<compile_context>
chip_gen: v6e
topology: v6e:2x2x1
jax: 0.10.0
libtpu: 0.0.40
codegen_flags: <defaults>
</compile_context>

<pallas_src>
import functools
import math

import jax
import jax.numpy as jnp
from jax.experimental import pallas as pl
from jax.experimental.pallas import tpu as pltpu


# ----------------------------------------------------------------------------
# In-kernel math helpers
# ----------------------------------------------------------------------------
_INV_SQRT2 = 0.7071067811865475


def _gelu_exact(x):
    """Exact (erf-based) GELU matching nn.GELU() default.

    erf is evaluated with the Abramowitz & Stegun 7.1.26 rational
    approximation (|abs err| <= 1.5e-7, i.e. float32-accurate) using only
    ops guaranteed to lower on TPU (mul/add/div/abs/exp/select).
    """
    z = x * _INV_SQRT2
    az = jnp.abs(z)
    t = 1.0 / (1.0 + 0.3275911 * az)
    poly = ((((1.061405429 * t - 1.453152027) * t + 1.421413741) * t
             - 0.284496736) * t + 0.254829592) * t
    erf_abs = 1.0 - poly * jnp.exp(-az * az)
    erf = jnp.where(z >= 0, erf_abs, -erf_abs)
    return 0.5 * x * (1.0 + erf)


# ----------------------------------------------------------------------------
# Fused Phi kernel (one batch element per grid step)
# ----------------------------------------------------------------------------
def _phi_kernel(x_ref, w1_ref, b1_ref, wd1_ref, wd2_ref, w4_ref, b4_ref,
                o_ref, pad_ref, *, H, W):
    """Shapes:
      x_ref   : (1, H*W, Cin)  f32   NHWC activations, flattened spatial
      w1_ref  : (Cin, E)       bf16  pointwise conv #1 (pre-transposed)
      b1_ref  : (1, E)         f32
      wd1_ref : (9, 1, 1, E)   f32   depthwise taps (ky*3 + kx major)
      wd2_ref : (9, 1, 1, E)   f32
      w4_ref  : (E, Cout)      bf16  pointwise conv #2 (pre-transposed)
      b4_ref  : (1, Cout)      f32
      o_ref   : (1, H*W, Cout) f32
      pad_ref : (H+2, W+16, E) f32   zero-padded scratch; interior starts at
                                     row 1 / col 8 so the store is sublane-aligned.
    """
    E = w1_ref.shape[1]
    col0 = 8  # sublane-aligned column where the W interior starts

    # ---- stage 1: 1x1 conv + bias (MXU, bf16 operands, f32 accumulate) -----
    x2d = x_ref[0]                                                   # [H*W, Cin]
    h = jnp.dot(x2d.astype(jnp.bfloat16), w1_ref[...],
                preferred_element_type=jnp.float32) + b1_ref[...]    # [H*W, E]

    # zero the halo scratch once per grid step (border stays zero afterwards)
    pad_ref[...] = jnp.zeros_like(pad_ref)

    def depthwise3x3(val, wd_ref):
        """val: [H, W, E] f32 -> 9-tap VPU MAC with zero padding = 1."""
        pad_ref[pl.ds(1, H), pl.ds(col0, W), :] = val
        acc = None
        for k in range(9):
            ky, kx = k // 3, k % 3
            tap = pad_ref[pl.ds(ky, H), pl.ds(col0 - 1 + kx, W), :] * wd_ref[k]
            acc = tap if acc is None else acc + tap
        return acc

    # ---- stage 2: depthwise 3x3 #1 (VPU) ------------------------------------
    d1 = depthwise3x3(h.reshape(H, W, E), wd1_ref)
    # ---- stage 3: exact GELU (VPU + EUP) ------------------------------------
    g = _gelu_exact(d1)
    # ---- stage 4: depthwise 3x3 #2 (VPU) ------------------------------------
    d2 = depthwise3x3(g, wd2_ref)

    # ---- stage 5: 1x1 conv + bias (MXU) -------------------------------------
    out = jnp.dot(d2.reshape(H * W, E).astype(jnp.bfloat16), w4_ref[...],
                  preferred_element_type=jnp.float32) + b4_ref[...]  # [H*W, Cout]
    o_ref[0] = out


def phi_forward(x_nchw, kp):
    """x_nchw: [N, dim+1, H, W] f32 -> [N, dim, H, W] f32 (matches Phi.forward)."""
    N, Cin, H, W = x_nchw.shape
    E = kp["w1"].shape[1]
    Cout = kp["w4"].shape[1]

    # layout glue only: NCHW -> NHWC with flattened spatial (channels in lanes)
    x = jnp.transpose(x_nchw, (0, 2, 3, 1)).reshape(N, H * W, Cin)

    out = pl.pallas_call(
        functools.partial(_phi_kernel, H=H, W=W),
        out_shape=jax.ShapeDtypeStruct((N, H * W, Cout), jnp.float32),
        grid=(N,),
        in_specs=[
            pl.BlockSpec((1, H * W, Cin), lambda n: (n, 0, 0)),
            pl.BlockSpec((Cin, E), lambda n: (0, 0)),
            pl.BlockSpec((1, E), lambda n: (0, 0)),
            pl.BlockSpec((9, 1, 1, E), lambda n: (0, 0, 0, 0)),
            pl.BlockSpec((9, 1, 1, E), lambda n: (0, 0, 0, 0)),
            pl.BlockSpec((E, Cout), lambda n: (0, 0)),
            pl.BlockSpec((1, Cout), lambda n: (0, 0)),
        ],
        out_specs=pl.BlockSpec((1, H * W, Cout), lambda n: (n, 0, 0)),
        scratch_shapes=[pltpu.VMEM((H + 2, W + 16, E), jnp.float32)],
        compiler_params=pltpu.CompilerParams(
            dimension_semantics=("parallel",)),
    )(x, kp["w1"], kp["b1"], kp["wd1"], kp["wd2"], kp["w4"], kp["b4"])

    return jnp.transpose(out.reshape(N, H, W, Cout), (0, 3, 1, 2))


# ----------------------------------------------------------------------------
# Parameters: synthetic PyTorch-shaped weights + one-time kernel prep
# ----------------------------------------------------------------------------
def init_phi_params(key, dim, embedding_dim):
    Cin, E = dim + 1, embedding_dim
    ks = jax.random.split(key, 6)

    def w(k, shape):
        fan_in = 1
        for d in shape[1:]:
            fan_in *= d
        return jax.random.normal(k, shape, jnp.float32) / math.sqrt(max(fan_in, 1))

    return {
        "conv1_w": w(ks[0], (E, Cin, 1, 1)),
        "conv1_b": 0.1 * jax.random.normal(ks[1], (E,), jnp.float32),
        "dw1_w":   w(ks[2], (E, 1, 3, 3)),
        "dw2_w":   w(ks[3], (E, 1, 3, 3)),
        "conv4_w": w(ks[4], (dim, E, 1, 1)),
        "conv4_b": 0.1 * jax.random.normal(ks[5], (dim,), jnp.float32),
    }


def prepare_kernel_params(raw):
    """One-time weight prep (outside jit): transpose to matmul layout, cast MXU
    operands to bf16, reshape depthwise taps to (9,1,1,E) f32."""
    def dw(wt):  # [E,1,3,3] -> [9,1,1,E], tap-major (ky*3 + kx)
        return (jnp.transpose(wt[:, 0, :, :], (1, 2, 0))
                .reshape(9, 1, 1, -1).astype(jnp.float32))

    return {
        "w1": jnp.transpose(raw["conv1_w"][:, :, 0, 0], (1, 0)).astype(jnp.bfloat16),
        "b1": raw["conv1_b"].reshape(1, -1).astype(jnp.float32),
        "wd1": dw(raw["dw1_w"]),
        "wd2": dw(raw["dw2_w"]),
        "w4": jnp.transpose(raw["conv4_w"][:, :, 0, 0], (1, 0)).astype(jnp.bfloat16),
        "b4": raw["conv4_b"].reshape(1, -1).astype(jnp.float32),
    }


def phi_reference(x_nchw, raw):
    """Plain-XLA float32 reference (lax convs + exact GELU) for validation."""
    dn = ("NCHW", "OIHW", "NCHW")
    E = raw["dw1_w"].shape[0]
    h = jax.lax.conv_general_dilated(x_nchw, raw["conv1_w"], (1, 1), "VALID",
                                     dimension_numbers=dn)
    h = h + raw["conv1_b"].reshape(1, -1, 1, 1)
    h = jax.lax.conv_general_dilated(h, raw["dw1_w"], (1, 1), ((1, 1), (1, 1)),
                                     dimension_numbers=dn, feature_group_count=E)
    h = jax.nn.gelu(h, approximate=False)
    h = jax.lax.conv_general_dilated(h, raw["dw2_w"], (1, 1), ((1, 1), (1, 1)),
                                     dimension_numbers=dn, feature_group_count=E)
    h = jax.lax.conv_general_dilated(h, raw["conv4_w"], (1, 1), "VALID",
                                     dimension_numbers=dn)
    return h + raw["conv4_b"].reshape(1, -1, 1, 1)


# ----------------------------------------------------------------------------
if __name__ == "__main__":
    B, DIM, EMB, H, W = 2, 4, 32, 16, 16     # input channels = DIM + 1 = 5
    key = jax.random.PRNGKey(0)
    kx, kparam = jax.random.split(key)
    x = jax.random.normal(kx, (B, DIM + 1, H, W), jnp.float32)

    raw = init_phi_params(kparam, dim=DIM, embedding_dim=EMB)
    kparams = prepare_kernel_params(raw)      # one-time weight prep (outside jit)

    fwd = jax.jit(phi_forward)
    out = fwd(x, kparams)
    jax.block_until_ready(out)
    assert out.shape == (B, DIM, H, W), out.shape

    # Sanity check vs plain-XLA f32 reference (relaxed: MXU operands are bf16).
    ref = phi_reference(x, raw)
    err = float(jnp.max(jnp.abs(out - ref)))
    assert err < 0.2, f"max abs error vs reference: {err}"

    print("KERNEL_OK")
</pallas_src>

<mosaic_0001>
module attributes {stable_mosaic.version = 11 : i64} {
  func.func @_phi_kernel(%arg0: i32, %arg1: memref<1x256x5xf32, #tpu.memory_space<vmem>>, %arg2: memref<5x32xbf16, #tpu.memory_space<vmem>>, %arg3: memref<1x32xf32, #tpu.memory_space<vmem>>, %arg4: memref<9x1x1x32xf32, #tpu.memory_space<vmem>>, %arg5: memref<9x1x1x32xf32, #tpu.memory_space<vmem>>, %arg6: memref<32x4xbf16, #tpu.memory_space<vmem>>, %arg7: memref<1x4xf32, #tpu.memory_space<vmem>>, %arg8: memref<1x256x4xf32, #tpu.memory_space<vmem>>, %arg9: memref<18x32x32xf32, #tpu.memory_space<vmem>>) attributes {dimension_semantics = [#tpu.dimension_semantics<parallel>], iteration_bounds = array<i64: 2>, scalar_prefetch = 0 : i64, scratch_operands = 1 : i64, tpu.core_type = #tpu.core_type<tc>, window_params = [{transform_indices = @transform_0, window_bounds = array<i64: 1, 256, 5>}, {pipeline_mode = #tpu.pipeline_mode<synchronous>, transform_indices = @transform_1, window_bounds = array<i64: 5, 32>}, {pipeline_mode = #tpu.pipeline_mode<synchronous>, transform_indices = @transform_2, window_bounds = array<i64: 1, 32>}, {pipeline_mode = #tpu.pipeline_mode<synchronous>, transform_indices = @transform_3, window_bounds = array<i64: 9, 1, 1, 32>}, {pipeline_mode = #tpu.pipeline_mode<synchronous>, transform_indices = @transform_4, window_bounds = array<i64: 9, 1, 1, 32>}, {pipeline_mode = #tpu.pipeline_mode<synchronous>, transform_indices = @transform_5, window_bounds = array<i64: 32, 4>}, {pipeline_mode = #tpu.pipeline_mode<synchronous>, transform_indices = @transform_6, window_bounds = array<i64: 1, 4>}, {transform_indices = @transform_7, window_bounds = array<i64: 1, 256, 4>}]} {
    %c0 = arith.constant 0 : index
    %c0_0 = arith.constant 0 : index
    %c0_1 = arith.constant 0 : index
    %0 = vector.load %arg1[%c0, %c0_0, %c0_1] : memref<1x256x5xf32, #tpu.memory_space<vmem>>, vector<1x256x5xf32>
    %1 = vector.shape_cast %0 : vector<1x256x5xf32> to vector<256x5xf32>
    %2 = arith.truncf %1 : vector<256x5xf32> to vector<256x5xbf16>
    %c0_2 = arith.constant 0 : index
    %c0_3 = arith.constant 0 : index
    %3 = vector.load %arg2[%c0_2, %c0_3] : memref<5x32xbf16, #tpu.memory_space<vmem>>, vector<5x32xbf16>
    %cst = arith.constant dense<0.000000e+00> : vector<256x32xf32>
    %4 = tpu.matmul %2, %3, %cst {dimension_numbers = #tpu.dot_dimension_numbers<[1], [0], [0], [1], [0, 0, 1, 1], [], []>} : vector<256x5xbf16>, vector<5x32xbf16>, vector<256x32xf32> -> vector<256x32xf32>
    %c0_4 = arith.constant 0 : index
    %c0_5 = arith.constant 0 : index
    %5 = vector.load %arg3[%c0_4, %c0_5] : memref<1x32xf32, #tpu.memory_space<vmem>>, vector<1x32xf32>
    %6 = vector.broadcast %5 : vector<1x32xf32> to vector<256x32xf32>
    %7 = arith.addf %4, %6 : vector<256x32xf32>
    %cst_6 = arith.constant 0.000000e+00 : f32
    %8 = vector.broadcast %cst_6 : f32 to vector<18x32x32xf32>
    %c0_7 = arith.constant 0 : index
    %c0_8 = arith.constant 0 : index
    %c0_9 = arith.constant 0 : index
    %9 = vector.load %arg9[%c0_7, %c0_8, %c0_9] : memref<18x32x32xf32, #tpu.memory_space<vmem>>, vector<18x32x32xf32>
    tpu.vector_store %arg9[%c0_7, %c0_8, %c0_9], %8 {strides = array<i32>} : memref<18x32x32xf32, #tpu.memory_space<vmem>>, vector<18x32x32xf32>,
    %10 = vector.shape_cast %7 : vector<256x32xf32> to vector<16x16x32xf32>
    %c1 = arith.constant 1 : index
    %c8 = arith.constant 8 : index
    %c0_10 = arith.constant 0 : index
    %11 = vector.load %arg9[%c1, %c8, %c0_10] : memref<18x32x32xf32, #tpu.memory_space<vmem>>, vector<16x16x32xf32>
    tpu.vector_store %arg9[%c1, %c8, %c0_10], %10 {strides = array<i32>} : memref<18x32x32xf32, #tpu.memory_space<vmem>>, vector<16x16x32xf32>,
    %c0_11 = arith.constant 0 : index
    %c7 = arith.constant 7 : index
    %c0_12 = arith.constant 0 : index
    %12 = vector.load %arg9[%c0_11, %c7, %c0_12] : memref<18x32x32xf32, #tpu.memory_space<vmem>>, vector<16x16x32xf32>
    %c0_13 = arith.constant 0 : index
    %c0_14 = arith.constant 0 : index
    %c0_15 = arith.constant 0 : index
    %c0_16 = arith.constant 0 : index
    %13 = vector.load %arg4[%c0_13, %c0_14, %c0_15, %c0_16] : memref<9x1x1x32xf32, #tpu.memory_space<vmem>>, vector<1x1x1x32xf32>
    %14 = vector.shape_cast %13 : vector<1x1x1x32xf32> to vector<1x1x32xf32>
    %15 = vector.broadcast %14 : vector<1x1x32xf32> to vector<16x16x32xf32>
    %16 = arith.mulf %12, %15 : vector<16x16x32xf32>
    %c0_17 = arith.constant 0 : index
    %c8_18 = arith.constant 8 : index
    %c0_19 = arith.constant 0 : index
    %17 = vector.load %arg9[%c0_17, %c8_18, %c0_19] : memref<18x32x32xf32, #tpu.memory_space<vmem>>, vector<16x16x32xf32>
    %c1_20 = arith.constant 1 : index
    %c0_21 = arith.constant 0 : index
    %c0_22 = arith.constant 0 : index
    %c0_23 = arith.constant 0 : index
    %18 = vector.load %arg4[%c1_20, %c0_21, %c0_22, %c0_23] : memref<9x1x1x32xf32, #tpu.memory_space<vmem>>, vector<1x1x1x32xf32>
    %19 = vector.shape_cast %18 : vector<1x1x1x32xf32> to vector<1x1x32xf32>
    %20 = vector.broadcast %19 : vector<1x1x32xf32> to vector<16x16x32xf32>
    %21 = arith.mulf %17, %20 : vector<16x16x32xf32>
    %22 = arith.addf %16, %21 : vector<16x16x32xf32>
    %c0_24 = arith.constant 0 : index
    %c9 = arith.constant 9 : index
    %c0_25 = arith.constant 0 : index
    %23 = vector.load %arg9[%c0_24, %c9, %c0_25] : memref<18x32x32xf32, #tpu.memory_space<vmem>>, vector<16x16x32xf32>
    %c2 = arith.constant 2 : index
    %c0_26 = arith.constant 0 : index
    %c0_27 = arith.constant 0 : index
    %c0_28 = arith.constant 0 : index
    %24 = vector.load %arg4[%c2, %c0_26, %c0_27, %c0_28] : memref<9x1x1x32xf32, #tpu.memory_space<vmem>>, vector<1x1x1x32xf32>
    %25 = vector.shape_cast %24 : vector<1x1x1x32xf32> to vector<1x1x32xf32>
    %26 = vector.broadcast %25 : vector<1x1x32xf32> to vector<16x16x32xf32>
    %27 = arith.mulf %23, %26 : vector<16x16x32xf32>
    %28 = arith.addf %22, %27 : vector<16x16x32xf32>
    %c1_29 = arith.constant 1 : index
    %c7_30 = arith.constant 7 : index
    %c0_31 = arith.constant 0 : index
    %29 = vector.load %arg9[%c1_29, %c7_30, %c0_31] : memref<18x32x32xf32, #tpu.memory_space<vmem>>, vector<16x16x32xf32>
    %c3 = arith.constant 3 : index
    %c0_32 = arith.constant 0 : index
    %c0_33 = arith.constant 0 : index
    %c0_34 = arith.constant 0 : index
    %30 = vector.load %arg4[%c3, %c0_32, %c0_33, %c0_34] : memref<9x1x1x32xf32, #tpu.memory_space<vmem>>, vector<1x1x1x32xf32>
    %31 = vector.shape_cast %30 : vector<1x1x1x32xf32> to vector<1x1x32xf32>
    %32 = vector.broadcast %31 : vector<1x1x32xf32> to vector<16x16x32xf32>
    %33 = arith.mulf %29, %32 : vector<16x16x32xf32>
    %34 = arith.addf %28, %33 : vector<16x16x32xf32>
    %c1_35 = arith.constant 1 : index
    %c8_36 = arith.constant 8 : index
    %c0_37 = arith.constant 0 : index
    %35 = vector.load %arg9[%c1_35, %c8_36, %c0_37] : memref<18x32x32xf32, #tpu.memory_space<vmem>>, vector<16x16x32xf32>
    %c4 = arith.constant 4 : index
    %c0_38 = arith.constant 0 : index
    %c0_39 = arith.constant 0 : index
    %c0_40 = arith.constant 0 : index
    %36 = vector.load %arg4[%c4, %c0_38, %c0_39, %c0_40] : memref<9x1x1x32xf32, #tpu.memory_space<vmem>>, vector<1x1x1x32xf32>
    %37 = vector.shape_cast %36 : vector<1x1x1x32xf32> to vector<1x1x32xf32>
    %38 = vector.broadcast %37 : vector<1x1x32xf32> to vector<16x16x32xf32>
    %39 = arith.mulf %35, %38 : vector<16x16x32xf32>
    %40 = arith.addf %34, %39 : vector<16x16x32xf32>
    %c1_41 = arith.constant 1 : index
    %c9_42 = arith.constant 9 : index
    %c0_43 = arith.constant 0 : index
    %41 = vector.load %arg9[%c1_41, %c9_42, %c0_43] : memref<18x32x32xf32, #tpu.memory_space<vmem>>, vector<16x16x32xf32>
    %c5 = arith.constant 5 : index
    %c0_44 = arith.constant 0 : index
    %c0_45 = arith.constant 0 : index
    %c0_46 = arith.constant 0 : index
    %42 = vector.load %arg4[%c5, %c0_44, %c0_45, %c0_46] : memref<9x1x1x32xf32, #tpu.memory_space<vmem>>, vector<1x1x1x32xf32>
    %43 = vector.shape_cast %42 : vector<1x1x1x32xf32> to vector<1x1x32xf32>
    %44 = vector.broadcast %43 : vector<1x1x32xf32> to vector<16x16x32xf32>
    %45 = arith.mulf %41, %44 : vector<16x16x32xf32>
    %46 = arith.addf %40, %45 : vector<16x16x32xf32>
    %c2_47 = arith.constant 2 : index
    %c7_48 = arith.constant 7 : index
    %c0_49 = arith.constant 0 : index
    %47 = vector.load %arg9[%c2_47, %c7_48, %c0_49] : memref<18x32x32xf32, #tpu.memory_space<vmem>>, vector<16x16x32xf32>
    %c6 = arith.constant 6 : index
    %c0_50 = arith.constant 0 : index
    %c0_51 = arith.constant 0 : index
    %c0_52 = arith.constant 0 : index
    %48 = vector.load %arg4[%c6, %c0_50, %c0_51, %c0_52] : memref<9x1x1x32xf32, #tpu.memory_space<vmem>>, vector<1x1x1x32xf32>
    %49 = vector.shape_cast %48 : vector<1x1x1x32xf32> to vector<1x1x32xf32>
    %50 = vector.broadcast %49 : vector<1x1x32xf32> to vector<16x16x32xf32>
    %51 = arith.mulf %47, %50 : vector<16x16x32xf32>
    %52 = arith.addf %46, %51 : vector<16x16x32xf32>
    %c2_53 = arith.constant 2 : index
    %c8_54 = arith.constant 8 : index
    %c0_55 = arith.constant 0 : index
    %53 = vector.load %arg9[%c2_53, %c8_54, %c0_55] : memref<18x32x32xf32, #tpu.memory_space<vmem>>, vector<16x16x32xf32>
    %c7_56 = arith.constant 7 : index
    %c0_57 = arith.constant 0 : index
    %c0_58 = arith.constant 0 : index
    %c0_59 = arith.constant 0 : index
    %54 = vector.load %arg4[%c7_56, %c0_57, %c0_58, %c0_59] : memref<9x1x1x32xf32, #tpu.memory_space<vmem>>, vector<1x1x1x32xf32>
    %55 = vector.shape_cast %54 : vector<1x1x1x32xf32> to vector<1x1x32xf32>
    %56 = vector.broadcast %55 : vector<1x1x32xf32> to vector<16x16x32xf32>
    %57 = arith.mulf %53, %56 : vector<16x16x32xf32>
    %58 = arith.addf %52, %57 : vector<16x16x32xf32>
    %c2_60 = arith.constant 2 : index
    %c9_61 = arith.constant 9 : index
    %c0_62 = arith.constant 0 : index
    %59 = vector.load %arg9[%c2_60, %c9_61, %c0_62] : memref<18x32x32xf32, #tpu.memory_space<vmem>>, vector<16x16x32xf32>
    %c8_63 = arith.constant 8 : index
    %c0_64 = arith.constant 0 : index
    %c0_65 = arith.constant 0 : index
    %c0_66 = arith.constant 0 : index
    %60 = vector.load %arg4[%c8_63, %c0_64, %c0_65, %c0_66] : memref<9x1x1x32xf32, #tpu.memory_space<vmem>>, vector<1x1x1x32xf32>
    %61 = vector.shape_cast %60 : vector<1x1x1x32xf32> to vector<1x1x32xf32>
    %62 = vector.broadcast %61 : vector<1x1x32xf32> to vector<16x16x32xf32>
    %63 = arith.mulf %59, %62 : vector<16x16x32xf32>
    %64 = arith.addf %58, %63 : vector<16x16x32xf32>
    %cst_67 = arith.constant 0.707106769 : f32
    %65 = vector.broadcast %cst_67 : f32 to vector<16x16x32xf32>
    %66 = arith.mulf %64, %65 : vector<16x16x32xf32>
    %67 = math.absf %66 : vector<16x16x32xf32>
    %cst_68 = arith.constant 0.327591091 : f32
    %68 = vector.broadcast %cst_68 : f32 to vector<16x16x32xf32>
    %69 = arith.mulf %68, %67 : vector<16x16x32xf32>
    %cst_69 = arith.constant 1.000000e+00 : f32
    %70 = vector.broadcast %cst_69 : f32 to vector<16x16x32xf32>
    %71 = arith.addf %70, %69 : vector<16x16x32xf32>
    %cst_70 = arith.constant 1.000000e+00 : f32
    %72 = vector.broadcast %cst_70 : f32 to vector<16x16x32xf32>
    %73 = arith.divf %72, %71 : vector<16x16x32xf32>
    %cst_71 = arith.constant 1.06140542 : f32
    %74 = vector.broadcast %cst_71 : f32 to vector<16x16x32xf32>
    %75 = arith.mulf %74, %73 : vector<16x16x32xf32>
    %cst_72 = arith.constant 1.45315206 : f32
    %76 = vector.broadcast %cst_72 : f32 to vector<16x16x32xf32>
    %77 = arith.subf %75, %76 : vector<16x16x32xf32>
    %78 = arith.mulf %77, %73 : vector<16x16x32xf32>
    %cst_73 = arith.constant 1.42141378 : f32
    %79 = vector.broadcast %cst_73 : f32 to vector<16x16x32xf32>
    %80 = arith.addf %78, %79 : vector<16x16x32xf32>
    %81 = arith.mulf %80, %73 : vector<16x16x32xf32>
    %cst_74 = arith.constant 0.284496725 : f32
    %82 = vector.broadcast %cst_74 : f32 to vector<16x16x32xf32>
    %83 = arith.subf %81, %82 : vector<16x16x32xf32>
    %84 = arith.mulf %83, %73 : vector<16x16x32xf32>
    %cst_75 = arith.constant 0.254829586 : f32
    %85 = vector.broadcast %cst_75 : f32 to vector<16x16x32xf32>
    %86 = arith.addf %84, %85 : vector<16x16x32xf32>
    %87 = arith.mulf %86, %73 : vector<16x16x32xf32>
    %cst_76 = arith.constant 0.000000e+00 : f32
    %88 = vector.broadcast %cst_76 : f32 to vector<16x16x32xf32>
    %89 = arith.subf %88, %67 : vector<16x16x32xf32>
    %90 = arith.mulf %89, %67 : vector<16x16x32xf32>
    %91 = math.exp %90 : vector<16x16x32xf32>
    %92 = arith.mulf %87, %91 : vector<16x16x32xf32>
    %cst_77 = arith.constant 1.000000e+00 : f32
    %93 = vector.broadcast %cst_77 : f32 to vector<16x16x32xf32>
    %94 = arith.subf %93, %92 : vector<16x16x32xf32>
    %cst_78 = arith.constant 0.000000e+00 : f32
    %95 = vector.broadcast %cst_78 : f32 to vector<16x16x32xf32>
    %96 = arith.cmpf oge, %66, %95 : vector<16x16x32xf32>
    %cst_79 = arith.constant 0.000000e+00 : f32
    %97 = vector.broadcast %cst_79 : f32 to vector<16x16x32xf32>
    %98 = arith.subf %97, %94 : vector<16x16x32xf32>
    %99 = arith.select %96, %94, %98 : vector<16x16x32xi1>, vector<16x16x32xf32>
    %cst_80 = arith.constant 5.000000e-01 : f32
    %100 = vector.broadcast %cst_80 : f32 to vector<16x16x32xf32>
    %101 = arith.mulf %100, %64 : vector<16x16x32xf32>
    %cst_81 = arith.constant 1.000000e+00 : f32
    %102 = vector.broadcast %cst_81 : f32 to vector<16x16x32xf32>
    %103 = arith.addf %102, %99 : vector<16x16x32xf32>
    %104 = arith.mulf %101, %103 : vector<16x16x32xf32>
    %c1_82 = arith.constant 1 : index
    %c8_83 = arith.constant 8 : index
    %c0_84 = arith.constant 0 : index
    %105 = vector.load %arg9[%c1_82, %c8_83, %c0_84] : memref<18x32x32xf32, #tpu.memory_space<vmem>>, vector<16x16x32xf32>
    tpu.vector_store %arg9[%c1_82, %c8_83, %c0_84], %104 {strides = array<i32>} : memref<18x32x32xf32, #tpu.memory_space<vmem>>, vector<16x16x32xf32>,
    %c0_85 = arith.constant 0 : index
    %c7_86 = arith.constant 7 : index
    %c0_87 = arith.constant 0 : index
    %106 = vector.load %arg9[%c0_85, %c7_86, %c0_87] : memref<18x32x32xf32, #tpu.memory_space<vmem>>, vector<16x16x32xf32>
    %c0_88 = arith.constant 0 : index
    %c0_89 = arith.constant 0 : index
    %c0_90 = arith.constant 0 : index
    %c0_91 = arith.constant 0 : index
    %107 = vector.load %arg5[%c0_88, %c0_89, %c0_90, %c0_91] : memref<9x1x1x32xf32, #tpu.memory_space<vmem>>, vector<1x1x1x32xf32>
    %108 = vector.shape_cast %107 : vector<1x1x1x32xf32> to vector<1x1x32xf32>
    %109 = vector.broadcast %108 : vector<1x1x32xf32> to vector<16x16x32xf32>
    %110 = arith.mulf %106, %109 : vector<16x16x32xf32>
    %c0_92 = arith.constant 0 : index
    %c8_93 = arith.constant 8 : index
    %c0_94 = arith.constant 0 : index
    %111 = vector.load %arg9[%c0_92, %c8_93, %c0_94] : memref<18x32x32xf32, #tpu.memory_space<vmem>>, vector<16x16x32xf32>
    %c1_95 = arith.constant 1 : index
    %c0_96 = arith.constant 0 : index
    %c0_97 = arith.constant 0 : index
    %c0_98 = arith.constant 0 : index
    %112 = vector.load %arg5[%c1_95, %c0_96, %c0_97, %c0_98] : memref<9x1x1x32xf32, #tpu.memory_space<vmem>>, vector<1x1x1x32xf32>
    %113 = vector.shape_cast %112 : vector<1x1x1x32xf32> to vector<1x1x32xf32>
    %114 = vector.broadcast %113 : vector<1x1x32xf32> to vector<16x16x32xf32>
    %115 = arith.mulf %111, %114 : vector<16x16x32xf32>
    %116 = arith.addf %110, %115 : vector<16x16x32xf32>
    %c0_99 = arith.constant 0 : index
    %c9_100 = arith.constant 9 : index
    %c0_101 = arith.constant 0 : index
    %117 = vector.load %arg9[%c0_99, %c9_100, %c0_101] : memref<18x32x32xf32, #tpu.memory_space<vmem>>, vector<16x16x32xf32>
    %c2_102 = arith.constant 2 : index
    %c0_103 = arith.constant 0 : index
    %c0_104 = arith.constant 0 : index
    %c0_105 = arith.constant 0 : index
    %118 = vector.load %arg5[%c2_102, %c0_103, %c0_104, %c0_105] : memref<9x1x1x32xf32, #tpu.memory_space<vmem>>, vector<1x1x1x32xf32>
    %119 = vector.shape_cast %118 : vector<1x1x1x32xf32> to vector<1x1x32xf32>
    %120 = vector.broadcast %119 : vector<1x1x32xf32> to vector<16x16x32xf32>
    %121 = arith.mulf %117, %120 : vector<16x16x32xf32>
    %122 = arith.addf %116, %121 : vector<16x16x32xf32>
    %c1_106 = arith.constant 1 : index
    %c7_107 = arith.constant 7 : index
    %c0_108 = arith.constant 0 : index
    %123 = vector.load %arg9[%c1_106, %c7_107, %c0_108] : memref<18x32x32xf32, #tpu.memory_space<vmem>>, vector<16x16x32xf32>
    %c3_109 = arith.constant 3 : index
    %c0_110 = arith.constant 0 : index
    %c0_111 = arith.constant 0 : index
    %c0_112 = arith.constant 0 : index
    %124 = vector.load %arg5[%c3_109, %c0_110, %c0_111, %c0_112] : memref<9x1x1x32xf32, #tpu.memory_space<vmem>>, vector<1x1x1x32xf32>
    %125 = vector.shape_cast %124 : vector<1x1x1x32xf32> to vector<1x1x32xf32>
    %126 = vector.broadcast %125 : vector<1x1x32xf32> to vector<16x16x32xf32>
    %127 = arith.mulf %123, %126 : vector<16x16x32xf32>
    %128 = arith.addf %122, %127 : vector<16x16x32xf32>
    %c1_113 = arith.constant 1 : index
    %c8_114 = arith.constant 8 : index
    %c0_115 = arith.constant 0 : index
    %129 = vector.load %arg9[%c1_113, %c8_114, %c0_115] : memref<18x32x32xf32, #tpu.memory_space<vmem>>, vector<16x16x32xf32>
    %c4_116 = arith.constant 4 : index
    %c0_117 = arith.constant 0 : index
    %c0_118 = arith.constant 0 : index
    %c0_119 = arith.constant 0 : index
    %130 = vector.load %arg5[%c4_116, %c0_117, %c0_118, %c0_119] : memref<9x1x1x32xf32, #tpu.memory_space<vmem>>, vector<1x1x1x32xf32>
    %131 = vector.shape_cast %130 : vector<1x1x1x32xf32> to vector<1x1x32xf32>
    %132 = vector.broadcast %131 : vector<1x1x32xf32> to vector<16x16x32xf32>
    %133 = arith.mulf %129, %132 : vector<16x16x32xf32>
    %134 = arith.addf %128, %133 : vector<16x16x32xf32>
    %c1_120 = arith.constant 1 : index
    %c9_121 = arith.constant 9 : index
    %c0_122 = arith.constant 0 : index
    %135 = vector.load %arg9[%c1_120, %c9_121, %c0_122] : memref<18x32x32xf32, #tpu.memory_space<vmem>>, vector<16x16x32xf32>
    %c5_123 = arith.constant 5 : index
    %c0_124 = arith.constant 0 : index
    %c0_125 = arith.constant 0 : index
    %c0_126 = arith.constant 0 : index
    %136 = vector.load %arg5[%c5_123, %c0_124, %c0_125, %c0_126] : memref<9x1x1x32xf32, #tpu.memory_space<vmem>>, vector<1x1x1x32xf32>
    %137 = vector.shape_cast %136 : vector<1x1x1x32xf32> to vector<1x1x32xf32>
    %138 = vector.broadcast %137 : vector<1x1x32xf32> to vector<16x16x32xf32>
    %139 = arith.mulf %135, %138 : vector<16x16x32xf32>
    %140 = arith.addf %134, %139 : vector<16x16x32xf32>
    %c2_127 = arith.constant 2 : index
    %c7_128 = arith.constant 7 : index
    %c0_129 = arith.constant 0 : index
    %141 = vector.load %arg9[%c2_127, %c7_128, %c0_129] : memref<18x32x32xf32, #tpu.memory_space<vmem>>, vector<16x16x32xf32>
    %c6_130 = arith.constant 6 : index
    %c0_131 = arith.constant 0 : index
    %c0_132 = arith.constant 0 : index
    %c0_133 = arith.constant 0 : index
    %142 = vector.load %arg5[%c6_130, %c0_131, %c0_132, %c0_133] : memref<9x1x1x32xf32, #tpu.memory_space<vmem>>, vector<1x1x1x32xf32>
    %143 = vector.shape_cast %142 : vector<1x1x1x32xf32> to vector<1x1x32xf32>
    %144 = vector.broadcast %143 : vector<1x1x32xf32> to vector<16x16x32xf32>
    %145 = arith.mulf %141, %144 : vector<16x16x32xf32>
    %146 = arith.addf %140, %145 : vector<16x16x32xf32>
    %c2_134 = arith.constant 2 : index
    %c8_135 = arith.constant 8 : index
    %c0_136 = arith.constant 0 : index
    %147 = vector.load %arg9[%c2_134, %c8_135, %c0_136] : memref<18x32x32xf32, #tpu.memory_space<vmem>>, vector<16x16x32xf32>
    %c7_137 = arith.constant 7 : index
    %c0_138 = arith.constant 0 : index
    %c0_139 = arith.constant 0 : index
    %c0_140 = arith.constant 0 : index
    %148 = vector.load %arg5[%c7_137, %c0_138, %c0_139, %c0_140] : memref<9x1x1x32xf32, #tpu.memory_space<vmem>>, vector<1x1x1x32xf32>
    %149 = vector.shape_cast %148 : vector<1x1x1x32xf32> to vector<1x1x32xf32>
    %150 = vector.broadcast %149 : vector<1x1x32xf32> to vector<16x16x32xf32>
    %151 = arith.mulf %147, %150 : vector<16x16x32xf32>
    %152 = arith.addf %146, %151 : vector<16x16x32xf32>
    %c2_141 = arith.constant 2 : index
    %c9_142 = arith.constant 9 : index
    %c0_143 = arith.constant 0 : index
    %153 = vector.load %arg9[%c2_141, %c9_142, %c0_143] : memref<18x32x32xf32, #tpu.memory_space<vmem>>, vector<16x16x32xf32>
    %c8_144 = arith.constant 8 : index
    %c0_145 = arith.constant 0 : index
    %c0_146 = arith.constant 0 : index
    %c0_147 = arith.constant 0 : index
    %154 = vector.load %arg5[%c8_144, %c0_145, %c0_146, %c0_147] : memref<9x1x1x32xf32, #tpu.memory_space<vmem>>, vector<1x1x1x32xf32>
    %155 = vector.shape_cast %154 : vector<1x1x1x32xf32> to vector<1x1x32xf32>
    %156 = vector.broadcast %155 : vector<1x1x32xf32> to vector<16x16x32xf32>
    %157 = arith.mulf %153, %156 : vector<16x16x32xf32>
    %158 = arith.addf %152, %157 : vector<16x16x32xf32>
    %159 = vector.shape_cast %158 : vector<16x16x32xf32> to vector<256x32xf32>
    %160 = arith.truncf %159 : vector<256x32xf32> to vector<256x32xbf16>
    %c0_148 = arith.constant 0 : index
    %c0_149 = arith.constant 0 : index
    %161 = vector.load %arg6[%c0_148, %c0_149] : memref<32x4xbf16, #tpu.memory_space<vmem>>, vector<32x4xbf16>
    %cst_150 = arith.constant dense<0.000000e+00> : vector<256x4xf32>
    %162 = tpu.matmul %160, %161, %cst_150 {dimension_numbers = #tpu.dot_dimension_numbers<[1], [0], [0], [1], [0, 0, 1, 1], [], []>} : vector<256x32xbf16>, vector<32x4xbf16>, vector<256x4xf32> -> vector<256x4xf32>
    %c0_151 = arith.constant 0 : index
    %c0_152 = arith.constant 0 : index
    %163 = vector.load %arg7[%c0_151, %c0_152] : memref<1x4xf32, #tpu.memory_space<vmem>>, vector<1x4xf32>
    %164 = vector.broadcast %163 : vector<1x4xf32> to vector<256x4xf32>
    %165 = arith.addf %162, %164 : vector<256x4xf32>
    %c0_153 = arith.constant 0 : index
    %c0_154 = arith.constant 0 : index
    %c0_155 = arith.constant 0 : index
    %166 = vector.load %arg8[%c0_153, %c0_154, %c0_155] : memref<1x256x4xf32, #tpu.memory_space<vmem>>, vector<1x256x4xf32>
    %167 = vector.shape_cast %166 : vector<1x256x4xf32> to vector<256x4xf32>
    %168 = vector.shape_cast %165 : vector<256x4xf32> to vector<1x256x4xf32>
    tpu.vector_store %arg8[%c0_153, %c0_154, %c0_155], %168 {strides = array<i32>} : memref<1x256x4xf32, #tpu.memory_space<vmem>>, vector<1x256x4xf32>,
    return
  }
  func.func @transform_0(%arg0: i32) -> (i32, i32, i32) {
    %c0_i32 = arith.constant 0 : i32
    %c0_i32_0 = arith.constant 0 : i32
    %c0_i32_1 = arith.constant 0 : i32
    return %arg0, %c0_i32, %c0_i32_0 : i32, i32, i32
  }
  func.func @transform_1(%arg0: i32) -> (i32, i32) {
    %c0_i32 = arith.constant 0 : i32
    %c0_i32_0 = arith.constant 0 : i32
    %c0_i32_1 = arith.constant 0 : i32
    return %c0_i32, %c0_i32_0 : i32, i32
  }
  func.func @transform_2(%arg0: i32) -> (i32, i32) {
    %c0_i32 = arith.constant 0 : i32
    %c0_i32_0 = arith.constant 0 : i32
    %c0_i32_1 = arith.constant 0 : i32
    return %c0_i32, %c0_i32_0 : i32, i32
  }
  func.func @transform_3(%arg0: i32) -> (i32, i32, i32, i32) {
    %c0_i32 = arith.constant 0 : i32
    %c0_i32_0 = arith.constant 0 : i32
    %c0_i32_1 = arith.constant 0 : i32
    %c0_i32_2 = arith.constant 0 : i32
    %c0_i32_3 = arith.constant 0 : i32
    return %c0_i32, %c0_i32_0, %c0_i32_1, %c0_i32_2 : i32, i32, i32, i32
  }
  func.func @transform_4(%arg0: i32) -> (i32, i32, i32, i32) {
    %c0_i32 = arith.constant 0 : i32
    %c0_i32_0 = arith.constant 0 : i32
    %c0_i32_1 = arith.constant 0 : i32
    %c0_i32_2 = arith.constant 0 : i32
    %c0_i32_3 = arith.constant 0 : i32
    return %c0_i32, %c0_i32_0, %c0_i32_1, %c0_i32_2 : i32, i32, i32, i32
  }
  func.func @transform_5(%arg0: i32) -> (i32, i32) {
    %c0_i32 = arith.constant 0 : i32
    %c0_i32_0 = arith.constant 0 : i32
    %c0_i32_1 = arith.constant 0 : i32
    return %c0_i32, %c0_i32_0 : i32, i32
  }
  func.func @transform_6(%arg0: i32) -> (i32, i32) {
    %c0_i32 = arith.constant 0 : i32
    %c0_i32_0 = arith.constant 0 : i32
    %c0_i32_1 = arith.constant 0 : i32
    return %c0_i32, %c0_i32_0 : i32, i32
  }
  func.func @transform_7(%arg0: i32) -> (i32, i32, i32) {
    %c0_i32 = arith.constant 0 : i32
    %c0_i32_0 = arith.constant 0 : i32
    %c0_i32_1 = arith.constant 0 : i32
    return %arg0, %c0_i32, %c0_i32_0 : i32, i32, i32
  }
}

</mosaic_0001>

<bundles_post_ra>
// kernel: phi_forward.1
= control target key start
LH: loop header
LB: loop body
LE: loop exit
PB: predicated region body
PF: predicated region fallthrough
CT: control target
= control target key end

     0   :  { %s4168_s24 = smov 0   ;;  %s6638_s0 = inlined_call_operand.vmem [shape: f32[2,256,5], index: 0, kind: input, shape index: {}]   ;;  %s6639_s1 = inlined_call_operand.vmem [shape: bf16[5,32], index: 1, kind: input, shape index: {}]   ;;  %s6640_s2 = inlined_call_operand.vmem [shape: f32[1,32], index: 2, kind: input, shape index: {}]   ;;  %s6641_s3 = inlined_call_operand.vmem [shape: f32[9,1,1,32], index: 3, kind: input, shape index: {}]   ;;  %s6642_s4 = inlined_call_operand.vmem [shape: f32[9,1,1,32], index: 4, kind: input, shape index: {}]   ;;  %s6643_s5 = inlined_call_operand.vmem [shape: bf16[32,4], index: 5, kind: input, shape index: {}]   ;;  %s6644_s6 = inlined_call_operand.vmem [shape: f32[1,4], index: 6, kind: input, shape index: {}]   ;;  %s6645_s7 = inlined_call_operand.vmem [shape: f32[2,256,4], index: 7, kind: output, shape index: {}]  }
   0x1 LB: > { %s3698_s25 = sadd.s32 4294967295, %s4124_s24   ;;  %p3702_p0 = scmp.ge.s32.totalorder %s4124_s24, 1  ;;  %s4124_s24 = sphi %s4168_s24, %s17_s24  }
   0x2   : > { %p237_p1 = scmp.lt.s32.totalorder %s4124_s24, 3 }
   0x4   : > { %p238_p2 = pnand %p3702_p0, %p237_p1 }
   0x6   : > { %241 = sbr.rel (%p238_p2) target bundleno = 924 (0x39c), region = 48 }
   0xb   : > { %v328_v0 = vld [vmem:[%s6639_s1] sm:$0x7]  ;;  %vm385_vm0 = vcmask 1041408   ;;  %vm386_vm1 = vcmask 1042432   ;;  %p269_p3 = scmp.lt.s32.totalorder %s3698_s25, 1  ;;  %v4126_v1 = vmov 65535  }
   0xc   : > { %v387_v2 = vsel %vm385_vm0, 4294967295, %v4126_v1  ;;  %vm336_vm2 = vcmask 39936   ;;  %vm553_vm3 = vcmask 261120   ;;  %v4127_v53 = vmov 0.0   ;;  %v4384_v54 = vld [vmem:[%s6640_s2] ss:$0 sm:$0xff] }
   0xd   : > { %v388_v3 = vsel %vm386_vm1, %v387_v2, 0  ;;  %s6728_s25 = smov (!%p269_p3, %s3698_s25), 1  ;;  %562 = vst.msk [vmem:[#allocation2 + $0x40] sm:$0xff] %vm553_vm3, %v4127_v53  ;;  %563 = vst.msk [vmem:[#allocation2 + $0x48] sm:$0xff] %vm553_vm3, %v4127_v53  ;;  %v4389_v55 = vld [vmem:[%s6641_s3] ss:$0 sm:$0xff] }
   0xe   : > { %v390_v4 = vand.u32 %v388_v3, %v328_v0  ;;  %s3843_s28 = sshll.u32 %s6728_s25, 8  ;;  %554 = vst.msk [vmem:[#allocation2] sm:$0xff] %vm553_vm3, %v4127_v53  ;;  %555 = vst.msk [vmem:[#allocation2 + $0x8] sm:$0xff] %vm553_vm3, %v4127_v53  ;;  %v4394_v57 = vld [vmem:[%s6641_s3 + $0x1] ss:$0 sm:$0xff] }
   0xf   : > { %s4187_s8 = scalar_lea.vmem %s6638_s0, %s3843_s28  ;;  %556 = vst.msk [vmem:[#allocation2 + $0x10] sm:$0xff] %vm553_vm3, %v4127_v53  ;;  %557 = vst.msk [vmem:[#allocation2 + $0x18] sm:$0xff] %vm553_vm3, %v4127_v53  ;;  %v4404_v2 = vld [vmem:[%s6641_s3 + $0x2] ss:$0 sm:$0xff]  ;;  %s6537_s11 = scalar_lea.vmem %s6645_s7, %s3843_s28 }
  0x10   : > { %3880 = vmatprep.subr.bf16.mxu0 %v390_v4  ;;  %v280_v5 = vld [vmem:[%s4187_s8] sm:$0xff]  ;;  %v281_v6 = vld [vmem:[%s4187_s8 + $0x8] sm:$0xff]  ;;  %v282_v7 = vld [vmem:[%s4187_s8 + $0x10] sm:$0xff]  ;;  %558 = vst.msk [vmem:[#allocation2 + $0x20] sm:$0xff] %vm553_vm3, %v4127_v53 }
  0x11   : > { %3881 = vmatpush3.bf16.msra.mxu0 %v390_v4  ;;  %v312_v8 = vpack.c.bf16 %v281_v6, %v280_v5  ;;  %v283_v9 = vld [vmem:[%s4187_s8 + $0x18] sm:$0xff]  ;;  %v284_v10 = vld [vmem:[%s4187_s8 + $0x20] sm:$0xff]  ;;  %v285_v11 = vld [vmem:[%s4187_s8 + $0x28] sm:$0xff]  ;;  %559 = vst.msk [vmem:[#allocation2 + $0x28] sm:$0xff] %vm553_vm3, %v4127_v53 }
  0x12   : > { %v313_v12 = vpack.c.bf16 %v283_v9, %v282_v7  ;;  %v314_v13 = vpack.c.bf16 %v285_v11, %v284_v10  ;;  %v286_v14 = vld [vmem:[%s4187_s8 + $0x30] sm:$0xff]  ;;  %v287_v15 = vld [vmem:[%s4187_s8 + $0x38] sm:$0xff]  ;;  %v288_v16 = vld [vmem:[%s4187_s8 + $0x40] sm:$0xff]  ;;  %560 = vst.msk [vmem:[#allocation2 + $0x30] sm:$0xff] %vm553_vm3, %v4127_v53 }
  0x13   : > { %3882 = vmatprep.mubr.msk.bf16.mxu0 %vm336_vm2, %v312_v8  ;;  %v289_v17 = vld [vmem:[%s4187_s8 + $0x48] sm:$0xff]  ;;  %v315_v18 = vpack.c.bf16 %v287_v15, %v286_v14  ;;  %v290_v20 = vld [vmem:[%s4187_s8 + $0x50] sm:$0xff]  ;;  %v291_v21 = vld [vmem:[%s4187_s8 + $0x58] sm:$0xff]  ;;  %561 = vst.msk [vmem:[#allocation2 + $0x38] sm:$0xff] %vm553_vm3, %v4127_v53 }
  0x14   : > { %3883 = vmatmul.mubr.msk.bf16.vlgmr.msra.gmra.mxu0 %vm336_vm2, %v313_v12  ;;  %v316_v19 = vpack.c.bf16 %v289_v17, %v288_v16  ;;  %v292_v22 = vld [vmem:[%s4187_s8 + $0x60] sm:$0xff]  ;;  %v293_v23 = vld [vmem:[%s4187_s8 + $0x68] sm:$0xff]  ;;  %v317_v24 = vpack.c.bf16 %v291_v21, %v290_v20  ;;  %v294_v26 = vld [vmem:[%s4187_s8 + $0x70] sm:$0xff]  ;;  %564 = vst.msk [vmem:[#allocation2 + $0x50] sm:$0xff] %vm553_vm3, %v4127_v53 }
  0x15   : > { %3886 = vmatprep.mubr.msk.bf16.mxu0 %vm336_vm2, %v314_v13  ;;  %v318_v25 = vpack.c.bf16 %v293_v23, %v292_v22  ;;  %v295_v27 = vld [vmem:[%s4187_s8 + $0x78] sm:$0xff]  ;;  %v296_v28 = vld [vmem:[%s4187_s8 + $0x80] sm:$0xff]  ;;  %v297_v29 = vld [vmem:[%s4187_s8 + $0x88] sm:$0xff]  ;;  %565 = vst.msk [vmem:[#allocation2 + $0x58] sm:$0xff] %vm553_vm3, %v4127_v53 }
  0x16   : > { %v319_v30 = vpack.c.bf16 %v295_v27, %v294_v26  ;;  %v320_v31 = vpack.c.bf16 %v297_v29, %v296_v28  ;;  %v298_v32 = vld [vmem:[%s4187_s8 + $0x90] sm:$0xff]  ;;  %v299_v33 = vld [vmem:[%s4187_s8 + $0x98] sm:$0xff]  ;;  %v300_v34 = vld [vmem:[%s4187_s8 + $0xa0] sm:$0xff]  ;;  %566 = vst.msk [vmem:[#allocation2 + $0x60] sm:$0xff] %vm553_vm3, %v4127_v53 }
  0x17   : > { %v301_v35 = vld [vmem:[%s4187_s8 + $0xa8] sm:$0xff]  ;;  %v321_v36 = vpack.c.bf16 %v299_v33, %v298_v32  ;;  %v302_v38 = vld [vmem:[%s4187_s8 + $0xb0] sm:$0xff]  ;;  %v303_v39 = vld [vmem:[%s4187_s8 + $0xb8] sm:$0xff]  ;;  %567 = vst.msk [vmem:[#allocation2 + $0x68] sm:$0xff] %vm553_vm3, %v4127_v53 }
  0x18   : > { %v322_v37 = vpack.c.bf16 %v301_v35, %v300_v34  ;;  %v304_v40 = vld [vmem:[%s4187_s8 + $0xc0] sm:$0xff]  ;;  %v305_v41 = vld [vmem:[%s4187_s8 + $0xc8] sm:$0xff]  ;;  %v323_v42 = vpack.c.bf16 %v303_v39, %v302_v38  ;;  %v306_v44 = vld [vmem:[%s4187_s8 + $0xd0] sm:$0xff]  ;;  %568 = vst.msk [vmem:[#allocation2 + $0x70] sm:$0xff] %vm553_vm3, %v4127_v53 }
  0x19   : > { %v324_v43 = vpack.c.bf16 %v305_v41, %v304_v40  ;;  %v307_v45 = vld [vmem:[%s4187_s8 + $0xd8] sm:$0xff]  ;;  %v308_v46 = vld [vmem:[%s4187_s8 + $0xe0] sm:$0xff]  ;;  %v309_v47 = vld [vmem:[%s4187_s8 + $0xe8] sm:$0xff]  ;;  %569 = vst.msk [vmem:[#allocation2 + $0x78] sm:$0xff] %vm553_vm3, %v4127_v53 }
  0x1a   : > { %v325_v48 = vpack.c.bf16 %v307_v45, %v306_v44  ;;  %v326_v49 = vpack.c.bf16 %v309_v47, %v308_v46  ;;  %v310_v50 = vld [vmem:[%s4187_s8 + $0xf0] sm:$0xff]  ;;  %v311_v51 = vld [vmem:[%s4187_s8 + $0xf8] sm:$0xff]  ;;  %570 = vst.msk [vmem:[#allocation2 + $0x80] sm:$0xff] %vm553_vm3, %v4127_v53  ;;  %571 = vst.msk [vmem:[#allocation2 + $0x88] sm:$0xff] %vm553_vm3, %v4127_v53 }
  0x1b   : > { %v327_v52 = vpack.c.bf16 %v311_v51, %v310_v50  ;;  %572 = vst.msk [vmem:[#allocation2 + $0x90] sm:$0xff] %vm553_vm3, %v4127_v53  ;;  %573 = vst.msk [vmem:[#allocation2 + $0x98] sm:$0xff] %vm553_vm3, %v4127_v53  ;;  %v659_v58 = vld [vmem:[#allocation2 + $0x7] sm:$0xff]  ;;  %v660_v9 = vld [vmem:[#allocation2 + $0xf] sm:$0xff] }
  0x1c   : > { %3887 = vmatmul.mubr.msk.bf16.gmra.mxu0 %vm336_vm2, %v315_v18  ;;  %574 = vst.msk [vmem:[#allocation2 + $0xa0] sm:$0xff] %vm553_vm3, %v4127_v53  ;;  %575 = vst.msk [vmem:[#allocation2 + $0xa8] sm:$0xff] %vm553_vm3, %v4127_v53  ;;  %v730_v59 = vld [vmem:[#allocation2 + $0x8] sm:$0xff]  ;;  %v698_v63 = vmul.f32 %v4389_v55, %v659_v58  ;;  %v731_v10 = vld [vmem:[#allocation2 + $0x10] sm:$0xff]  ;;  %v699_v13 = vmul.f32 %v4389_v55, %v660_v9 }
  0x1d   : > { %3890 = vmatprep.mubr.msk.bf16.mxu0 %vm336_vm2, %v316_v19  ;;  %576 = vst.msk [vmem:[#allocation2 + $0xb0] sm:$0xff] %vm553_vm3, %v4127_v53  ;;  %577 = vst.msk [vmem:[#allocation2 + $0xb8] sm:$0xff] %vm553_vm3, %v4127_v53  ;;  %v770_v0 = vmul.f32 %v4394_v57, %v730_v59  ;;  %v834_v1 = vld [vmem:[#allocation2 + $0x9] sm:$0xff]  ;;  %v771_v14 = vmul.f32 %v4394_v57, %v731_v10  ;;  %v835_v17 = vld [vmem:[#allocation2 + $0x11] sm:$0xff] }
  0x1e   : > { %578 = vst.msk [vmem:[#allocation2 + $0xc0] sm:$0xff] %vm553_vm3, %v4127_v53  ;;  %579 = vst.msk [vmem:[#allocation2 + $0xc8] sm:$0xff] %vm553_vm3, %v4127_v53  ;;  %v874_v7 = vmul.f32 %v4404_v2, %v834_v1  ;;  %v4419_v18 = vld [vmem:[%s6641_s3 + $0x3] ss:$0 sm:$0xff]  ;;  %v4431_v29 = vld [vmem:[%s6641_s3 + $0x4] ss:$0 sm:$0xff] }
  0x1f   : > { %580 = vst.msk [vmem:[#allocation2 + $0xd0] sm:$0xff] %vm553_vm3, %v4127_v53  ;;  %581 = vst.msk [vmem:[#allocation2 + $0xd8] sm:$0xff] %vm553_vm3, %v4127_v53  ;;  %v802_v6 = vadd.f32 %v770_v0, %v698_v63  ;;  %v4442_v39 = vld [vmem:[%s6641_s3 + $0x6] ss:$0 sm:$0xff]  ;;  %v4447_v40 = vld [vmem:[%s6641_s3 + $0x5] ss:$0 sm:$0xff] }
  0x20   : > { %582 = vst.msk [vmem:[#allocation2 + $0xe0] sm:$0xff] %vm553_vm3, %v4127_v53  ;;  %583 = vst.msk [vmem:[#allocation2 + $0xe8] sm:$0xff] %vm553_vm3, %v4127_v53 }
  0x21   : > { %584 = vst.msk [vmem:[#allocation2 + $0xf0] sm:$0xff] %vm553_vm3, %v4127_v53  ;;  %585 = vst.msk [vmem:[#allocation2 + $0xf8] sm:$0xff] %vm553_vm3, %v4127_v53  ;;  %v906_v16 = vadd.f32 %v874_v7, %v802_v6 }
  0x22   : > { %586 = vst.msk [vmem:[#allocation2 + $0x100] sm:$0xff] %vm553_vm3, %v4127_v53  ;;  %587 = vst.msk [vmem:[#allocation2 + $0x108] sm:$0xff] %vm553_vm3, %v4127_v53 }
  0x23   : > { %588 = vst.msk [vmem:[#allocation2 + $0x110] sm:$0xff] %vm553_vm3, %v4127_v53  ;;  %589 = vst.msk [vmem:[#allocation2 + $0x118] sm:$0xff] %vm553_vm3, %v4127_v53 }
  0x24   : > { %3891 = vmatmul.mubr.msk.bf16.gmra.mxu0 %vm336_vm2, %v317_v24  ;;  %590 = vst.msk [vmem:[#allocation2 + $0x120] sm:$0xff] %vm553_vm3, %v4127_v53  ;;  %591 = vst.msk [vmem:[#allocation2 + $0x128] sm:$0xff] %vm553_vm3, %v4127_v53  ;;  %v803_v24 = vadd.f32 %v771_v14, %v699_v13 }
  0x25   : > { %3894 = vmatprep.mubr.msk.bf16.mxu0 %vm336_vm2, %v318_v25  ;;  %592 = vst.msk [vmem:[#allocation2 + $0x130] sm:$0xff] %vm553_vm3, %v4127_v53  ;;  %593 = vst.msk [vmem:[#allocation2 + $0x138] sm:$0xff] %vm553_vm3, %v4127_v53  ;;  %v875_v25 = vmul.f32 %v4404_v2, %v835_v17 }
  0x26   : > { %594 = vst.msk [vmem:[#allocation2 + $0x140] sm:$0xff] %vm553_vm3, %v4127_v53  ;;  %595 = vst.msk [vmem:[#allocation2 + $0x148] sm:$0xff] %vm553_vm3, %v4127_v53 }
  0x27   : > { %596 = vst.msk [vmem:[#allocation2 + $0x150] sm:$0xff] %vm553_vm3, %v4127_v53  ;;  %597 = vst.msk [vmem:[#allocation2 + $0x158] sm:$0xff] %vm553_vm3, %v4127_v53  ;;  %v907_v34 = vadd.f32 %v875_v25, %v803_v24 }
  0x28   : > { %598 = vst.msk [vmem:[#allocation2 + $0x160] sm:$0xff] %vm553_vm3, %v4127_v53  ;;  %599 = vst.msk [vmem:[#allocation2 + $0x168] sm:$0xff] %vm553_vm3, %v4127_v53 }
  0x29   : > { %600 = vst.msk [vmem:[#allocation2 + $0x170] sm:$0xff] %vm553_vm3, %v4127_v53  ;;  %601 = vst.msk [vmem:[#allocation2 + $0x178] sm:$0xff] %vm553_vm3, %v4127_v53 }
  0x2a   : > { %602 = vst.msk [vmem:[#allocation2 + $0x180] sm:$0xff] %vm553_vm3, %v4127_v53  ;;  %603 = vst.msk [vmem:[#allocation2 + $0x188] sm:$0xff] %vm553_vm3, %v4127_v53 }
  0x2b   : > { %604 = vst.msk [vmem:[#allocation2 + $0x190] sm:$0xff] %vm553_vm3, %v4127_v53  ;;  %605 = vst.msk [vmem:[#allocation2 + $0x198] sm:$0xff] %vm553_vm3, %v4127_v53 }
  0x2c   : > { %3895 = vmatmul.mubr.msk.bf16.gmra.mxu0 %vm336_vm2, %v319_v30  ;;  %606 = vst.msk [vmem:[#allocation2 + $0x1a0] sm:$0xff] %vm553_vm3, %v4127_v53  ;;  %607 = vst.msk [vmem:[#allocation2 + $0x1a8] sm:$0xff] %vm553_vm3, %v4127_v53 }
  0x2d   : > { %3898 = vmatprep.mubr.msk.bf16.mxu0 %vm336_vm2, %v320_v31  ;;  %608 = vst.msk [vmem:[#allocation2 + $0x1b0] sm:$0xff] %vm553_vm3, %v4127_v53  ;;  %609 = vst.msk [vmem:[#allocation2 + $0x1b8] sm:$0xff] %vm553_vm3, %v4127_v53 }
  0x2e   : > { %610 = vst.msk [vmem:[#allocation2 + $0x1c0] sm:$0xff] %vm553_vm3, %v4127_v53  ;;  %611 = vst.msk [vmem:[#allocation2 + $0x1c8] sm:$0xff] %vm553_vm3, %v4127_v53 }
  0x2f   : > { %612 = vst.msk [vmem:[#allocation2 + $0x1d0] sm:$0xff] %vm553_vm3, %v4127_v53  ;;  %613 = vst.msk [vmem:[#allocation2 + $0x1d8] sm:$0xff] %vm553_vm3, %v4127_v53 }
  0x30   : > { %614 = vst.msk [vmem:[#allocation2 + $0x1e0] sm:$0xff] %vm553_vm3, %v4127_v53  ;;  %615 = vst.msk [vmem:[#allocation2 + $0x1e8] sm:$0xff] %vm553_vm3, %v4127_v53 }
  0x31   : > { %616 = vst.msk [vmem:[#allocation2 + $0x1f0] sm:$0xff] %vm553_vm3, %v4127_v53  ;;  %617 = vst.msk [vmem:[#allocation2 + $0x1f8] sm:$0xff] %vm553_vm3, %v4127_v53 }
  0x32   : > { %618 = vst.msk [vmem:[#allocation2 + $0x200] sm:$0xff] %vm553_vm3, %v4127_v53  ;;  %619 = vst.msk [vmem:[#allocation2 + $0x208] sm:$0xff] %vm553_vm3, %v4127_v53 }
  0x33   : > { %620 = vst.msk [vmem:[#allocation2 + $0x210] sm:$0xff] %vm553_vm3, %v4127_v53  ;;  %621 = vst.msk [vmem:[#allocation2 + $0x218] sm:$0xff] %vm553_vm3, %v4127_v53 }
  0x34   : > { %3899 = vmatmul.mubr.msk.bf16.gmra.mxu0 %vm336_vm2, %v321_v36  ;;  %622 = vst.msk [vmem:[#allocation2 + $0x220] sm:$0xff] %vm553_vm3, %v4127_v53  ;;  %623 = vst.msk [vmem:[#allocation2 + $0x228] sm:$0xff] %vm553_vm3, %v4127_v53 }
  0x35   : > { %3902 = vmatprep.mubr.msk.bf16.mxu0 %vm336_vm2, %v322_v37  ;;  %624 = vst.msk [vmem:[#allocation2 + $0x230] sm:$0xff] %vm553_vm3, %v4127_v53  ;;  %625 = vst.msk [vmem:[#allocation2 + $0x238] sm:$0xff] %vm553_vm3, %v4127_v53 }
  0x36   : > { %6673 = vst [vmem:[#allocation3_spill] sm:$0xff] %v4431_v29 }
  0x3c   : > { %3903 = vmatmul.mubr.msk.bf16.gmra.mxu0 %vm336_vm2, %v323_v42 }
  0x3d   : > { %3906 = vmatprep.mubr.msk.bf16.mxu0 %vm336_vm2, %v324_v43 }
  0x44   : > { %3907 = vmatmul.mubr.msk.bf16.gmra.mxu0 %vm336_vm2, %v325_v48  ;;  %v4458_v48 = vld [vmem:[%s6641_s3 + $0x7] ss:$0 sm:$0xff] }
  0x45   : > { %3910 = vmatprep.mubr.msk.bf16.mxu0 %vm336_vm2, %v326_v49 }
  0x4c   : > { %3911 = vmatmul.mubr.msk.bf16.gmra.mxu0 %vm336_vm2, %v327_v52 }
  0xd4   : > { %v3884_v56 = vpop.f32.mrf.mxu0 }
  0xd5   : > { %v435_v60 = vadd.f32 %v3884_v56, %v4384_v54 }
  0xd6   : > { %v426_v61 = vpop.f32.mrf.mxu0 }
  0xd7   : > { %629 = vst.msk [vmem:[#allocation2 + $0x48] sm:$0xff] %vm553_vm3, %v435_v60  ;;  %v427_v62 = vadd.f32 %v4384_v54, %v426_v61  ;;  %v4468_v61 = vld [vmem:[%s6641_s3 + $0x8] ss:$0 sm:$0xff] }
  0xd8   : > { %v3885_v3 = vpop.f32.mrf.mxu0 }
  0xd9   : > { %627 = vst.msk [vmem:[#allocation2 + $0x28] sm:$0xff] %vm553_vm3, %v427_v62  ;;  %v438_v4 = vadd.f32 %v3885_v3, %v4384_v54 }
  0xda   : > { %v429_v5 = vpop.f32.mrf.mxu0 }
  0xdb   : > { %630 = vst.msk [vmem:[#allocation2 + $0x50] sm:$0xff] %vm553_vm3, %v438_v4  ;;  %v430_v8 = vadd.f32 %v4384_v54, %v429_v5 }
  0xdc   : > { %v3888_v11 = vpop.f32.mrf.mxu0 }
  0xdd   : > { %628 = vst.msk [vmem:[#allocation2 + $0x30] sm:$0xff] %vm553_vm3, %v430_v8  ;;  %v451_v12 = vadd.f32 %v3888_v11, %v4384_v54 }
  0xde   : > { %v442_v15 = vpop.f32.mrf.mxu0  ;;  %v663_v38 = vld [vmem:[#allocation2 + $0x47] sm:$0xff] }
  0xdf   : > { %633 = vst.msk [vmem:[#allocation2 + $0x88] sm:$0xff] %vm553_vm3, %v451_v12  ;;  %v443_v20 = vadd.f32 %v4384_v54, %v442_v15  ;;  %v734_v47 = vld [vmem:[#allocation2 + $0x48] sm:$0xff]  ;;  %v1291_v52 = vmul.f32 %v4442_v39, %v663_v38  ;;  %v702_v4 = vmul.f32 %v4389_v55, %v663_v38 }
  0xe0   : > { %v661_v19 = vld [vmem:[#allocation2 + $0x27] sm:$0xff]  ;;  %v3889_v21 = vpop.f32.mrf.mxu0  ;;  %v1395_v5 = vmul.f32 %v4458_v48, %v734_v47  ;;  %v774_v13 = vmul.f32 %v4394_v57, %v734_v47  ;;  %v1084_v24 = vmul.f32 %v4431_v29, %v734_v47 }
  0xe1   : > { %v978_v22 = vmul.f32 %v4419_v18, %v661_v19  ;;  %v732_v23 = vld [vmem:[#allocation2 + $0x28] sm:$0xff]  ;;  %631 = vst.msk [vmem:[#allocation2 + $0x68] sm:$0xff] %vm553_vm3, %v443_v20  ;;  %v454_v26 = vadd.f32 %v3889_v21, %v4384_v54  ;;  %v700_v43 = vmul.f32 %v4389_v55, %v661_v19 }
  0xe2   : > { %v4426_v27 = vpop.f32.mrf.mxu0  ;;  %v1082_v31 = vmul.f32 %v4431_v29, %v732_v23  ;;  %v772_v44 = vmul.f32 %v4394_v57, %v732_v23  ;;  %v664_v53 = vld [vmem:[#allocation2 + $0x4f] sm:$0xff]  ;;  %v980_v23 = vmul.f32 %v4419_v18, %v663_v38 }
  0xe3   : > { %v1010_v28 = vadd.f32 %v978_v22, %v906_v16  ;;  %634 = vst.msk [vmem:[#allocation2 + $0x90] sm:$0xff] %vm553_vm3, %v454_v26  ;;  %v735_v56 = vld [vmem:[#allocation2 + $0x50] sm:$0xff]  ;;  %v703_v8 = vmul.f32 %v4389_v55, %v664_v53  ;;  %v1292_v10 = vmul.f32 %v4442_v39, %v664_v53 }
  0xe4   : > { %v4434_v30 = vpop.f32.mrf.mxu0  ;;  %v662_v32 = vld [vmem:[#allocation2 + $0x2f] sm:$0xff]  ;;  %v804_v6 = vadd.f32 %v772_v44, %v700_v43  ;;  %v775_v9 = vmul.f32 %v4394_v57, %v735_v56  ;;  %v1396_v19 = vmul.f32 %v4458_v48, %v735_v56  ;;  %v1085_v47 = vmul.f32 %v4431_v29, %v735_v56 }
  0xe5   : > { %v836_v33 = vld [vmem:[#allocation2 + $0x29] sm:$0xff]  ;;  %v1114_v36 = vadd.f32 %v1082_v31, %v1010_v28  ;;  %v979_v41 = vmul.f32 %v4419_v18, %v662_v32  ;;  %v837_v45 = vld [vmem:[#allocation2 + $0x31] sm:$0xff]  ;;  %v701_v62 = vmul.f32 %v4389_v55, %v662_v32 }
  0xe6   : > { %v4437_v35 = vpop.f32.mrf.mxu0  ;;  %v733_v37 = vld [vmem:[#allocation2 + $0x30] sm:$0xff]  ;;  %v1186_v46 = vmul.f32 %v4447_v40, %v836_v33  ;;  %v876_v58 = vmul.f32 %v4404_v2, %v836_v33  ;;  %v1187_v1 = vmul.f32 %v4447_v40, %v837_v45  ;;  %v807_v28 = vadd.f32 %v775_v9, %v703_v8  ;;  %v4498_v38 = vld [vmem:[#allocation2 + $0x87] sm:$0xff] }
  0xe7   : > { %v1011_v49 = vadd.f32 %v979_v41, %v907_v34  ;;  %v1083_v50 = vmul.f32 %v4431_v29, %v733_v37  ;;  %v838_v60 = vld [vmem:[#allocation2 + $0x49] sm:$0xff]  ;;  %v773_v63 = vmul.f32 %v4394_v57, %v733_v37  ;;  %v839_v14 = vld [vmem:[#allocation2 + $0x51] sm:$0xff]  ;;  %v877_v32 = vmul.f32 %v4404_v2, %v837_v45 }
  0xe8   : > { %v4450_v42 = vpop.f32.mrf.mxu0  ;;  %v1218_v59 = vadd.f32 %v1186_v46, %v1114_v36  ;;  %v1499_v15 = vmul.f32 %v4468_v61, %v838_v60  ;;  %v908_v16 = vadd.f32 %v876_v58, %v804_v6  ;;  %v878_v25 = vmul.f32 %v4404_v2, %v838_v60  ;;  %v4500_v44 = vld [vmem:[#allocation2 + $0x88] sm:$0xff] }
  0xe9   : > { %v1115_v0 = vadd.f32 %v1083_v50, %v1011_v49  ;;  %v805_v20 = vadd.f32 %v773_v63, %v701_v62  ;;  %v1500_v31 = vmul.f32 %v4468_v61, %v839_v14  ;;  %v806_v36 = vadd.f32 %v774_v13, %v702_v4  ;;  %v665_v63 = vld [vmem:[#allocation2 + $0x67] sm:$0xff] }
  0xea   : > { %v4461_v51 = vpop.f32.mrf.mxu0  ;;  %v1323_v7 = vadd.f32 %v1291_v52, %v1218_v59  ;;  %v879_v37 = vmul.f32 %v4404_v2, %v839_v14  ;;  %v1012_v41 = vadd.f32 %v980_v23, %v908_v16  ;;  %v981_v46 = vmul.f32 %v4419_v18, %v664_v53  ;;  %v4522_v4 = vld [vmem:[#allocation2 + $0x68] sm:$0xff] }
  0xeb   : > { %v1219_v11 = vadd.f32 %v1187_v1, %v1115_v0  ;;  %v909_v49 = vadd.f32 %v877_v32, %v805_v20  ;;  %v910_v52 = vadd.f32 %v878_v25, %v806_v36  ;;  %v1188_v58 = vmul.f32 %v4447_v40, %v838_v60  ;;  %v4558_v36 = vld [vmem:[#allocation2 + $0x90] sm:$0xff] }
  0xec   : > { %v4473_v3 = vpop.f32.mrf.mxu0  ;;  %v1427_v17 = vadd.f32 %v1395_v5, %v1323_v7  ;;  %v4508_v59 = vmul.f32 %v4447_v40, %v839_v14  ;;  %v4513_v0 = vadd.f32 %v879_v37, %v807_v28  ;;  %v706_v56 = vmul.f32 %v4389_v55, %v4498_v38 }
  0xed   : > { %v1324_v21 = vadd.f32 %v1292_v10, %v1219_v11  ;;  %v778_v1 = vmul.f32 %v4394_v57, %v4500_v44  ;;  %v4527_v6 = vmul.f32 %v4419_v18, %v4498_v38  ;;  %v4531_v7 = vmul.f32 %v4431_v29, %v4500_v44 }
  0xee   : > { %v4480_v12 = vpop.f32.mrf.mxu0  ;;  %v4490_v26 = vadd.f32 %v1499_v15, %v1427_v17  ;;  %v1116_v8 = vadd.f32 %v1084_v24, %v1012_v41  ;;  %v1013_v9 = vadd.f32 %v981_v46, %v909_v49  ;;  %v982_v11 = vmul.f32 %v4419_v18, %v665_v63 }
  0xef   : > { %v1428_v33 = vadd.f32 %v1396_v19, %v1324_v21  ;;  %v446_v13 = vadd.f32 %v4384_v54, %v4426_v27  ;;  %v704_v16 = vmul.f32 %v4389_v55, %v665_v63  ;;  %v776_v17 = vmul.f32 %v4394_v57, %v4522_v4 }
  0xf0   : > { %v4485_v22 = vpop.f32.mrf.mxu0  ;;  %v4496_v43 = vmul.f32 0.70710677, %v4490_v26  ;;  %v467_v19 = vadd.f32 %v4434_v30, %v4384_v54  ;;  %v1293_v21 = vmul.f32 %v4442_v39, %v665_v63  ;;  %v459_v23 = vadd.f32 %v4384_v54, %v4437_v35 }
  0xf1   : > { %v4504_v50 = vadd.f32 %v1500_v31, %v1428_v33  ;;  %632 = vst.msk [vmem:[#allocation2 + $0x70] sm:$0xff] %vm553_vm3, %v446_v13  ;;  %v470_v27 = vadd.f32 %v4450_v42, %v4384_v54  ;;  %v1220_v24 = vadd.f32 %v1188_v58, %v1116_v8  ;;  %v462_v25 = vadd.f32 %v4384_v54, %v4461_v51  ;;  %v4556_v33 = vld [vmem:[#allocation2 + $0x8f] sm:$0xff] }
  0xf2   : > { %v477_v34 = vpop.f32.mrf.mxu0  ;;  %v4511_v62 = vand.u32 2147483647, %v4496_v43  ;;  %637 = vst.msk [vmem:[#allocation2 + $0xc8] sm:$0xff] %vm553_vm3, %v467_v19  ;;  %v483_v30 = vadd.f32 %v4473_v3, %v4384_v54  ;;  %v1014_v32 = vadd.f32 %v982_v11, %v910_v52  ;;  %635 = vst.msk [vmem:[#allocation2 + $0xa8] sm:$0xff] %vm553_vm3, %v459_v23  ;;  %v475_v35 = vadd.f32 %v4384_v54, %v4480_v12  ;;  %v4567_v3 = vld [vmem:[#allocation2 + $0x89] sm:$0xff] }
  0xf3   : > { %v4516_v53 = vmul.f32 0.70710677, %v4504_v50  ;;  %638 = vst.msk [vmem:[#allocation2 + $0xd0] sm:$0xff] %vm553_vm3, %v470_v27  ;;  %v486_v42 = vadd.f32 %v4485_v22, %v4384_v54  ;;  %636 = vst.msk [vmem:[#allocation2 + $0xb0] sm:$0xff] %vm553_vm3, %v462_v25  ;;  %v478_v37 = vadd.f32 %v4384_v54, %v477_v34  ;;  %v1117_v49 = vadd.f32 %v1085_v47, %v1013_v9  ;;  %v4584_v47 = vld [vmem:[#allocation2 + $0x91] sm:$0xff] }
  0xf4   : > { %v3900_v45 = vpop.f32.mrf.mxu0  ;;  %v1627_v5 = vmul.f32 0.3275911, %v4511_v62  ;;  %v2043_v51 = vsub.f32 0.0, %v4511_v62  ;;  %641 = vst.msk [vmem:[#allocation2 + $0x108] sm:$0xff] %vm553_vm3, %v483_v30  ;;  %639 = vst.msk [vmem:[#allocation2 + $0xe8] sm:$0xff] %vm553_vm3, %v475_v35  ;;  %v1086_v52 = vmul.f32 %v4431_v29, %v4522_v4  ;;  %v1325_v58 = vadd.f32 %v1293_v21, %v1220_v24 }
  0xf5   : > { %v4534_v10 = vand.u32 2147483647, %v4516_v53  ;;  %v499_v41 = vadd.f32 %v3900_v45, %v4384_v54  ;;  %642 = vst.msk [vmem:[#allocation2 + $0x110] sm:$0xff] %vm553_vm3, %v486_v42  ;;  %v707_v34 = vmul.f32 %v4389_v55, %v4556_v33  ;;  %v779_v45 = vmul.f32 %v4394_v57, %v4558_v36  ;;  %640 = vst.msk [vmem:[#allocation2 + $0xf0] sm:$0xff] %vm553_vm3, %v478_v37 }
  0xf6   : > { %v490_v60 = vpop.f32.mrf.mxu0  ;;  %v1659_v15 = vadd.f32 1.0, %v1627_v5  ;;  %v810_v63 = vadd.f32 %v778_v1, %v706_v56  ;;  %v882_v5 = vmul.f32 %v4404_v2, %v4567_v3  ;;  %v2075_v9 = vmul.f32 %v2043_v51, %v4511_v62 }
  0xf7   : > { %v1628_v20 = vmul.f32 0.3275911, %v4534_v10  ;;  %v491_v46 = vadd.f32 %v4384_v54, %v490_v60  ;;  %645 = vst.msk [vmem:[#allocation2 + $0x148] sm:$0xff] %vm553_vm3, %v499_v41  ;;  %v1399_v60 = vmul.f32 %v4458_v48, %v4500_v44  ;;  %v2044_v8 = vsub.f32 0.0, %v4534_v10 }
  0xf8   : > { %v3901_v14 = vpop.f32.mrf.mxu0  ;;  %3962 = vrcp.f32 %v1659_v15  ;;  %v1118_v11 = vadd.f32 %v1086_v52, %v1014_v32  ;;  %v1397_v56 = vmul.f32 %v4458_v48, %v4522_v4  ;;  %v666_v1 = vld [vmem:[#allocation2 + $0x6f] sm:$0xff]  ;;  %v4605_v44 = vmul.f32 %v4404_v2, %v4584_v47 }
  0xf9   : > { %v1660_v31 = vadd.f32 1.0, %v1628_v20  ;;  %v502_v12 = vadd.f32 %v3901_v14, %v4384_v54  ;;  %643 = vst.msk [vmem:[#allocation2 + $0x128] sm:$0xff] %vm553_vm3, %v491_v46  ;;  %v840_v13 = vld [vmem:[#allocation2 + $0x69] sm:$0xff]  ;;  %v4601_v14 = vadd.f32 %v776_v17, %v704_v16  ;;  %v983_v15 = vmul.f32 %v4419_v18, %v666_v1  ;;  %v841_v4 = vld [vmem:[#allocation2 + $0x71] sm:$0xff] }
  0xfa   : > { %v493_v28 = vpop.f32.mrf.mxu0  ;;  %v1221_v19 = vadd.f32 %v4508_v59, %v1117_v49  ;;  %v4610_v20 = vmul.f32 0.5, %v4490_v26  ;;  %v1429_v62 = vadd.f32 %v1397_v56, %v1325_v58  ;;  %v4612_v21 = vadd.f32 %v779_v45, %v707_v34 }
  0xfb   : > { %3964 = vrcp.f32 %v1660_v31  ;;  %v494_v22 = vadd.f32 %v4384_v54, %v493_v28  ;;  %v1295_v54 = vmul.f32 %v4442_v39, %v4498_v38  ;;  %646 = vst.msk [vmem:[#allocation2 + $0x150] sm:$0xff] %vm553_vm3, %v502_v12  ;;  %v737_v38 = vld [vmem:[#allocation2 + $0x70] sm:$0xff]  ;;  %v1190_v23 = vmul.f32 %v4447_v40, %v840_v13 }
  0xfc   : > { %v4615_v27 = vadd.f32 %v882_v5, %v810_v63  ;;  %v1015_v16 = vadd.f32 %v983_v15, %v4513_v0  ;;  %v1087_v17 = vmul.f32 %v4431_v29, %v737_v38  ;;  %v1294_v24 = vmul.f32 %v4442_v39, %v666_v1 }
  0xfd   : > { %644 = vst.msk [vmem:[#allocation2 + $0x130] sm:$0xff] %vm553_vm3, %v494_v22  ;;  %v2076_v25 = vmul.f32 %v2044_v8, %v4534_v10  ;;  %v2107_v59 = vmul.f32 1.442695, %v2075_v9  ;;  %v1222_v30 = vadd.f32 %v1190_v23, %v1118_v11  ;;  %v1501_v26 = vmul.f32 %v4468_v61, %v840_v13 }
  0xfe   : > { %v1119_v28 = vadd.f32 %v1087_v17, %v1015_v16  ;;  %v1191_v31 = vmul.f32 %v4447_v40, %v841_v4  ;;  %v1326_v32 = vadd.f32 %v1294_v24, %v1221_v19  ;;  %v1398_v35 = vmul.f32 %v4458_v48, %v737_v38 }
  0xff   : > { %v1296_v42 = vmul.f32 %v4442_v39, %v4556_v33  ;;  %v1400_v0 = vmul.f32 %v4458_v48, %v4558_v36  ;;  %v1327_v51 = vadd.f32 %v1295_v54, %v1222_v30  ;;  %v4628_v37 = vadd.f32 %v1501_v26, %v1429_v62 }
 0x100   : > { %v1503_v41 = vmul.f32 %v4468_v61, %v4567_v3  ;;  %v1223_v46 = vadd.f32 %v1191_v31, %v1119_v28  ;;  %v1430_v49 = vadd.f32 %v1398_v35, %v1326_v32  ;;  %v1502_v12 = vmul.f32 %v4468_v61, %v841_v4 }
 0x101   : > { %v2109_v52 = vmul.f32 1.442695, %v2076_v25  ;;  %v1431_v58 = vadd.f32 %v1399_v60, %v1327_v51  ;;  %v4637_v34 = vmul.f32 0.70710677, %v4628_v37  ;;  %3966 = vpow2.f32 %v2107_v59 }
 0x102   : > { %v1504_v45 = vmul.f32 %v4468_v61, %v4584_v47  ;;  %v1328_v63 = vadd.f32 %v1296_v42, %v1223_v46  ;;  %v4641_v54 = vadd.f32 %v1502_v12, %v1430_v49  ;;  %v705_v9 = vmul.f32 %v4389_v55, %v666_v1 }
 0x103   : > { %v4646_v11 = vadd.f32 %v1503_v41, %v1431_v58  ;;  %v1597_v56 = vand.u32 2147483647, %v4637_v34  ;;  %v777_v15 = vmul.f32 %v4394_v57, %v737_v38  ;;  %3968 = vpow2.f32 %v2109_v52 }
 0x104   : > { %v1432_v19 = vadd.f32 %v1400_v0, %v1328_v63  ;;  %v4652_v62 = vmul.f32 0.70710677, %v4641_v54  ;;  %v880_v24 = vmul.f32 %v4404_v2, %v840_v13  ;;  %v881_v38 = vmul.f32 %v4404_v2, %v841_v4 }
 0x105   : > { %v4630_v10 = vpop.eup %3962  ;;  %v4656_v16 = vmul.f32 0.70710677, %v4646_v11  ;;  %v1629_v17 = vmul.f32 0.3275911, %v1597_v56  ;;  %v809_v32 = vadd.f32 %v777_v15, %v705_v9  ;;  %v2045_v51 = vsub.f32 0.0, %v1597_v56 }
 0x106   : > { %v1755_v22 = vmul.f32 1.0614054, %v4630_v10  ;;  %v4659_v25 = vadd.f32 %v1504_v45, %v1432_v19  ;;  %v1598_v59 = vand.u32 2147483647, %v4652_v62  ;;  %vm2235_vm4 = vcmp.ge.f32.partialorder %v4496_v43, 0.0 }
 0x107   : > { %v1599_v26 = vand.u32 2147483647, %v4656_v16  ;;  %v1661_v28 = vadd.f32 1.0, %v1629_v17  ;;  %v2077_v15 = vmul.f32 %v2045_v51, %v1597_v56  ;;  %v1192_v56 = vmul.f32 %v4447_v40, %v4567_v3 }
 0x108   : > { %v4643_v5 = vpop.eup %3964  ;;  %v3741_v8 = vadd.f32 -1.4531521, %v1755_v22  ;;  %v4666_v35 = vmul.f32 0.70710677, %v4659_v25  ;;  %v1630_v42 = vmul.f32 0.3275911, %v1598_v59  ;;  %v912_v22 = vadd.f32 %v880_v24, %v4601_v14 }
 0x109   : > { %v1756_v60 = vmul.f32 1.0614054, %v4643_v5  ;;  %v1631_v13 = vmul.f32 0.3275911, %v1599_v26  ;;  %3970 = vrcp.f32 %v1661_v28  ;;  %v2046_v4 = vsub.f32 0.0, %v1598_v59 }
 0x10a   : > { %v1819_v23 = vmul.f32 %v4630_v10, %v3741_v8  ;;  %v1600_v46 = vand.u32 2147483647, %v4666_v35  ;;  %v1662_v49 = vadd.f32 1.0, %v1630_v42  ;;  %v2047_v58 = vsub.f32 0.0, %v1599_v26 }
 0x10b   : > { %v3742_v1 = vadd.f32 -1.4531521, %v1756_v60  ;;  %v1663_v52 = vadd.f32 1.0, %v1631_v13  ;;  %v913_v60 = vadd.f32 %v881_v38, %v809_v32  ;;  %v4677_v24 = vadd.f32 %v4605_v44, %v4612_v21 }
 0x10c   : > { %v1851_v30 = vadd.f32 1.4214138, %v1819_v23  ;;  %v1632_v63 = vmul.f32 0.3275911, %v1600_v46  ;;  %3972 = vrcp.f32 %v1662_v49  ;;  %v2048_v8 = vsub.f32 0.0, %v1600_v46 }
 0x10d   : > { %v1820_v31 = vmul.f32 %v4643_v5, %v3742_v1  ;;  %3974 = vrcp.f32 %v1663_v52  ;;  %v985_v23 = vmul.f32 %v4419_v18, %v4556_v33  ;;  %v2078_v1 = vmul.f32 %v2046_v4, %v1598_v59  ;;  %v4685_v59 = vld [vmem:[#allocation2 + $0xc7] sm:$0xff] }
 0x10e   : > { %v1883_v0 = vmul.f32 %v4630_v10, %v1851_v30  ;;  %v1664_v17 = vadd.f32 1.0, %v1632_v63  ;;  %v3967_v30 = vpop.eup %3966  ;;  %v1089_v28 = vmul.f32 %v4431_v29, %v4558_v36  ;;  %v2080_v33 = vmul.f32 %v2048_v8, %v1600_v46 }
 0x10f   : > { %v1852_v41 = vadd.f32 1.4214138, %v1820_v31  ;;  %v2079_v31 = vmul.f32 %v2047_v58, %v1599_v26  ;;  %v1016_v44 = vadd.f32 %v4527_v6, %v912_v22  ;;  %v1017_v21 = vadd.f32 %v985_v23, %v913_v60  ;;  %v669_v22 = vld [vmem:[#allocation2 + $0xa7] sm:$0xff] }
 0x110   : > { %v3773_v12 = vadd.f32 -0.28449672, %v1883_v0  ;;  %3976 = vrcp.f32 %v1664_v17  ;;  %v2111_v42 = vmul.f32 1.442695, %v2077_v15  ;;  %v4689_v0 = vld [vmem:[#allocation2 + $0xc8] sm:$0xff]  ;;  %v3969_v36 = vpop.eup %3968  ;;  %v2332_v13 = vmul.f32 0.5, %v4504_v50 }
 0x111   : > { %v1884_v45 = vmul.f32 %v4643_v5, %v1852_v41  ;;  %6674 = vst [vmem:[#allocation4_spill] sm:$0xff] %v4689_v0  ;;  %v4694_v51 = vmul.f32 %v4447_v40, %v4584_v47  ;;  %v2113_v3 = vmul.f32 1.442695, %v2078_v1  ;;  %vm2236_vm5 = vcmp.ge.f32.partialorder %v4516_v53, 0.0  ;;  %v740_v60 = vld [vmem:[#allocation2 + $0xa8] sm:$0xff] }
 0x112   : > { %v1947_v9 = vmul.f32 %v4630_v10, %v3773_v12  ;;  %v2115_v46 = vmul.f32 1.442695, %v2079_v31  ;;  %v4699_v6 = vmul.f32 %v4389_v55, %v4685_v59  ;;  %v2117_v49 = vmul.f32 1.442695, %v2080_v33 }
 0x113   : > { %v3774_v19 = vadd.f32 -0.28449672, %v1884_v45  ;;  %v4703_v4 = vmul.f32 0.5, %v4628_v37  ;;  %v4707_v50 = vmul.f32 %v4394_v57, %v4689_v0  ;;  %v4709_v12 = vadd.f32 %v1089_v28, %v1017_v21 }
 0x114   : > { %v1979_v14 = vadd.f32 0.2548296, %v1947_v9  ;;  %3978 = vpow2.f32 %v2111_v42  ;;  %v1120_v52 = vadd.f32 %v4531_v7, %v1016_v44  ;;  %v4718_v37 = vmul.f32 0.5, %v4646_v11 }
 0x115   : > { %v1948_v38 = vmul.f32 %v4643_v5, %v3774_v19  ;;  %3980 = vpow2.f32 %v2113_v3  ;;  %v4722_v9 = vmul.f32 0.5, %v4659_v25  ;;  %v4726_v7 = vmul.f32 %v4442_v39, %v4685_v59 }
 0x116   : > { %v2011_v32 = vmul.f32 %v4630_v10, %v1979_v14  ;;  %v4712_v58 = vpop.eup %3970  ;;  %3982 = vpow2.f32 %v2115_v46  ;;  %v708_v17 = vmul.f32 %v4389_v55, %v669_v22  ;;  %v1224_v1 = vadd.f32 %v1192_v56, %v1120_v52 }
 0x117   : > { %v1980_v26 = vadd.f32 0.2548296, %v1948_v38  ;;  %v1757_v8 = vmul.f32 1.0614054, %v4712_v58  ;;  %3984 = vpow2.f32 %v2117_v49  ;;  %v780_v31 = vmul.f32 %v4394_v57, %v740_v60 }
 0x118   : > { %v2171_v41 = vmul.f32 %v3967_v30, %v2011_v32  ;;  %v4742_v43 = vmul.f32 %v4458_v48, %v4689_v0  ;;  %v1297_v32 = vmul.f32 %v4442_v39, %v669_v22  ;;  %vm2237_vm6 = vcmp.ge.f32.partialorder %v4637_v34, 0.0 }
 0x119   : > { %v2012_v10 = vmul.f32 %v4643_v5, %v1980_v26  ;;  %v4715_v5 = vmul.f32 0.5, %v4641_v54  ;;  %v986_v54 = vmul.f32 %v4419_v18, %v669_v22  ;;  %v4729_v19 = vpop.eup %3972  ;;  %v3743_v23 = vadd.f32 -1.4531521, %v1757_v8  ;;  %v670_v8 = vld [vmem:[#allocation2 + $0xaf] sm:$0xff] }
 0x11a   : > { %v2203_v47 = vsub.f32 1.0, %v2171_v41  ;;  %v4734_v25 = vpop.eup %3974  ;;  %v1758_v28 = vmul.f32 1.0614054, %v4729_v19  ;;  %v1329_v46 = vadd.f32 %v1297_v32, %v1224_v1  ;;  %v4770_v1 = vld [vmem:[#allocation2 + $0xd1] sm:$0xff]  ;;  %vm2238_vm7 = vcmp.ge.f32.partialorder %v4652_v62, 0.0 }
 0x11b   : > { %v2172_v45 = vmul.f32 %v3969_v36, %v2012_v10  ;;  %v1759_v38 = vmul.f32 1.0614054, %v4734_v25  ;;  %v1821_v33 = vmul.f32 %v4712_v58, %v3743_v23  ;;  %v1018_v42 = vadd.f32 %v986_v54, %v4615_v27  ;;  %v4751_v10 = vld [vmem:[#allocation2 + $0xcf] sm:$0xff]  ;;  %6675 = vst [vmem:[#allocation5_spill] sm:$0xff] %v4770_v1 }
 0x11c   : > { %v2267_v63 = vsub.f32 0.0, %v2203_v47  ;;  %v3744_v21 = vadd.f32 -1.4531521, %v1758_v28  ;;  %v4766_v23 = vmul.f32 %v4389_v55, %v4751_v10  ;;  %v741_v28 = vld [vmem:[#allocation2 + $0xb0] sm:$0xff]  ;;  %vm2239_vm8 = vcmp.ge.f32.partialorder %v4656_v16, 0.0 }
 0x11d   : > { %v2204_v15 = vsub.f32 1.0, %v2172_v45  ;;  %v4749_v36 = vpop.eup %3976  ;;  %v3745_v3 = vadd.f32 -1.4531521, %v1759_v38  ;;  %v1853_v41 = vadd.f32 1.4214138, %v1821_v33  ;;  %v1401_v45 = vmul.f32 %v4458_v48, %v740_v60 }
 0x11e   : > { %v2299_v11 = vsel %vm2235_vm4, %v2203_v47, %v2267_v63  ;;  %v1760_v49 = vmul.f32 1.0614054, %v4749_v36  ;;  %v1822_v53 = vmul.f32 %v4729_v19, %v3744_v21  ;;  %v4756_v47 = vadd.f32 %v780_v31, %v708_v17  ;;  %v4762_v63 = vld [vmem:[#allocation2 + $0xd0] sm:$0xff] }
 0x11f   : > { %v2268_v30 = vsub.f32 0.0, %v2204_v15  ;;  %v2363_v14 = vadd.f32 1.0, %v2299_v11  ;;  %v1823_v27 = vmul.f32 %v4734_v25, %v3745_v3  ;;  %v1885_v52 = vmul.f32 %v4712_v58, %v1853_v41  ;;  %v4768_v17 = vld [vmem:[#allocation2 + $0xc9] sm:$0xff] }
 0x120   : > { %v1854_v54 = vadd.f32 1.4214138, %v1822_v53  ;;  %v1404_v32 = vmul.f32 %v4458_v48, %v4762_v63  ;;  %v1508_v3 = vmul.f32 %v4468_v61, %v4770_v1  ;;  %v844_v41 = vld [vmem:[#allocation2 + $0xa9] sm:$0xff]  ;;  %vm2240_vm9 = vcmp.ge.f32.partialorder %v4666_v35, 0.0 }
 0x121   : > { %v2300_v56 = vsel %vm2236_vm5, %v2204_v15, %v2268_v30  ;;  %v2395_v44 = vmul.f32 %v2363_v14, %v4610_v20  ;;  %v1090_v20 = vmul.f32 %v4431_v29, %v740_v60  ;;  %v3746_v15 = vadd.f32 -1.4531521, %v1760_v49  ;;  %v3979_v31 = vpop.eup %3978 }
 0x122   : > { %v2364_v26 = vadd.f32 1.0, %v2300_v56  ;;  %v3775_v30 = vadd.f32 -0.28449672, %v1885_v52  ;;  %v4773_v14 = vadd.f32 %v1401_v45, %v1329_v46  ;;  %v1300_v60 = vmul.f32 %v4442_v39, %v4751_v10 }
 0x123   : > { %2427 = vst.msk [vmem:[#allocation2 + $0x28] sm:$0xff] %vm553_vm3, %v2395_v44  ;;  %v1122_v11 = vadd.f32 %v1090_v20, %v1018_v42  ;;  %v1824_v38 = vmul.f32 %v4749_v36, %v3746_v15  ;;  %v1886_v33 = vmul.f32 %v4729_v19, %v1854_v54  ;;  %v987_v56 = vmul.f32 %v4419_v18, %v670_v8  ;;  %v3981_v44 = vpop.eup %3980  ;;  %v4788_v20 = vld [vmem:[#allocation2 + $0xb1] sm:$0xff] }
 0x124   : > { %v2396_v22 = vmul.f32 %v2364_v26, %v2332_v13  ;;  %v1855_v13 = vadd.f32 1.4214138, %v1823_v27  ;;  %v1949_v42 = vmul.f32 %v4712_v58, %v3775_v30  ;;  %v1507_v26 = vmul.f32 %v4468_v61, %v4768_v17  ;;  %v3983_v46 = vpop.eup %3982 }
 0x125   : > { %v1856_v49 = vadd.f32 1.4214138, %v1824_v38  ;;  %v3776_v53 = vadd.f32 -0.28449672, %v1886_v33  ;;  %v1091_v27 = vmul.f32 %v4431_v29, %v741_v28  ;;  %v3985_v52 = vpop.eup %3984  ;;  %v709_v54 = vmul.f32 %v4389_v55, %v670_v8 }
 0x126   : > { %2428 = vst.msk [vmem:[#allocation2 + $0x30] sm:$0xff] %vm553_vm3, %v2396_v22  ;;  %v1887_v21 = vmul.f32 %v4734_v25, %v1855_v13  ;;  %v1019_v22 = vadd.f32 %v987_v56, %v4677_v24  ;;  %v1981_v15 = vadd.f32 0.2548296, %v1949_v42  ;;  %v781_v13 = vmul.f32 %v4394_v57, %v741_v28 }
 0x127   : > { %v1888_v30 = vmul.f32 %v4749_v36, %v1856_v49  ;;  %v1950_v0 = vmul.f32 %v4729_v19, %v3776_v53  ;;  %v1194_v33 = vmul.f32 %v4447_v40, %v844_v41  ;;  %v1195_v55 = vmul.f32 %v4447_v40, %v4788_v20 }
 0x128   : > { %v3777_v45 = vadd.f32 -0.28449672, %v1887_v21  ;;  %v1123_v38 = vadd.f32 %v1091_v27, %v1019_v22  ;;  %v2013_v56 = vmul.f32 %v4712_v58, %v1981_v15  ;;  %v4801_v21 = vmul.f32 %v4404_v2, %v844_v41 }
 0x129   : > { %v3778_v42 = vadd.f32 -0.28449672, %v1888_v30  ;;  %v1982_v29 = vadd.f32 0.2548296, %v1950_v0  ;;  %v1225_v49 = vadd.f32 %v4694_v51, %v4709_v12  ;;  %v1226_v53 = vadd.f32 %v1194_v33, %v1122_v11 }
 0x12a   : > { %v1951_v24 = vmul.f32 %v4734_v25, %v3777_v45  ;;  %v2173_v22 = vmul.f32 %v3979_v31, %v2013_v56  ;;  %v4808_v27 = vadd.f32 %v781_v13, %v709_v54  ;;  %v1227_v45 = vadd.f32 %v1195_v55, %v1123_v38 }
 0x12b   : > { %v1952_v58 = vmul.f32 %v4749_v36, %v3778_v42  ;;  %v2014_v15 = vmul.f32 %v4729_v19, %v1982_v29  ;;  %v1298_v30 = vmul.f32 %v4442_v39, %v670_v8  ;;  %v1331_v0 = vadd.f32 %v4726_v7, %v1226_v53 }
 0x12c   : > { %v1983_v1 = vadd.f32 0.2548296, %v1951_v24  ;;  %v2205_v12 = vsub.f32 1.0, %v2173_v22  ;;  %v1332_v11 = vadd.f32 %v1300_v60, %v1227_v45  ;;  %v1402_v31 = vmul.f32 %v4458_v48, %v741_v28 }
 0x12d   : > { %v1984_v33 = vadd.f32 0.2548296, %v1952_v58  ;;  %v2174_v54 = vmul.f32 %v3981_v44, %v2014_v15  ;;  %v1330_v13 = vadd.f32 %v1298_v30, %v1225_v49  ;;  %v1435_v38 = vadd.f32 %v4742_v43, %v1331_v0 }
 0x12e   : > { %v2015_v51 = vmul.f32 %v4734_v25, %v1983_v1  ;;  %v2269_v29 = vsub.f32 0.0, %v2205_v12  ;;  %v1436_v19 = vadd.f32 %v1404_v32, %v1332_v11  ;;  %v1505_v8 = vmul.f32 %v4468_v61, %v844_v41 }
 0x12f   : > { %v2016_v7 = vmul.f32 %v4749_v36, %v1984_v33  ;;  %v2206_v56 = vsub.f32 1.0, %v2174_v54  ;;  %v1434_v25 = vadd.f32 %v1402_v31, %v1330_v13  ;;  %v1506_v1 = vmul.f32 %v4468_v61, %v4788_v20 }
 0x130   : > { %v2175_v24 = vmul.f32 %v3983_v46, %v2015_v51  ;;  %v2301_v28 = vsel %vm2237_vm6, %v2205_v12, %v2269_v29  ;;  %v4826_v43 = vadd.f32 %v1505_v8, %v4773_v14  ;;  %v4828_v44 = vadd.f32 %v1507_v26, %v1435_v38 }
 0x131   : > { %v2176_v46 = vmul.f32 %v3985_v52, %v2016_v7  ;;  %v2270_v32 = vsub.f32 0.0, %v2206_v56  ;;  %v2365_v55 = vadd.f32 1.0, %v2301_v28  ;;  %v4830_v41 = vadd.f32 %v1506_v1, %v1434_v25 }
 0x132   : > { %v2207_v60 = vsub.f32 1.0, %v2175_v24  ;;  %v4832_v42 = vadd.f32 %v1508_v3, %v1436_v19  ;;  %v4835_v49 = vmul.f32 0.70710677, %v4826_v43  ;;  %v4838_v53 = vmul.f32 0.70710677, %v4828_v44 }
 0x133   : > { %v2208_v34 = vsub.f32 1.0, %v2176_v46  ;;  %v2302_v14 = vsel %vm2238_vm7, %v2206_v56, %v2270_v32  ;;  %v2397_v26 = vmul.f32 %v2365_v55, %v4703_v4  ;;  %v4844_v52 = vmul.f32 0.70710677, %v4830_v41 }
 0x134   : > { %v2271_v36 = vsub.f32 0.0, %v2207_v60  ;;  %v2366_v3 = vadd.f32 1.0, %v2302_v14  ;;  %v4849_v45 = vmul.f32 0.70710677, %v4832_v42  ;;  %v1601_v58 = vand.u32 2147483647, %v4835_v49 }
 0x135   : > { %v2272_v15 = vsub.f32 0.0, %v2208_v34  ;;  %2429 = vst.msk [vmem:[#allocation2 + $0x48] sm:$0xff] %vm553_vm3, %v2397_v26  ;;  %v1602_v62 = vand.u32 2147483647, %v4844_v52  ;;  %v1603_v4 = vand.u32 2147483647, %v4838_v53  ;;  %v885_v19 = vmul.f32 %v4404_v2, %v4788_v20 }
 0x136   : > { %v2303_v22 = vsel %vm2239_vm8, %v2207_v60, %v2271_v36  ;;  %v2398_v0 = vmul.f32 %v2366_v3, %v4715_v5  ;;  %v1604_v51 = vand.u32 2147483647, %v4849_v45  ;;  %v1633_v16 = vmul.f32 0.3275911, %v1601_v58  ;;  %v6676_v14 = vld [vmem:[#allocation5_spill] sm:$0xff]  ;;  %v6677_v3 = vld [vmem:[#allocation4_spill] sm:$0xff] }
 0x137   : > { %v2367_v30 = vadd.f32 1.0, %v2303_v22  ;;  %v2049_v12 = vsub.f32 0.0, %v1601_v58  ;;  %v2304_v11 = vsel %vm2240_vm9, %v2208_v34, %v2272_v15  ;;  %v1634_v33 = vmul.f32 0.3275911, %v1602_v62  ;;  %v673_v34 = vld [vmem:[#allocation2 + $0xe7] sm:$0xff] }
 0x138   : > { %v1635_v54 = vmul.f32 0.3275911, %v1603_v4  ;;  %v2368_v13 = vadd.f32 1.0, %v2304_v11  ;;  %2430 = vst.msk [vmem:[#allocation2 + $0x50] sm:$0xff] %vm553_vm3, %v2398_v0  ;;  %v1636_v38 = vmul.f32 0.3275911, %v1604_v51  ;;  %v783_v5 = vmul.f32 %v4394_v57, %v4762_v63 }
 0x139   : > { %v2399_v31 = vmul.f32 %v2367_v30, %v4718_v37  ;;  %v1665_v24 = vadd.f32 1.0, %v1633_v16  ;;  %v2050_v29 = vsub.f32 0.0, %v1602_v62  ;;  %v1666_v35 = vadd.f32 1.0, %v1634_v33  ;;  %v4910_v11 = vld [vmem:[%s6641_s3 + $0x1] ss:$0 sm:$0xff] }
 0x13a   : > { %v1667_v8 = vadd.f32 1.0, %v1635_v54  ;;  %v2400_v37 = vmul.f32 %v2368_v13, %v4722_v9  ;;  %v1668_v7 = vadd.f32 1.0, %v1636_v38  ;;  %v2051_v56 = vsub.f32 0.0, %v1603_v4 }
 0x13b   : > { %2431 = vst.msk [vmem:[#allocation2 + $0x68] sm:$0xff] %vm553_vm3, %v2399_v31  ;;  %3986 = vrcp.f32 %v1665_v24  ;;  %v916_v25 = vadd.f32 %v4801_v21, %v4756_v47  ;;  %v2052_v1 = vsub.f32 0.0, %v1604_v51  ;;  %v2081_v60 = vmul.f32 %v2049_v12, %v1601_v58  ;;  %v6678_v58 = vld [vmem:[#allocation3_spill] sm:$0xff] }
 0x13c   : > { %3988 = vrcp.f32 %v1666_v35  ;;  %2432 = vst.msk [vmem:[#allocation2 + $0x70] sm:$0xff] %vm553_vm3, %v2400_v37  ;;  %v917_v57 = vadd.f32 %v885_v19, %v4808_v27  ;;  %v2082_v28 = vmul.f32 %v2050_v29, %v1602_v62  ;;  %v988_v20 = vmul.f32 %v4419_v18, %v4685_v59  ;;  %v4903_v12 = vld [vmem:[#allocation2 + $0x107] sm:$0xff]  ;;  %v4923_v29 = vld [vmem:[#allocation2 + $0x10f] sm:$0xff] }
 0x13d   : > { %3990 = vrcp.f32 %v1667_v8  ;;  %v886_v9 = vmul.f32 %v4404_v2, %v4768_v17  ;;  %v815_v46 = vadd.f32 %v783_v5, %v4766_v23  ;;  %v989_v47 = vmul.f32 %v4419_v18, %v4751_v10  ;;  %v4931_v37 = vld [vmem:[#allocation2 + $0x110] sm:$0xff] }
 0x13e   : > { %3992 = vrcp.f32 %v1668_v7  ;;  %v2083_v21 = vmul.f32 %v2051_v56, %v1603_v4  ;;  %v814_v32 = vadd.f32 %v4707_v50, %v4699_v6  ;;  %v1020_v55 = vadd.f32 %v988_v20, %v916_v25  ;;  %v744_v6 = vld [vmem:[#allocation2 + $0xe8] sm:$0xff]  ;;  %v4950_v20 = vld [vmem:[#allocation2 + $0x111] sm:$0xff] }
 0x13f   : > { %v2084_v27 = vmul.f32 %v2052_v1, %v1604_v51  ;;  %v2119_v36 = vmul.f32 1.442695, %v2081_v60  ;;  %v887_v59 = vmul.f32 %v4404_v2, %v6676_v14  ;;  %v1021_v26 = vadd.f32 %v989_v47, %v917_v57  ;;  %v674_v25 = vld [vmem:[#allocation2 + $0xef] sm:$0xff] }
 0x140   : > { %v2121_v22 = vmul.f32 1.442695, %v2082_v28  ;;  %v1092_v15 = vmul.f32 %v6678_v58, %v6677_v3  ;;  %v918_v23 = vadd.f32 %v886_v9, %v814_v32  ;;  %v1093_v10 = vmul.f32 %v6678_v58, %v4762_v63  ;;  %v4900_v63 = vld [vmem:[%s6641_s3] ss:$0 sm:$0xff] }
 0x141   : > { %v4884_v30 = vadd.f32 %v887_v59, %v815_v46  ;;  %v2123_v62 = vmul.f32 1.442695, %v2083_v21  ;;  %v990_v50 = vmul.f32 %v4419_v18, %v673_v34  ;;  %v1196_v4 = vmul.f32 %v4447_v40, %v4768_v17  ;;  %v4905_v17 = vld [vmem:[#allocation2 + $0x108] sm:$0xff] }
 0x142   : > { %3994 = vpow2.f32 %v2119_v36  ;;  %v2125_v2 = vmul.f32 1.442695, %v2084_v27  ;;  %v1124_v0 = vadd.f32 %v1092_v15, %v1020_v55  ;;  %v4893_v51 = vmul.f32 %v4447_v40, %v6676_v14  ;;  %v745_v27 = vld [vmem:[#allocation2 + $0xf0] sm:$0xff] }
 0x143   : > { %v4895_v16 = vadd.f32 %v1093_v10, %v1021_v26  ;;  %3996 = vpow2.f32 %v2121_v22  ;;  %v712_v18 = vmul.f32 %v4900_v63, %v673_v34  ;;  %v784_v40 = vmul.f32 %v4910_v11, %v744_v6  ;;  %v848_v59 = vld [vmem:[#allocation2 + $0xe9] sm:$0xff]  ;;  %v849_v10 = vld [vmem:[#allocation2 + $0xf1] sm:$0xff] }
 0x144   : > { %v1022_v31 = vadd.f32 %v990_v50, %v918_v23  ;;  %v1228_v33 = vadd.f32 %v1196_v4, %v1124_v0  ;;  %v1301_v54 = vmul.f32 %v4442_v39, %v673_v34  ;;  %3998 = vpow2.f32 %v2123_v62  ;;  %v4991_v0 = vld [vmem:[%s6641_s3 + $0x2] ss:$0 sm:$0xff] }
 0x145   : > { %v4915_v13 = vmul.f32 0.5, %v4826_v43  ;;  %v4918_v38 = vmul.f32 0.5, %v4830_v41  ;;  %v4921_v24 = vmul.f32 0.5, %v4828_v44  ;;  %4000 = vpow2.f32 %v2125_v2  ;;  %v4933_v43 = vld [vmem:[#allocation2 + $0x109] sm:$0xff] }
 0x146   : > { %v4928_v19 = vmul.f32 0.5, %v4832_v42  ;;  %v1094_v35 = vmul.f32 %v6678_v58, %v744_v6  ;;  %v1333_v8 = vadd.f32 %v1301_v54, %v1228_v33  ;;  %v1303_v7 = vmul.f32 %v4442_v39, %v4903_v12  ;;  %v5000_v33 = vld [vmem:[%s6641_s3 + $0x5] ss:$0 sm:$0xff] }
 0x147   : > { %v4942_v56 = vmul.f32 %v4458_v48, %v4905_v17  ;;  %v1405_v42 = vmul.f32 %v4458_v48, %v744_v6  ;;  %v4948_v57 = vadd.f32 %v784_v40, %v712_v18  ;;  %v1304_v9 = vmul.f32 %v4442_v39, %v4923_v29  ;;  %v4969_v39 = vld [vmem:[%s6641_s3 + $0x3] ss:$0 sm:$0xff]  ;;  %v4983_v6 = vld [vmem:[%s6641_s3 + $0x4] ss:$0 sm:$0xff]  ;;  %6679 = vst [vmem:[#allocation5_spill] sm:$0xff] %v5000_v33 }
 0x148   : > { %v4925_v5 = vpop.eup %3986  ;;  %v1126_v28 = vadd.f32 %v1094_v35, %v1022_v31  ;;  %v1408_v32 = vmul.f32 %v4458_v48, %v4931_v37  ;;  %v4961_v55 = vmul.f32 %v4468_v61, %v4933_v43  ;;  %v991_v26 = vmul.f32 %v4969_v39, %v674_v25 }
 0x149   : > { %v4935_v41 = vpop.eup %3988  ;;  %v1761_v44 = vmul.f32 1.0614054, %v4925_v5  ;;  %v4964_v14 = vadd.f32 %v1405_v42, %v1333_v8  ;;  %v4975_v3 = vmul.f32 %v4468_v61, %v4950_v20  ;;  %v713_v58 = vmul.f32 %v4900_v63, %v674_v25 }
 0x14a   : > { %v4945_v1 = vpop.eup %3990  ;;  %v1762_v60 = vmul.f32 1.0614054, %v4935_v41  ;;  %v1023_v62 = vadd.f32 %v991_v26, %v4884_v30  ;;  %v1095_v50 = vmul.f32 %v4983_v6, %v745_v27  ;;  %v785_v61 = vmul.f32 %v4910_v11, %v745_v27 }
 0x14b   : > { %v4954_v46 = vpop.eup %3992  ;;  %v1763_v47 = vmul.f32 1.0614054, %v4945_v1  ;;  %v3747_v21 = vadd.f32 -1.4531521, %v1761_v44  ;;  %v4994_v18 = vmul.f32 %v4991_v0, %v848_v59  ;;  %v1198_v54 = vmul.f32 %v5000_v33, %v848_v59 }
 0x14c   : > { %v1764_v36 = vmul.f32 1.0614054, %v4954_v46  ;;  %v3748_v34 = vadd.f32 -1.4531521, %v1762_v60  ;;  %v1127_v31 = vadd.f32 %v1095_v50, %v1023_v62  ;;  %v5005_v42 = vmul.f32 %v4991_v0, %v849_v10 }
 0x14d   : > { %v3749_v22 = vadd.f32 -1.4531521, %v1763_v47  ;;  %v1825_v48 = vmul.f32 %v4925_v5, %v3747_v21  ;;  %v1199_v60 = vmul.f32 %v5000_v33, %v849_v10  ;;  %v1230_v26 = vadd.f32 %v1198_v54, %v1126_v28 }
 0x14e   : > { %v3750_v15 = vadd.f32 -1.4531521, %v1764_v36  ;;  %v1826_v23 = vmul.f32 %v4935_v41, %v3748_v34  ;;  %v1229_v34 = vadd.f32 %v4893_v51, %v4895_v16  ;;  %vm2241_vm10 = vcmp.ge.f32.partialorder %v4835_v49, 0.0 }
 0x14f   : > { %v1827_v4 = vmul.f32 %v4945_v1, %v3749_v22  ;;  %v1857_v2 = vadd.f32 1.4214138, %v1825_v48  ;;  %v3995_v35 = vpop.eup %3994  ;;  %vm2242_vm11 = vcmp.ge.f32.partialorder %v4844_v52, 0.0  ;;  %vm2243_vm12 = vcmp.ge.f32.partialorder %v4838_v53, 0.0 }
 0x150   : > { %v1828_v30 = vmul.f32 %v4954_v46, %v3750_v15  ;;  %v1858_v40 = vadd.f32 1.4214138, %v1826_v23  ;;  %v3997_v47 = vpop.eup %3996  ;;  %v5012_v15 = vadd.f32 %v785_v61, %v713_v58  ;;  %v1231_v23 = vadd.f32 %v1199_v60, %v1127_v31  ;;  %v5025_v58 = vld [vmem:[%s6641_s3 + $0x7] ss:$0 sm:$0xff] }
 0x151   : > { %v1859_v8 = vadd.f32 1.4214138, %v1827_v4  ;;  %v1889_v44 = vmul.f32 %v4925_v5, %v1857_v2  ;;  %v3999_v62 = vpop.eup %3998  ;;  %v5018_v2 = vld [vmem:[%s6641_s3 + $0x6] ss:$0 sm:$0xff]  ;;  %v1406_v61 = vmul.f32 %v5025_v58, %v745_v27  ;;  %vm2244_vm13 = vcmp.ge.f32.partialorder %v4849_v45, 0.0 }
 0x152   : > { %v1860_v21 = vadd.f32 1.4214138, %v1828_v30  ;;  %v1890_v36 = vmul.f32 %v4935_v41, %v1858_v40  ;;  %6680 = vst [vmem:[#allocation4_spill] sm:$0xff] %v5018_v2  ;;  %v1302_v30 = vmul.f32 %v5018_v2, %v674_v25  ;;  %v1335_v40 = vadd.f32 %v1303_v7, %v1230_v26  ;;  %v4001_v51 = vpop.eup %4000 }
 0x153   : > { %v1891_v22 = vmul.f32 %v4945_v1, %v1859_v8  ;;  %v3779_v48 = vadd.f32 -0.28449672, %v1889_v44  ;;  %v1336_v54 = vadd.f32 %v1304_v9, %v1231_v23  ;;  %v5034_v9 = vld [vmem:[%s6641_s3 + $0x8] ss:$0 sm:$0xff]  ;;  %v715_v53 = vmul.f32 %v4900_v63, %v4923_v29 }
 0x154   : > { %v1892_v50 = vmul.f32 %v4954_v46, %v1860_v21  ;;  %v3780_v4 = vadd.f32 -0.28449672, %v1890_v36  ;;  %v1334_v44 = vadd.f32 %v1302_v30, %v1229_v34  ;;  %v1439_v60 = vadd.f32 %v4942_v56, %v1335_v40 }
 0x155   : > { %v3781_v16 = vadd.f32 -0.28449672, %v1891_v22  ;;  %v1953_v28 = vmul.f32 %v4925_v5, %v3779_v48  ;;  %v1440_v21 = vadd.f32 %v1408_v32, %v1336_v54  ;;  %v1509_v36 = vmul.f32 %v5034_v9, %v848_v59 }
 0x156   : > { %v3782_v31 = vadd.f32 -0.28449672, %v1892_v50  ;;  %v1954_v8 = vmul.f32 %v4935_v41, %v3780_v4  ;;  %v1438_v22 = vadd.f32 %v1406_v61, %v1334_v44  ;;  %v1510_v34 = vmul.f32 %v5034_v9, %v849_v10 }
 0x157   : > { %v1955_v7 = vmul.f32 %v4945_v1, %v3781_v16  ;;  %v1985_v25 = vadd.f32 0.2548296, %v1953_v28  ;;  %v5043_v32 = vadd.f32 %v1509_v36, %v4964_v14  ;;  %v5046_v23 = vadd.f32 %v4961_v55, %v1439_v60 }
 0x158   : > { %v1956_v26 = vmul.f32 %v4954_v46, %v3782_v31  ;;  %v1986_v27 = vadd.f32 0.2548296, %v1954_v8  ;;  %v5050_v4 = vadd.f32 %v1510_v34, %v1438_v22  ;;  %v5053_v10 = vadd.f32 %v4975_v3, %v1440_v21 }
 0x159   : > { %v1987_v56 = vadd.f32 0.2548296, %v1955_v7  ;;  %v2017_v48 = vmul.f32 %v4925_v5, %v1985_v25  ;;  %v5058_v14 = vmul.f32 0.70710677, %v5043_v32  ;;  %v5061_v55 = vmul.f32 0.70710677, %v5046_v23 }
 0x15a   : > { %v1988_v59 = vadd.f32 0.2548296, %v1956_v26  ;;  %v2018_v50 = vmul.f32 %v4935_v41, %v1986_v27  ;;  %v5065_v16 = vmul.f32 0.70710677, %v5050_v4  ;;  %v5068_v3 = vmul.f32 0.70710677, %v5053_v10 }
 0x15b   : > { %v2019_v5 = vmul.f32 %v4945_v1, %v1987_v56  ;;  %v2177_v30 = vmul.f32 %v3995_v35, %v2017_v48  ;;  %v1605_v35 = vand.u32 2147483647, %v5058_v14  ;;  %v1607_v54 = vand.u32 2147483647, %v5061_v55 }
 0x15c   : > { %v2020_v41 = vmul.f32 %v4954_v46, %v1988_v59  ;;  %v2178_v40 = vmul.f32 %v3997_v47, %v2018_v50  ;;  %v1606_v8 = vand.u32 2147483647, %v5065_v16  ;;  %v1608_v44 = vand.u32 2147483647, %v5068_v3 }
 0x15d   : > { %v2179_v28 = vmul.f32 %v3999_v62, %v2019_v5  ;;  %v2209_v1 = vsub.f32 1.0, %v2177_v30  ;;  %v1637_v60 = vmul.f32 0.3275911, %v1605_v35  ;;  %v1639_v7 = vmul.f32 0.3275911, %v1607_v54 }
 0x15e   : > { %v2180_v61 = vmul.f32 %v4001_v51, %v2020_v41  ;;  %v2210_v31 = vsub.f32 1.0, %v2178_v40  ;;  %v1638_v36 = vmul.f32 0.3275911, %v1606_v8  ;;  %v1640_v26 = vmul.f32 0.3275911, %v1608_v44 }
 0x15f   : > { %v2211_v46 = vsub.f32 1.0, %v2179_v28  ;;  %v2273_v47 = vsub.f32 0.0, %v2209_v1  ;;  %v1669_v22 = vadd.f32 1.0, %v1637_v60  ;;  %v1671_v34 = vadd.f32 1.0, %v1639_v7 }
 0x160   : > { %v2212_v25 = vsub.f32 1.0, %v2180_v61  ;;  %v2274_v21 = vsub.f32 0.0, %v2210_v31  ;;  %v1670_v59 = vadd.f32 1.0, %v1638_v36  ;;  %v1672_v30 = vadd.f32 1.0, %v1640_v26 }
 0x161   : > { %v2275_v62 = vsub.f32 0.0, %v2211_v46  ;;  %v2305_v27 = vsel %vm2241_vm10, %v2209_v1, %v2273_v47  ;;  %4002 = vrcp.f32 %v1669_v22  ;;  %v2053_v52 = vsub.f32 0.0, %v1605_v35  ;;  %v5110_v22 = vpop.f32.mrf.mxu0 }
 0x162   : > { %v2276_v51 = vsub.f32 0.0, %v2212_v25  ;;  %v2306_v56 = vsel %vm2242_vm11, %v2210_v31, %v2274_v21  ;;  %v2369_v48 = vadd.f32 1.0, %v2305_v27  ;;  %4004 = vrcp.f32 %v1670_v59 }
 0x163   : > { %v2307_v50 = vsel %vm2243_vm12, %v2211_v46, %v2275_v62  ;;  %v2370_v5 = vadd.f32 1.0, %v2306_v56  ;;  %4006 = vrcp.f32 %v1671_v34  ;;  %v787_v45 = vmul.f32 %v4910_v11, %v4931_v37 }
 0x164   : > { %v2308_v41 = vsel %vm2244_vm13, %v2212_v25, %v2276_v51  ;;  %v2371_v40 = vadd.f32 1.0, %v2307_v50  ;;  %v2401_v49 = vmul.f32 %v2369_v48, %v4915_v13  ;;  %4008 = vrcp.f32 %v1672_v30  ;;  %v679_v50 = vld [vmem:[#allocation2 + $0x147] sm:$0xff] }
 0x165   : > { %v2372_v28 = vadd.f32 1.0, %v2308_v41  ;;  %v2402_v1 = vmul.f32 %v2370_v5, %v4918_v38  ;;  %v920_v13 = vadd.f32 %v4994_v18, %v4948_v57  ;;  %v921_v38 = vadd.f32 %v5005_v42, %v5012_v15  ;;  %v5137_v41 = vld [vmem:[#allocation2 + $0x148] sm:$0xff] }
 0x166   : > { %v2403_v61 = vmul.f32 %v2371_v40, %v4921_v24  ;;  %2433 = vst.msk [vmem:[#allocation2 + $0x88] sm:$0xff] %vm553_vm3, %v2401_v49  ;;  %v2054_v24 = vsub.f32 0.0, %v1606_v8  ;;  %v714_v46 = vmul.f32 %v4900_v63, %v4903_v12  ;;  %v786_v47 = vmul.f32 %v4910_v11, %v4905_v17  ;;  %v5139_v40 = vpop.f32.mrf.mxu0 }
 0x167   : > { %v2404_v31 = vmul.f32 %v2372_v28, %v4928_v19  ;;  %2434 = vst.msk [vmem:[#allocation2 + $0x90] sm:$0xff] %vm553_vm3, %v2402_v1  ;;  %v2055_v60 = vsub.f32 0.0, %v1607_v54  ;;  %v992_v19 = vmul.f32 %v4969_v39, %v4903_v12  ;;  %v993_v57 = vmul.f32 %v4969_v39, %v4923_v29 }
 0x168   : > { %2435 = vst.msk [vmem:[#allocation2 + $0xa8] sm:$0xff] %vm553_vm3, %v2403_v61  ;;  %v2056_v18 = vsub.f32 0.0, %v1608_v44  ;;  %v2085_v42 = vmul.f32 %v2053_v52, %v1605_v35  ;;  %v890_v15 = vmul.f32 %v4991_v0, %v4933_v43  ;;  %v819_v7 = vadd.f32 %v787_v45, %v715_v53 }
 0x169   : > { %2436 = vst.msk [vmem:[#allocation2 + $0xb0] sm:$0xff] %vm553_vm3, %v2404_v31  ;;  %v1024_v25 = vadd.f32 %v992_v19, %v920_v13  ;;  %v1025_v21 = vadd.f32 %v993_v57, %v921_v38  ;;  %v2086_v36 = vmul.f32 %v2054_v24, %v1606_v8  ;;  %v818_v26 = vadd.f32 %v786_v47, %v714_v46  ;;  %v5165_v47 = vld [vmem:[#allocation2 + $0x128] sm:$0xff]  ;;  %v5168_v19 = vpop.f32.mrf.mxu0 }
 0x16a   : > { %v1096_v62 = vmul.f32 %v4983_v6, %v4905_v17  ;;  %v2087_v27 = vmul.f32 %v2055_v60, %v1607_v54  ;;  %v891_v12 = vmul.f32 %v4991_v0, %v4950_v20  ;;  %v1097_v29 = vmul.f32 %v4983_v6, %v4931_v37  ;;  %v677_v17 = vld [vmem:[#allocation2 + $0x127] sm:$0xff]  ;;  %6682 = vst [vmem:[#allocation6_spill] sm:$0xff] %v5168_v19 }
 0x16b   : > { %v2088_v35 = vmul.f32 %v2056_v18, %v1608_v44  ;;  %v2127_v34 = vmul.f32 1.442695, %v2085_v42  ;;  %v922_v51 = vadd.f32 %v890_v15, %v818_v26  ;;  %v1200_v56 = vmul.f32 %v5000_v33, %v4933_v43 }
 0x16c   : > { %v5120_v8 = vmul.f32 %v5000_v33, %v4950_v20  ;;  %v5122_v54 = vadd.f32 %v891_v12, %v819_v7  ;;  %v5124_v48 = vadd.f32 %v1097_v29, %v1025_v21  ;;  %v2129_v59 = vmul.f32 1.442695, %v2086_v36  ;;  %v678_v12 = vld [vmem:[#allocation2 + $0x12f] sm:$0xff] }
 0x16d   : > { %v1128_v5 = vadd.f32 %v1096_v62, %v1024_v25  ;;  %v2131_v37 = vmul.f32 1.442695, %v2087_v27  ;;  %v5129_v44 = vmul.f32 0.5, %v5043_v32  ;;  %v5132_v43 = vmul.f32 0.5, %v5050_v4 }
 0x16e   : > { %v5126_v30 = vpop.eup %4002  ;;  %v5135_v20 = vmul.f32 0.5, %v5046_v23  ;;  %4010 = vpow2.f32 %v2127_v34  ;;  %v2133_v1 = vmul.f32 1.442695, %v2088_v35  ;;  %v994_v52 = vmul.f32 %v4969_v39, %v677_v17 }
 0x16f   : > { %v5141_v49 = vpop.eup %4004  ;;  %v1765_v28 = vmul.f32 1.0614054, %v5126_v30  ;;  %v5149_v61 = vmul.f32 0.5, %v5053_v10  ;;  %v5152_v23 = vmul.f32 %v4900_v63, %v679_v50  ;;  %v1232_v53 = vadd.f32 %v1200_v56, %v1128_v5  ;;  %v5187_v56 = vld [vmem:[#allocation2 + $0x150] sm:$0xff] }
 0x170   : > { %v5145_v32 = vpop.eup %4006  ;;  %v1766_v4 = vmul.f32 1.0614054, %v5141_v49  ;;  %4012 = vpow2.f32 %v2129_v59  ;;  %v5159_v38 = vmul.f32 %v4910_v11, %v5137_v41  ;;  %v5163_v10 = vmul.f32 %v4969_v39, %v679_v50  ;;  %v5189_v59 = vpop.f32.mrf.mxu0 }
 0x171   : > { %v5154_v45 = vpop.eup %4008  ;;  %v1767_v31 = vmul.f32 1.0614054, %v5145_v32  ;;  %v3751_v13 = vadd.f32 -1.4531521, %v1765_v28  ;;  %v1305_v60 = vmul.f32 %v5018_v2, %v677_v17  ;;  %4014 = vpow2.f32 %v2131_v37  ;;  %6683 = vst [vmem:[#allocation7_spill] sm:$0xff] %v5189_v59 }
 0x172   : > { %v1768_v24 = vmul.f32 1.0614054, %v5154_v45  ;;  %v3752_v46 = vadd.f32 -1.4531521, %v1766_v4  ;;  %6681 = vst [vmem:[#allocation3_spill] sm:$0xff] %v5163_v10  ;;  %v1026_v42 = vadd.f32 %v994_v52, %v922_v51  ;;  %v5173_v25 = vmul.f32 %v5018_v2, %v679_v50  ;;  %v5185_v51 = vld [vmem:[#allocation2 + $0x14f] sm:$0xff] }
 0x173   : > { %v3753_v57 = vadd.f32 -1.4531521, %v1767_v31  ;;  %v1829_v18 = vmul.f32 %v5126_v30, %v3751_v13  ;;  %v1337_v21 = vadd.f32 %v1305_v60, %v1232_v53  ;;  %v5178_v62 = vmul.f32 %v5025_v58, %v5137_v41  ;;  %v749_v52 = vld [vmem:[#allocation2 + $0x130] sm:$0xff] }
 0x174   : > { %v3754_v15 = vadd.f32 -1.4531521, %v1768_v24  ;;  %v1830_v7 = vmul.f32 %v5141_v49, %v3752_v46  ;;  %v1098_v27 = vmul.f32 %v4983_v6, %v5165_v47  ;;  %4016 = vpow2.f32 %v2133_v1  ;;  %v5198_v31 = vld [vmem:[#allocation2 + $0x149] sm:$0xff]  ;;  %v5200_v13 = vld [vmem:[#allocation2 + $0x151] sm:$0xff] }
 0x175   : > { %v1831_v36 = vmul.f32 %v5145_v32, %v3753_v57  ;;  %v1861_v26 = vadd.f32 1.4214138, %v1829_v18  ;;  %v1409_v34 = vmul.f32 %v5025_v58, %v5165_v47  ;;  %v5193_v37 = vmul.f32 %v4900_v63, %v677_v17  ;;  %6684 = vst [vmem:[#allocation8_spill] sm:$0xff] %v5200_v13  ;;  %v5208_v18 = vld [vmem:[#allocation2 + $0x129] sm:$0xff] }
 0x176   : > { %v1832_v29 = vmul.f32 %v5154_v45, %v3754_v15  ;;  %v1862_v35 = vadd.f32 1.4214138, %v1830_v7  ;;  %v1130_v28 = vadd.f32 %v1098_v27, %v1026_v42  ;;  %v995_v24 = vmul.f32 %v4969_v39, %v678_v12  ;;  %v5211_v7 = vld [vmem:[#allocation2 + $0x131] sm:$0xff] }
 0x177   : > { %v1863_v50 = vadd.f32 1.4214138, %v1831_v36  ;;  %v1893_v5 = vmul.f32 %v5126_v30, %v1861_v26  ;;  %v5196_v53 = vadd.f32 %v1409_v34, %v1337_v21  ;;  %v1308_v17 = vmul.f32 %v5018_v2, %v5185_v51  ;;  %v5215_v26 = vpop.f32.mrf.mxu0 }
 0x178   : > { %v1864_v4 = vadd.f32 1.4214138, %v1832_v29  ;;  %v1894_v1 = vmul.f32 %v5141_v49, %v1862_v35  ;;  %v1412_v57 = vmul.f32 %v5025_v58, %v5187_v56  ;;  %v1027_v21 = vadd.f32 %v995_v24, %v5122_v54  ;;  %6685 = vst [vmem:[#allocation9_spill] sm:$0xff] %v5215_v26 }
 0x179   : > { %v1895_v46 = vmul.f32 %v5145_v32, %v1863_v50  ;;  %v3783_v60 = vadd.f32 -0.28449672, %v1893_v5  ;;  %v1099_v36 = vmul.f32 %v4983_v6, %v749_v52  ;;  %v1515_v35 = vmul.f32 %v5034_v9, %v5198_v31 }
 0x17a   : > { %v1896_v42 = vmul.f32 %v5154_v45, %v1864_v4  ;;  %v3784_v15 = vadd.f32 -0.28449672, %v1894_v1  ;;  %v1516_v34 = vmul.f32 %v5034_v9, %v5200_v13  ;;  %v1202_v54 = vmul.f32 %v5000_v33, %v5208_v18 }
 0x17b   : > { %v3785_v27 = vadd.f32 -0.28449672, %v1895_v46  ;;  %v1957_v29 = vmul.f32 %v5126_v30, %v3783_v60  ;;  %v4011_v50 = vpop.eup %4010  ;;  %v1131_v1 = vadd.f32 %v1099_v36, %v1027_v21  ;;  %v5227_v46 = vmul.f32 %v4900_v63, %v678_v12  ;;  %v5235_v21 = vpop.f32.mrf.mxu0 }
 0x17c   : > { %v3786_v5 = vadd.f32 -0.28449672, %v1896_v42  ;;  %v1958_v4 = vmul.f32 %v5141_v49, %v3784_v15  ;;  %v1203_v60 = vmul.f32 %v5000_v33, %v5211_v7  ;;  %vm2245_vm14 = vcmp.ge.f32.partialorder %v5058_v14, 0.0 }
 0x17d   : > { %v1959_v24 = vmul.f32 %v5145_v32, %v3785_v27  ;;  %v1989_v26 = vadd.f32 0.2548296, %v1957_v29  ;;  %v4013_v59 = vpop.eup %4012  ;;  %v1233_v42 = vadd.f32 %v5120_v8, %v5124_v48  ;;  %v1234_v15 = vadd.f32 %v1202_v54, %v1130_v28 }
 0x17e   : > { %v1960_v13 = vmul.f32 %v5154_v45, %v3786_v5  ;;  %v1990_v10 = vadd.f32 0.2548296, %v1958_v4  ;;  %vm2246_vm15 = vcmp.ge.f32.partialorder %v5065_v16, 0.0  ;;  %v5240_v29 = vmul.f32 %v4910_v11, %v749_v52  ;;  %v4015_v19 = vpop.eup %4014 }
 0x17f   : > { %v1991_v36 = vadd.f32 0.2548296, %v1959_v24  ;;  %v2021_v27 = vmul.f32 %v5126_v30, %v1989_v26  ;;  %v1235_v33 = vadd.f32 %v1203_v60, %v1131_v1  ;;  %vm2247_vm0 = vcmp.ge.f32.partialorder %v5061_v55, 0.0 }
 0x180   : > { %v1992_v5 = vadd.f32 0.2548296, %v1960_v13  ;;  %v2022_v4 = vmul.f32 %v5141_v49, %v1990_v10  ;;  %v1306_v8 = vmul.f32 %v5018_v2, %v678_v12  ;;  %v1339_v48 = vadd.f32 %v5173_v25, %v1234_v15  ;;  %v5251_v10 = vpop.f32.mrf.mxu0 }
 0x181   : > { %v2023_v28 = vmul.f32 %v5145_v32, %v1991_v36  ;;  %v2181_v54 = vmul.f32 %v4011_v50, %v2021_v27  ;;  %vm2248_vm1 = vcmp.ge.f32.partialorder %v5068_v3, 0.0  ;;  %v1340_v30 = vadd.f32 %v1308_v17, %v1235_v33  ;;  %v4017_v60 = vpop.eup %4016 }
 0x182   : > { %v1410_v26 = vmul.f32 %v5025_v58, %v749_v52  ;;  %v2024_v1 = vmul.f32 %v5154_v45, %v1992_v5  ;;  %v2182_v24 = vmul.f32 %v4013_v59, %v2022_v4  ;;  %v1338_v13 = vadd.f32 %v1306_v8, %v1233_v42  ;;  %v5266_v27 = vpop.f32.mrf.mxu0 }
 0x183   : > { %v1443_v49 = vadd.f32 %v5178_v62, %v1339_v48  ;;  %v2183_v12 = vmul.f32 %v4015_v19, %v2023_v28  ;;  %v2213_v2 = vsub.f32 1.0, %v2181_v54  ;;  %v1444_v25 = vadd.f32 %v1412_v57, %v1340_v30 }
 0x184   : > { %v1513_v32 = vmul.f32 %v5034_v9, %v5208_v18  ;;  %v2184_v50 = vmul.f32 %v4017_v60, %v2024_v1  ;;  %v2214_v15 = vsub.f32 1.0, %v2182_v24  ;;  %v1442_v33 = vadd.f32 %v1410_v26, %v1338_v13  ;;  %v5291_v13 = vpop.f32.mrf.mxu0 }
 0x185   : > { %v1514_v52 = vmul.f32 %v5034_v9, %v5211_v7  ;;  %v2215_v45 = vsub.f32 1.0, %v2183_v12  ;;  %v2277_v59 = vsub.f32 0.0, %v2213_v2  ;;  %v5260_v62 = vadd.f32 %v1515_v35, %v1443_v49 }
 0x186   : > { %v5258_v17 = vadd.f32 %v1513_v32, %v5196_v53  ;;  %v2216_v42 = vsub.f32 1.0, %v2184_v50  ;;  %v2278_v19 = vsub.f32 0.0, %v2214_v15  ;;  %v5264_v57 = vadd.f32 %v1516_v34, %v1444_v25 }
 0x187   : > { %v5262_v36 = vadd.f32 %v1514_v52, %v1442_v33  ;;  %v2279_v5 = vsub.f32 0.0, %v2215_v45  ;;  %v2309_v4 = vsel %vm2245_vm14, %v2213_v2, %v2277_v59  ;;  %v5274_v53 = vmul.f32 0.70710677, %v5260_v62  ;;  %v538_v59 = vpop.f32.mrf.mxu0 }
 0x188   : > { %v5271_v8 = vmul.f32 0.70710677, %v5258_v17  ;;  %v2280_v35 = vsub.f32 0.0, %v2216_v42  ;;  %v2310_v48 = vsel %vm2246_vm15, %v2214_v15, %v2278_v19  ;;  %v2373_v28 = vadd.f32 1.0, %v2309_v4 }
 0x189   : > { %v5279_v34 = vmul.f32 0.70710677, %v5262_v36  ;;  %v2311_v54 = vsel %vm2247_vm0, %v2215_v45, %v2279_v5  ;;  %v2374_v30 = vadd.f32 1.0, %v2310_v48  ;;  %v5284_v2 = vmul.f32 0.70710677, %v5264_v57 }
 0x18a   : > { %v1609_v14 = vand.u32 2147483647, %v5271_v8  ;;  %v2312_v26 = vsel %vm2248_vm1, %v2216_v42, %v2280_v35  ;;  %v2375_v1 = vadd.f32 1.0, %v2311_v54  ;;  %v2405_v16 = vmul.f32 %v2373_v28, %v5129_v44 }
 0x18b   : > { %v1610_v24 = vand.u32 2147483647, %v5279_v34  ;;  %v2376_v49 = vadd.f32 1.0, %v2312_v26  ;;  %v2406_v55 = vmul.f32 %v2374_v30, %v5132_v43  ;;  %v1611_v60 = vand.u32 2147483647, %v5274_v53 }
 0x18c   : > { %v1612_v12 = vand.u32 2147483647, %v5284_v2  ;;  %v2407_v25 = vmul.f32 %v2375_v1, %v5135_v20  ;;  %2437 = vst.msk [vmem:[#allocation2 + $0xc8] sm:$0xff] %vm553_vm3, %v2405_v16  ;;  %v788_v3 = vmul.f32 %v4910_v11, %v5165_v47  ;;  %v1641_v32 = vmul.f32 0.3275911, %v1609_v14 }
 0x18d   : > { %v1642_v44 = vmul.f32 0.3275911, %v1610_v24  ;;  %v2408_v50 = vmul.f32 %v2376_v49, %v5149_v61  ;;  %2438 = vst.msk [vmem:[#allocation2 + $0xd0] sm:$0xff] %vm553_vm3, %v2406_v55  ;;  %v821_v43 = vadd.f32 %v5240_v29, %v5227_v46  ;;  %v1643_v15 = vmul.f32 0.3275911, %v1611_v60 }
 0x18e   : > { %v1644_v33 = vmul.f32 0.3275911, %v1612_v12  ;;  %2439 = vst.msk [vmem:[#allocation2 + $0xe8] sm:$0xff] %vm553_vm3, %v2407_v25  ;;  %v892_v20 = vmul.f32 %v4991_v0, %v5208_v18  ;;  %v893_v52 = vmul.f32 %v4991_v0, %v5211_v7  ;;  %v1673_v47 = vadd.f32 1.0, %v1641_v32 }
 0x18f   : > { %v1674_v45 = vadd.f32 1.0, %v1642_v44  ;;  %2440 = vst.msk [vmem:[#allocation2 + $0xf0] sm:$0xff] %vm553_vm3, %v2408_v50  ;;  %v1675_v61 = vadd.f32 1.0, %v1643_v15  ;;  %v2057_v19 = vsub.f32 0.0, %v1609_v14  ;;  %v2058_v5 = vsub.f32 0.0, %v1610_v24  ;;  %v6688_v50 = vld [vmem:[#allocation7_spill] sm:$0xff] }
 0x190   : > { %v1676_v42 = vadd.f32 1.0, %v1644_v33  ;;  %v820_v46 = vadd.f32 %v788_v3, %v5193_v37  ;;  %v719_v29 = vmul.f32 %v4900_v63, %v5185_v51  ;;  %v791_v18 = vmul.f32 %v4910_v11, %v5187_v56  ;;  %v3913_v37 = vpop.f32.mrf.mxu0  ;;  %v6686_v3 = vld [vmem:[#allocation6_spill] sm:$0xff] }
 0x191   : > { %4018 = vrcp.f32 %v1673_v47  ;;  %v1100_v7 = vmul.f32 %v4983_v6, %v5137_v41  ;;  %v925_v4 = vadd.f32 %v893_v52, %v821_v43  ;;  %v2059_v35 = vsub.f32 0.0, %v1611_v60 }
 0x192   : > { %4020 = vrcp.f32 %v1674_v45  ;;  %v822_v48 = vadd.f32 %v5159_v38, %v5152_v23  ;;  %v924_v28 = vadd.f32 %v892_v20, %v820_v46  ;;  %v2060_v54 = vsub.f32 0.0, %v1612_v12  ;;  %v4099_v23 = vld [vmem:[%s6640_s2] ss:$0 sm:$0xff]  ;;  %v541_v33 = vpop.f32.mrf.mxu0 }
 0x193   : > { %4022 = vrcp.f32 %v1675_v61  ;;  %v997_v30 = vmul.f32 %v4969_v39, %v5185_v51  ;;  %v2089_v26 = vmul.f32 %v2057_v19, %v1609_v14  ;;  %v2090_v1 = vmul.f32 %v2058_v5, %v1610_v24  ;;  %v6687_v24 = vld [vmem:[#allocation3_spill] sm:$0xff]  ;;  %v6690_v61 = vld [vmem:[#allocation8_spill] sm:$0xff] }
 0x194   : > { %4024 = vrcp.f32 %v1676_v42  ;;  %v823_v16 = vadd.f32 %v791_v18, %v719_v29  ;;  %v894_v41 = vmul.f32 %v4991_v0, %v5198_v31  ;;  %v1101_v49 = vmul.f32 %v4983_v6, %v5187_v56  ;;  %v6689_v56 = vld [vmem:[#allocation9_spill] sm:$0xff]  ;;  %v1281_v18 = vld [vmem:[#allocation2 + $0x227] sm:$0xff] }
 0x195   : > { %v515_v38 = vadd.f32 %v4099_v23, %v5110_v22  ;;  %v1029_v55 = vadd.f32 %v997_v30, %v925_v4  ;;  %v2091_v25 = vmul.f32 %v2059_v35, %v1611_v60  ;;  %v507_v51 = vadd.f32 %v4099_v23, %v5139_v40 }
 0x196   : > { %v518_v14 = vadd.f32 %v4099_v23, %v6686_v3  ;;  %v1028_v32 = vadd.f32 %v6687_v24, %v924_v28  ;;  %v2092_v44 = vmul.f32 %v2060_v54, %v1612_v12  ;;  %v510_v43 = vadd.f32 %v4099_v23, %v6688_v50  ;;  %v1385_v28 = vld [vmem:[#allocation2 + $0x228] sm:$0xff]  ;;  %v1386_v54 = vld [vmem:[#allocation2 + $0x230] sm:$0xff] }
 0x197   : > { %649 = vst.msk [vmem:[#allocation2 + $0x188] sm:$0xff] %vm553_vm3, %v515_v38  ;;  %v531_v15 = vadd.f32 %v4099_v23, %v6689_v56  ;;  %v2135_v20 = vmul.f32 1.442695, %v2089_v26  ;;  %v2137_v52 = vmul.f32 1.442695, %v2090_v1  ;;  %647 = vst.msk [vmem:[#allocation2 + $0x168] sm:$0xff] %vm553_vm3, %v507_v51  ;;  %v523_v22 = vadd.f32 %v4099_v23, %v5235_v21 }
 0x198   : > { %650 = vst.msk [vmem:[#allocation2 + $0x190] sm:$0xff] %vm553_vm3, %v518_v14  ;;  %v534_v40 = vadd.f32 %v4099_v23, %v5251_v10  ;;  %648 = vst.msk [vmem:[#allocation2 + $0x170] sm:$0xff] %vm553_vm3, %v510_v43  ;;  %v526_v60 = vadd.f32 %v4099_v23, %v5266_v27  ;;  %v547_v12 = vadd.f32 %v4099_v23, %v5291_v13  ;;  %v2139_v5 = vmul.f32 1.442695, %v2091_v25  ;;  %v1489_v1 = vld [vmem:[#allocation2 + $0x229] sm:$0xff] }
 0x199   : > { %653 = vst.msk [vmem:[#allocation2 + $0x1c8] sm:$0xff] %vm553_vm3, %v531_v15  ;;  %v539_v47 = vadd.f32 %v4099_v23, %v538_v59  ;;  %v550_v45 = vadd.f32 %v4099_v23, %v3913_v37  ;;  %v895_v42 = vmul.f32 %v4991_v0, %v6690_v61  ;;  %v1133_v19 = vadd.f32 %v1101_v49, %v1029_v55  ;;  %v6691_v59 = vld [vmem:[#allocation5_spill] sm:$0xff]  ;;  %v6692_v38 = vld [vmem:[#allocation4_spill] sm:$0xff] }
 0x19a   : > { %651 = vst.msk [vmem:[#allocation2 + $0x1a8] sm:$0xff] %vm553_vm3, %v523_v22  ;;  %654 = vst.msk [vmem:[#allocation2 + $0x1d0] sm:$0xff] %vm553_vm3, %v534_v40  ;;  %v542_v21 = vadd.f32 %v4099_v23, %v541_v33  ;;  %v2141_v10 = vmul.f32 1.442695, %v2092_v44  ;;  %v1132_v46 = vadd.f32 %v1100_v7, %v1028_v32  ;;  %v5351_v27 = vadd.f32 %v894_v41, %v822_v48  ;;  %v1282_v48 = vld [vmem:[#allocation2 + $0x22f] sm:$0xff] }
 0x19b   : > { %652 = vst.msk [vmem:[#allocation2 + $0x1b0] sm:$0xff] %vm553_vm3, %v526_v60  ;;  %657 = vst.msk [vmem:[#allocation2 + $0x208] sm:$0xff] %vm553_vm3, %v547_v12  ;;  %v5353_v13 = vadd.f32 %v895_v42, %v823_v16  ;;  %v1205_v29 = vmul.f32 %v6691_v59, %v6690_v61  ;;  %4026 = vpow2.f32 %v2135_v20  ;;  %v1204_v7 = vmul.f32 %v6691_v59, %v5198_v31 }
 0x19c   : > { %655 = vst.msk [vmem:[#allocation2 + $0x1e8] sm:$0xff] %vm553_vm3, %v539_v47  ;;  %658 = vst.msk [vmem:[#allocation2 + $0x210] sm:$0xff] %vm553_vm3, %v550_v45  ;;  %4028 = vpow2.f32 %v2137_v52  ;;  %v5361_v4 = vmul.f32 0.5, %v5258_v17  ;;  %v5364_v35 = vmul.f32 0.5, %v5262_v36  ;;  %v5369_v30 = vmul.f32 0.5, %v5260_v62  ;;  %v1490_v17 = vld [vmem:[#allocation2 + $0x231] sm:$0xff] }
 0x19d   : > { %656 = vst.msk [vmem:[#allocation2 + $0x1f0] sm:$0xff] %vm553_vm3, %v542_v21  ;;  %4030 = vpow2.f32 %v2139_v5  ;;  %v5372_v26 = vmul.f32 0.5, %v5264_v57  ;;  %v5374_v31 = vadd.f32 %v1205_v29, %v1133_v19  ;;  %v1236_v23 = vadd.f32 %v1204_v7, %v1132_v46 }
 0x19e   : > { %v5366_v37 = vpop.eup %4018  ;;  %4032 = vpow2.f32 %v2141_v10  ;;  %v683_v41 = vld [vmem:[#allocation2 + $0x187] sm:$0xff]  ;;  %v5380_v55 = vmul.f32 %v6692_v38, %v1281_v18  ;;  %v5386_v51 = vmul.f32 %v6692_v38, %v1282_v48  ;;  %v5389_v3 = vmul.f32 %v5025_v58, %v1385_v28 }
 0x19f   : > { %v5376_v16 = vpop.eup %4020  ;;  %v1769_v36 = vmul.f32 1.0614054, %v5366_v37  ;;  %v754_v49 = vld [vmem:[#allocation2 + $0x188] sm:$0xff]  ;;  %v5392_v14 = vmul.f32 %v5025_v58, %v1386_v54  ;;  %v5398_v50 = vmul.f32 %v5034_v9, %v1489_v1  ;;  %v5401_v43 = vmul.f32 %v5034_v9, %v1490_v17  ;;  %v5426_v28 = vld [vmem:[#allocation2 + $0x190] sm:$0xff] }
 0x1a0   : > { %6693 = vst [vmem:[#allocation6_spill] sm:$0xff] %v5380_v55  ;;  %v5382_v62 = vpop.eup %4022  ;;  %v1770_v57 = vmul.f32 1.0614054, %v5376_v16  ;;  %v681_v25 = vld [vmem:[#allocation2 + $0x167] sm:$0xff]  ;;  %6694 = vst [vmem:[#allocation3_spill] sm:$0xff] %v5386_v51  ;;  %v722_v33 = vmul.f32 %v4900_v63, %v683_v41  ;;  %v794_v20 = vmul.f32 %v4910_v11, %v754_v49  ;;  %v5408_v40 = vmul.f32 %v4969_v39, %v683_v41  ;;  %v684_v48 = vld [vmem:[#allocation2 + $0x18f] sm:$0xff] }
 0x1a1   : > { %6695 = vst [vmem:[#allocation7_spill] sm:$0xff] %v5389_v3  ;;  %6696 = vst [vmem:[#allocation9_spill] sm:$0xff] %v5392_v14  ;;  %v5394_v24 = vpop.eup %4024  ;;  %v1771_v32 = vmul.f32 1.0614054, %v5382_v62  ;;  %v3755_v44 = vadd.f32 -1.4531521, %v1769_v36  ;;  %v998_v12 = vmul.f32 %v4969_v39, %v681_v25  ;;  %v5413_v61 = vmul.f32 %v4983_v6, %v754_v49 }
 0x1a2   : > { %6697 = vst [vmem:[#allocation8_spill] sm:$0xff] %v5398_v50  ;;  %6698 = vst [vmem:[#allocation5_spill] sm:$0xff] %v5401_v43  ;;  %v1772_v56 = vmul.f32 1.0614054, %v5394_v24  ;;  %v3756_v15 = vadd.f32 -1.4531521, %v1770_v57  ;;  %v5416_v42 = vmul.f32 %v6692_v38, %v683_v41  ;;  %v5420_v21 = vmul.f32 %v5025_v58, %v754_v49 }
 0x1a3   : > { %v3757_v52 = vadd.f32 -1.4531521, %v1771_v32  ;;  %v1833_v22 = vmul.f32 %v5366_v37, %v3755_v44  ;;  %v752_v60 = vld [vmem:[#allocation2 + $0x168] sm:$0xff]  ;;  %6699 = vst [vmem:[#allocation4_spill] sm:$0xff] %v5413_v61  ;;  %v1309_v10 = vmul.f32 %v6692_v38, %v681_v25  ;;  %v720_v18 = vmul.f32 %v4900_v63, %v681_v25 }
 0x1a4   : > { %v3758_v47 = vadd.f32 -1.4531521, %v1772_v56  ;;  %v1834_v45 = vmul.f32 %v5376_v16, %v3756_v15  ;;  %v792_v7 = vmul.f32 %v4910_v11, %v752_v60  ;;  %v1030_v17 = vadd.f32 %v998_v12, %v5351_v27  ;;  %v5439_v27 = vld [vmem:[#allocation2 + $0x191] sm:$0xff] }
 0x1a5   : > { %v1835_v19 = vmul.f32 %v5382_v62, %v3757_v52  ;;  %v1865_v5 = vadd.f32 1.4214138, %v1833_v22  ;;  %v1341_v36 = vadd.f32 %v1309_v10, %v1236_v23  ;;  %v1102_v57 = vmul.f32 %v4983_v6, %v752_v60  ;;  %v5437_v22 = vld [vmem:[#allocation2 + $0x189] sm:$0xff] }
 0x1a6   : > { %v1836_v46 = vmul.f32 %v5394_v24, %v3758_v47  ;;  %v1866_v29 = vadd.f32 1.4214138, %v1834_v45  ;;  %v1413_v32 = vmul.f32 %v5025_v58, %v752_v60  ;;  %v723_v15 = vmul.f32 %v4900_v63, %v684_v48 }
 0x1a7   : > { %v1867_v54 = vadd.f32 1.4214138, %v1835_v19  ;;  %v1897_v1 = vmul.f32 %v5366_v37, %v1865_v5  ;;  %v795_v52 = vmul.f32 %v4910_v11, %v5426_v28  ;;  %v5442_v45 = vadd.f32 %v794_v20, %v722_v33  ;;  %v682_v20 = vld [vmem:[#allocation2 + $0x16f] sm:$0xff] }
 0x1a8   : > { %v1868_v41 = vadd.f32 1.4214138, %v1836_v46  ;;  %v1898_v49 = vmul.f32 %v5376_v16, %v1866_v29  ;;  %v4027_v44 = vpop.eup %4026  ;;  %v824_v60 = vadd.f32 %v792_v7, %v720_v18  ;;  %v1134_v46 = vadd.f32 %v1102_v57, %v1030_v17  ;;  %v5456_v18 = vld [vmem:[#allocation2 + $0x170] sm:$0xff] }
 0x1a9   : > { %v1899_v25 = vmul.f32 %v5382_v62, %v1867_v54  ;;  %v3787_v56 = vadd.f32 -0.28449672, %v1897_v1  ;;  %v4029_v23 = vpop.eup %4028  ;;  %v5445_v63 = vadd.f32 %v1413_v32, %v1341_v36  ;;  %v5450_v1 = vmul.f32 %v4991_v0, %v5437_v22 }
 0x1aa   : > { %v1900_v12 = vmul.f32 %v5394_v24, %v1868_v41  ;;  %v3788_v47 = vadd.f32 -0.28449672, %v1898_v49  ;;  %v4031_v19 = vpop.eup %4030  ;;  %v5454_v33 = vmul.f32 %v4991_v0, %v5439_v27  ;;  %v5459_v36 = vadd.f32 %v795_v52, %v723_v15  ;;  %v5478_v52 = vld [vmem:[%s6641_s3] ss:$0 sm:$0xff] }
 0x1ab   : > { %v3789_v5 = vadd.f32 -0.28449672, %v1899_v25  ;;  %v1961_v10 = vmul.f32 %v5366_v37, %v3787_v56  ;;  %v4033_v29 = vpop.eup %4032  ;;  %v5462_v41 = vmul.f32 %v4969_v39, %v684_v48  ;;  %vm2249_vm2 = vcmp.ge.f32.partialorder %v5271_v8, 0.0  ;;  %v5471_v56 = vld [vmem:[#allocation2 + $0x169] sm:$0xff]  ;;  %6700 = vst [vmem:[#allocation10_spill] sm:$0xff] %v5478_v52 }
 0x1ac   : > { %v3790_v11 = vadd.f32 -0.28449672, %v1900_v12  ;;  %v1962_v54 = vmul.f32 %v5376_v16, %v3788_v47  ;;  %v1312_v32 = vmul.f32 %v6692_v38, %v684_v48  ;;  %v5469_v25 = vmul.f32 %v5025_v58, %v5426_v28  ;;  %v5484_v48 = vld [vmem:[%s6641_s3 + $0x1] ss:$0 sm:$0xff] }
 0x1ad   : > { %v1963_v7 = vmul.f32 %v5382_v62, %v3789_v5  ;;  %v1993_v17 = vadd.f32 0.2548296, %v1961_v10  ;;  %vm2250_vm4 = vcmp.ge.f32.partialorder %v5279_v34, 0.0  ;;  %v721_v47 = vmul.f32 %v5478_v52, %v682_v20  ;;  %6701 = vst [vmem:[#allocation11_spill] sm:$0xff] %v5484_v48 }
 0x1ae   : > { %v1964_v49 = vmul.f32 %v5394_v24, %v3790_v11  ;;  %v1994_v57 = vadd.f32 0.2548296, %v1962_v54  ;;  %v793_v5 = vmul.f32 %v5484_v48, %v5456_v18  ;;  %vm2251_vm5 = vcmp.ge.f32.partialorder %v5274_v53, 0.0  ;;  %v857_v54 = vld [vmem:[#allocation2 + $0x171] sm:$0xff] }
 0x1af   : > { %v1995_v12 = vadd.f32 0.2548296, %v1963_v7  ;;  %v2025_v15 = vmul.f32 %v5366_v37, %v1993_v17  ;;  %v1519_v11 = vmul.f32 %v5034_v9, %v5437_v22  ;;  %v999_v7 = vmul.f32 %v4969_v39, %v682_v20 }
 0x1b0   : > { %v1996_v10 = vadd.f32 0.2548296, %v1964_v49  ;;  %v2026_v37 = vmul.f32 %v5376_v16, %v1994_v57  ;;  %vm2252_vm6 = vcmp.ge.f32.partialorder %v5284_v2, 0.0  ;;  %v1520_v50 = vmul.f32 %v5034_v9, %v5439_v27 }
 0x1b1   : > { %v2027_v17 = vmul.f32 %v5382_v62, %v1995_v12  ;;  %v2185_v43 = vmul.f32 %v4027_v44, %v2025_v15  ;;  %v896_v49 = vmul.f32 %v4991_v0, %v5471_v56  ;;  %v1031_v14 = vadd.f32 %v999_v7, %v5353_v13 }
 0x1b2   : > { %v2028_v16 = vmul.f32 %v5394_v24, %v1996_v10  ;;  %v2186_v57 = vmul.f32 %v4029_v23, %v2026_v37  ;;  %v1103_v3 = vmul.f32 %v4983_v6, %v5456_v18  ;;  %v825_v62 = vadd.f32 %v793_v5, %v721_v47 }
 0x1b3   : > { %v2187_v39 = vmul.f32 %v4031_v19, %v2027_v17  ;;  %v2217_v51 = vsub.f32 1.0, %v2185_v43  ;;  %v897_v44 = vmul.f32 %v4991_v0, %v857_v54  ;;  %v1206_v61 = vmul.f32 %v6691_v59, %v5471_v56  ;;  %v3960_v0 = vld [vmem:[%s6643_s5 + $0x8] sm:$0xff]  }
 0x1b4   : > { %v2188_v12 = vmul.f32 %v4033_v29, %v2028_v16  ;;  %v2218_v15 = vsub.f32 1.0, %v2186_v57  ;;  %v1135_v55 = vadd.f32 %v1103_v3, %v1031_v14  ;;  %v928_v24 = vadd.f32 %v896_v49, %v824_v60  ;;  %3914 = vmatprep.subr.bf16.mxu1 %v3960_v0  ;;  %v6702_v16 = vld [vmem:[#allocation10_spill] sm:$0xff] }
 0x1b5   : > { %v2219_v48 = vsub.f32 1.0, %v2187_v39  ;;  %v2281_v52 = vsub.f32 0.0, %v2217_v51  ;;  %v1207_v23 = vmul.f32 %v6691_v59, %v857_v54  ;;  %v1238_v37 = vadd.f32 %v1206_v61, %v1134_v46  ;;  %3915 = vmatpush3.bf16.msra.mxu1 %v3960_v0 }
 0x1b6   : > { %v2220_v13 = vsub.f32 1.0, %v2188_v12  ;;  %v2282_v10 = vsub.f32 0.0, %v2218_v15  ;;  %v1310_v6 = vmul.f32 %v6692_v38, %v682_v20  ;;  %v929_v14 = vadd.f32 %v897_v44, %v825_v62 }
 0x1b7   : > { %v2283_v43 = vsub.f32 0.0, %v2219_v48  ;;  %v2313_v3 = vsel %vm2249_vm2, %v2217_v51, %v2281_v52  ;;  %v1239_v19 = vadd.f32 %v1207_v23, %v1135_v55  ;;  %v1343_v46 = vadd.f32 %v5416_v42, %v1238_v37 }
 0x1b8   : > { %v2284_v29 = vsub.f32 0.0, %v2220_v13  ;;  %v2314_v60 = vsel %vm2250_vm4, %v2218_v15, %v2282_v10  ;;  %v2377_v59 = vadd.f32 1.0, %v2313_v3  ;;  %v1342_v47 = vadd.f32 %v1310_v6, %v5374_v31  ;;  %v3961_v31 = vld [vmem:[%s6643_s5] sm:$0xff]  }
 0x1b9   : > { %v2315_v38 = vsel %vm2251_vm5, %v2219_v48, %v2283_v43  ;;  %v2378_v61 = vadd.f32 1.0, %v2314_v60  ;;  %v1344_v20 = vadd.f32 %v1312_v32, %v1239_v19  ;;  %v1414_v34 = vmul.f32 %v5025_v58, %v5456_v18  ;;  %3916 = vmatprep.subr.bf16.mxu1 %v3961_v31 }
 0x1ba   : > { %v2316_v8 = vsel %vm2252_vm6, %v2220_v13, %v2284_v29  ;;  %v2379_v55 = vadd.f32 1.0, %v2315_v38  ;;  %v2409_v51 = vmul.f32 %v2377_v59, %v5361_v4  ;;  %v1447_v42 = vadd.f32 %v5420_v21, %v1343_v46  ;;  %3917 = vmatpush3.bf16.msra.mxu1 %v3961_v31 }
 0x1bb   : > { %v2380_v53 = vadd.f32 1.0, %v2316_v8  ;;  %v2410_v52 = vmul.f32 %v2378_v61, %v5364_v35  ;;  %v1448_v32 = vadd.f32 %v5469_v25, %v1344_v20  ;;  %v1446_v48 = vadd.f32 %v1414_v34, %v1342_v47  ;;  %v685_v20 = vld [vmem:[#allocation2 + $0x1a7] sm:$0xff] }
 0x1bc   : > { %v2411_v2 = vmul.f32 %v2379_v55, %v5369_v30  ;;  %2441 = vst.msk [vmem:[#allocation2 + $0x108] sm:$0xff] %vm553_vm3, %v2409_v51  ;;  %v1517_v4 = vmul.f32 %v5034_v9, %v5471_v56  ;;  %v1518_v58 = vmul.f32 %v5034_v9, %v857_v54  ;;  %v1033_v35 = vadd.f32 %v5462_v41, %v929_v14  ;;  %v5546_v9 = vld [vmem:[%s6641_s3 + $0x4] ss:$0 sm:$0xff]  ;;  %v687_v56 = vld [vmem:[#allocation2 + $0x1c7] sm:$0xff] }
 0x1bd   : > { %v2412_v18 = vmul.f32 %v2380_v53, %v5372_v26  ;;  %2442 = vst.msk [vmem:[#allocation2 + $0x110] sm:$0xff] %vm553_vm3, %v2410_v52  ;;  %v1551_v21 = vadd.f32 %v1519_v11, %v1447_v42  ;;  %v1552_v5 = vadd.f32 %v1520_v50, %v1448_v32  ;;  %v5541_v30 = vadd.f32 %v5450_v1, %v5442_v45  ;;  %v5559_v45 = vld [vmem:[%s6641_s3 + $0x5] ss:$0 sm:$0xff]  ;;  %v5569_v11 = vld [vmem:[#allocation2 + $0x1c8] sm:$0xff] }
 0x1be   : > { %2443 = vst.msk [vmem:[#allocation2 + $0x128] sm:$0xff] %vm553_vm3, %v2411_v2  ;;  %v1105_v26 = vmul.f32 %v5546_v9, %v5426_v28  ;;  %v1549_v25 = vadd.f32 %v1517_v4, %v5445_v63  ;;  %v1550_v41 = vadd.f32 %v1518_v58, %v1446_v48  ;;  %v5554_v50 = vadd.f32 %v5454_v33, %v5459_v36  ;;  %v756_v8 = vld [vmem:[#allocation2 + $0x1a8] sm:$0xff]  ;;  %v759_v4 = vld [vmem:[#allocation2 + $0x1d0] sm:$0xff] }
 0x1bf   : > { %2444 = vst.msk [vmem:[#allocation2 + $0x130] sm:$0xff] %vm553_vm3, %v2412_v18  ;;  %v5563_v1 = vmul.f32 %v5559_v45, %v5437_v22  ;;  %v5565_v28 = vmul.f32 0.70710677, %v1551_v21  ;;  %v5567_v63 = vmul.f32 0.70710677, %v1552_v5  ;;  %v5573_v54 = vmul.f32 %v5559_v45, %v5439_v27  ;;  %v6703_v27 = vld [vmem:[#allocation11_spill] sm:$0xff] }
 0x1c0   : > { %v1032_v33 = vadd.f32 %v5408_v40, %v928_v24  ;;  %v5576_v36 = vmul.f32 0.70710677, %v1549_v25  ;;  %v5578_v7 = vmul.f32 0.70710677, %v1550_v41  ;;  %v5580_v17 = vadd.f32 %v1105_v26, %v1033_v35  ;;  %v5592_v40 = vld [vmem:[%s6641_s3 + $0x3] ss:$0 sm:$0xff] }
 0x1c1   : > { %v1615_v22 = vand.u32 2147483647, %v5565_v28  ;;  %v1616_v49 = vand.u32 2147483647, %v5567_v63  ;;  %v726_v57 = vmul.f32 %v6702_v16, %v687_v56  ;;  %v798_v44 = vmul.f32 %v6703_v27, %v5569_v11  ;;  %v688_v42 = vld [vmem:[#allocation2 + $0x1cf] sm:$0xff] }
 0x1c2   : > { %v1613_v39 = vand.u32 2147483647, %v5576_v36  ;;  %v1614_v62 = vand.u32 2147483647, %v5578_v7  ;;  %v5595_v12 = vmul.f32 %v5592_v40, %v687_v56  ;;  %v5597_v38 = vmul.f32 0.5, %v1549_v25  ;;  %v862_v58 = vld [vmem:[#allocation2 + $0x1c9] sm:$0xff] }
 0x1c3   : > { %v1647_v15 = vmul.f32 0.3275911, %v1615_v22  ;;  %v1648_v24 = vmul.f32 0.3275911, %v1616_v49  ;;  %v2063_v23 = vsub.f32 0.0, %v1615_v22  ;;  %v2064_v13 = vsub.f32 0.0, %v1616_v49 }
 0x1c4   : > { %v1645_v10 = vmul.f32 0.3275911, %v1613_v39  ;;  %v1646_v37 = vmul.f32 0.3275911, %v1614_v62  ;;  %v2061_v6 = vsub.f32 0.0, %v1613_v39  ;;  %v2062_v0 = vsub.f32 0.0, %v1614_v62 }
 0x1c5   : > { %v1679_v43 = vadd.f32 1.0, %v1647_v15  ;;  %v1680_v3 = vadd.f32 1.0, %v1648_v24  ;;  %v2095_v14 = vmul.f32 %v2063_v23, %v1615_v22  ;;  %v2096_v19 = vmul.f32 %v2064_v13, %v1616_v49  ;;  %v5615_v35 = vld [vmem:[%s6641_s3 + $0x6] ss:$0 sm:$0xff]  ;;  %v6704_v26 = vld [vmem:[#allocation4_spill] sm:$0xff] }
 0x1c6   : > { %v1677_v29 = vadd.f32 1.0, %v1645_v10  ;;  %v1678_v60 = vadd.f32 1.0, %v1646_v37  ;;  %v2093_v59 = vmul.f32 %v2061_v6, %v1613_v39  ;;  %v2094_v47 = vmul.f32 %v2062_v0, %v1614_v62  ;;  %v686_v10 = vld [vmem:[#allocation2 + $0x1af] sm:$0xff] }
 0x1c7   : > { %4034 = vrcp.f32 %v1679_v43  ;;  %v5599_v61 = vmul.f32 0.5, %v1551_v21  ;;  %v5601_v46 = vmul.f32 0.5, %v1552_v5  ;;  %v2147_v51 = vmul.f32 1.442695, %v2095_v14  ;;  %v757_v37 = vld [vmem:[#allocation2 + $0x1b0] sm:$0xff] }
 0x1c8   : > { %4036 = vrcp.f32 %v1677_v29  ;;  %v2143_v55 = vmul.f32 1.442695, %v2093_v59  ;;  %v5603_v34 = vmul.f32 0.5, %v1550_v41  ;;  %v2145_v31 = vmul.f32 1.442695, %v2094_v47  ;;  %v861_v59 = vld [vmem:[#allocation2 + $0x1b1] sm:$0xff] }
 0x1c9   : > { %4038 = vrcp.f32 %v1678_v60  ;;  %v2149_v53 = vmul.f32 1.442695, %v2096_v19  ;;  %v830_v52 = vadd.f32 %v798_v44, %v726_v57  ;;  %v724_v32 = vmul.f32 %v6702_v16, %v685_v20  ;;  %v863_v57 = vld [vmem:[#allocation2 + $0x1d1] sm:$0xff] }
 0x1ca   : > { %4040 = vrcp.f32 %v1680_v3  ;;  %v796_v2 = vmul.f32 %v6703_v27, %v756_v8  ;;  %v1002_v48 = vmul.f32 %v5592_v40, %v685_v20  ;;  %v5610_v18 = vmul.f32 %v5546_v9, %v5569_v11  ;;  %v860_v3 = vld [vmem:[#allocation2 + $0x1a9] sm:$0xff] }
 0x1cb   : > { %v1315_v21 = vmul.f32 %v5615_v35, %v687_v56  ;;  %v1106_v5 = vmul.f32 %v5546_v9, %v756_v8  ;;  %v1136_v25 = vadd.f32 %v6704_v26, %v1032_v33  ;;  %4042 = vpow2.f32 %v2143_v55  ;;  %v5628_v56 = vld [vmem:[%s6641_s3 + $0x2] ss:$0 sm:$0xff] }
 0x1cc   : > { %v1034_v41 = vadd.f32 %v1002_v48, %v5541_v30  ;;  %v1313_v22 = vmul.f32 %v5615_v35, %v685_v20  ;;  %v727_v49 = vmul.f32 %v6702_v16, %v688_v42  ;;  %4044 = vpow2.f32 %v2145_v31  ;;  %6705 = vst [vmem:[#allocation10_spill] sm:$0xff] %v5628_v56  ;;  %v5634_v30 = vld [vmem:[%s6641_s3 + $0x7] ss:$0 sm:$0xff]  ;;  %v5663_v20 = vld [vmem:[%s6641_s3 + $0x8] ss:$0 sm:$0xff] }
 0x1cd   : > { %v1240_v39 = vadd.f32 %v5563_v1, %v1136_v25  ;;  %v799_v62 = vmul.f32 %v6703_v27, %v759_v4  ;;  %v902_v33 = vmul.f32 %v5628_v56, %v862_v58  ;;  %4046 = vpow2.f32 %v2147_v51 }
 0x1ce   : > { %v1419_v44 = vmul.f32 %v5634_v30, %v5569_v11  ;;  %v828_v15 = vadd.f32 %v796_v2, %v724_v32  ;;  %v1417_v1 = vmul.f32 %v5634_v30, %v756_v8  ;;  %4048 = vpow2.f32 %v2149_v53 }
 0x1cf   : > { %v1138_v24 = vadd.f32 %v1106_v5, %v1034_v41  ;;  %v1345_v23 = vadd.f32 %v1313_v22, %v1240_v39  ;;  %v5640_v13 = vmul.f32 %v5628_v56, %v863_v57  ;;  %v5642_v6 = vadd.f32 %v799_v62, %v727_v49 }
 0x1d0   : > { %v5644_v0 = vadd.f32 %v902_v33, %v830_v52  ;;  %v5647_v43 = vmul.f32 %v5592_v40, %v688_v42  ;;  %v5650_v11 = vmul.f32 %v5546_v9, %v759_v4  ;;  %v5653_v14 = vmul.f32 %v5559_v45, %v862_v58 }
 0x1d1   : > { %v5656_v19 = vmul.f32 %v5559_v45, %v863_v57  ;;  %v1316_v29 = vmul.f32 %v5615_v35, %v688_v42  ;;  %v1420_v60 = vmul.f32 %v5634_v30, %v759_v4  ;;  %v1449_v47 = vadd.f32 %v1417_v1, %v1345_v23 }
 0x1d2   : > { %v1523_v8 = vmul.f32 %v5663_v20, %v862_v58  ;;  %v725_v55 = vmul.f32 %v6702_v16, %v686_v10  ;;  %v797_v51 = vmul.f32 %v6703_v27, %v757_v37  ;;  %v1524_v31 = vmul.f32 %v5663_v20, %v863_v57 }
 0x1d3   : > { %6706 = vst [vmem:[#allocation11_spill] sm:$0xff] %v5656_v19  ;;  %v900_v53 = vmul.f32 %v5628_v56, %v860_v3  ;;  %v1003_v52 = vmul.f32 %v5592_v40, %v686_v10  ;;  %v1210_v42 = vmul.f32 %v5559_v45, %v860_v3  ;;  %v901_v2 = vmul.f32 %v5628_v56, %v861_v59 }
 0x1d4   : > { %v5672_v32 = vpop.eup %4034  ;;  %v1107_v48 = vmul.f32 %v5546_v9, %v757_v37  ;;  %v1241_v4 = vadd.f32 %v5573_v54, %v5580_v17  ;;  %v1314_v58 = vmul.f32 %v5615_v35, %v686_v10  ;;  %v1211_v41 = vmul.f32 %v5559_v45, %v861_v59 }
 0x1d5   : > { %v5679_v5 = vpop.eup %4036  ;;  %v1775_v26 = vmul.f32 1.0614054, %v5672_v32  ;;  %v1035_v25 = vadd.f32 %v1003_v52, %v5554_v50  ;;  %v1242_v22 = vadd.f32 %v1210_v42, %v1138_v24  ;;  %v829_v39 = vadd.f32 %v797_v51, %v725_v55 }
 0x1d6   : > { %v5684_v49 = vpop.eup %4038  ;;  %v1773_v57 = vmul.f32 1.0614054, %v5679_v5  ;;  %v1346_v62 = vadd.f32 %v1314_v58, %v1241_v4  ;;  %v1418_v33 = vmul.f32 %v5634_v30, %v757_v37  ;;  %v5692_v19 = vadd.f32 %v900_v53, %v828_v15 }
 0x1d7   : > { %v5688_v54 = vpop.eup %4040  ;;  %v1774_v17 = vmul.f32 1.0614054, %v5684_v49  ;;  %v3761_v1 = vadd.f32 -1.4531521, %v1775_v26  ;;  %v1139_v23 = vadd.f32 %v1107_v48, %v1035_v25  ;;  %v1347_v10 = vadd.f32 %v1315_v21, %v1242_v22 }
 0x1d8   : > { %v1776_v50 = vmul.f32 1.0614054, %v5688_v54  ;;  %v3759_v52 = vadd.f32 -1.4531521, %v1773_v57  ;;  %v1450_v24 = vadd.f32 %v1418_v33, %v1346_v62  ;;  %v5694_v42 = vpop.eup %4042  ;;  %v5700_v48 = vadd.f32 %v901_v2, %v829_v39 }
 0x1d9   : > { %v3760_v56 = vadd.f32 -1.4531521, %v1774_v17  ;;  %v1839_v55 = vmul.f32 %v5672_v32, %v3761_v1  ;;  %v1243_v51 = vadd.f32 %v1211_v41, %v1139_v23  ;;  %v1451_v37 = vadd.f32 %v1419_v44, %v1347_v10  ;;  %v5697_v4 = vpop.eup %4044 }
 0x1da   : > { %v3762_v58 = vadd.f32 -1.4531521, %v1776_v50  ;;  %v1837_v26 = vmul.f32 %v5679_v5, %v3759_v52  ;;  %v1521_v21 = vmul.f32 %v5663_v20, %v860_v3  ;;  %v4047_v25 = vpop.eup %4046  ;;  %v1522_v57 = vmul.f32 %v5663_v20, %v861_v59 }
 0x1db   : > { %v1838_v15 = vmul.f32 %v5684_v49, %v3760_v56  ;;  %v1871_v53 = vadd.f32 1.4214138, %v1839_v55  ;;  %v1348_v22 = vadd.f32 %v1316_v29, %v1243_v51  ;;  %v4049_v62 = vpop.eup %4048  ;;  %v5708_v17 = vadd.f32 %v1523_v8, %v1451_v37 }
 0x1dc   : > { %v1840_v41 = vmul.f32 %v5688_v54, %v3762_v58  ;;  %v1869_v44 = vadd.f32 1.4214138, %v1837_v26  ;;  %v5706_v33 = vadd.f32 %v1521_v21, %v1449_v47  ;;  %v5711_v3 = vadd.f32 %v1522_v57, %v1450_v24 }
 0x1dd   : > { %v1870_v1 = vadd.f32 1.4214138, %v1838_v15  ;;  %v1903_v2 = vmul.f32 %v5672_v32, %v1871_v53  ;;  %v1452_v39 = vadd.f32 %v1420_v60, %v1348_v22  ;;  %v5718_v59 = vmul.f32 0.70710677, %v5708_v17 }
 0x1de   : > { %v1872_v23 = vadd.f32 1.4214138, %v1840_v41  ;;  %v1901_v56 = vmul.f32 %v5679_v5, %v1869_v44  ;;  %v5715_v29 = vmul.f32 0.70710677, %v5706_v33  ;;  %v5724_v50 = vmul.f32 0.70710677, %v5711_v3 }
 0x1df   : > { %v1902_v47 = vmul.f32 %v5684_v49, %v1870_v1  ;;  %v3793_v10 = vadd.f32 -0.28449672, %v1903_v2  ;;  %v5721_v8 = vadd.f32 %v1524_v31, %v1452_v39  ;;  %v1619_v55 = vand.u32 2147483647, %v5718_v59 }
 0x1e0   : > { %v1904_v60 = vmul.f32 %v5688_v54, %v1872_v23  ;;  %v3791_v52 = vadd.f32 -0.28449672, %v1901_v56  ;;  %v1617_v24 = vand.u32 2147483647, %v5715_v29  ;;  %v1618_v26 = vand.u32 2147483647, %v5724_v50 }
 0x1e1   : > { %v3792_v51 = vadd.f32 -0.28449672, %v1902_v47  ;;  %v1967_v37 = vmul.f32 %v5672_v32, %v3793_v10  ;;  %v5731_v58 = vmul.f32 0.70710677, %v5721_v8  ;;  %v1651_v53 = vmul.f32 0.3275911, %v1619_v55 }
 0x1e2   : > { %v3794_v31 = vadd.f32 -0.28449672, %v1904_v60  ;;  %v1965_v21 = vmul.f32 %v5679_v5, %v3791_v52  ;;  %v1649_v15 = vmul.f32 0.3275911, %v1617_v24  ;;  %v1650_v44 = vmul.f32 0.3275911, %v1618_v26 }
 0x1e3   : > { %6707 = vst [vmem:[#allocation4_spill] sm:$0xff] %v5731_v58  ;;  %v1966_v22 = vmul.f32 %v5684_v49, %v3792_v51  ;;  %v1999_v57 = vadd.f32 0.2548296, %v1967_v37  ;;  %v1620_v41 = vand.u32 2147483647, %v5731_v58  ;;  %vm2255_vm7 = vcmp.ge.f32.partialorder %v5565_v28, 0.0 }
 0x1e4   : > { %v1968_v1 = vmul.f32 %v5688_v54, %v3794_v31  ;;  %v1997_v2 = vadd.f32 0.2548296, %v1965_v21  ;;  %v1681_v39 = vadd.f32 1.0, %v1649_v15  ;;  %v1683_v23 = vadd.f32 1.0, %v1651_v53 }
 0x1e5   : > { %v1998_v56 = vadd.f32 0.2548296, %v1966_v22  ;;  %v2031_v47 = vmul.f32 %v5672_v32, %v1999_v57  ;;  %vm2253_vm8 = vcmp.ge.f32.partialorder %v5576_v36, 0.0  ;;  %v1652_v10 = vmul.f32 0.3275911, %v1620_v41 }
 0x1e6   : > { %v1682_v60 = vadd.f32 1.0, %v1650_v44  ;;  %v2000_v52 = vadd.f32 0.2548296, %v1968_v1  ;;  %v2029_v51 = vmul.f32 %v5679_v5, %v1997_v2  ;;  %vm2254_vm9 = vcmp.ge.f32.partialorder %v5578_v7, 0.0  ;;  %v968_v7 = vld [vmem:[#allocation2 + $0x207] sm:$0xff] }
 0x1e7   : > { %4050 = vrcp.f32 %v1681_v39  ;;  %v2065_v37 = vsub.f32 0.0, %v1617_v24  ;;  %v2030_v31 = vmul.f32 %v5684_v49, %v1998_v56  ;;  %v2191_v21 = vmul.f32 %v4047_v25, %v2031_v47 }
 0x1e8   : > { %vm2256_vm10 = vcmp.ge.f32.partialorder %v5567_v63, 0.0  ;;  %v1684_v15 = vadd.f32 1.0, %v1652_v10  ;;  %4052 = vrcp.f32 %v1682_v60  ;;  %v2032_v32 = vmul.f32 %v5688_v54, %v2000_v52 }
 0x1e9   : > { %v2189_v53 = vmul.f32 %v5694_v42, %v2029_v51  ;;  %4054 = vrcp.f32 %v1683_v23  ;;  %v2066_v22 = vsub.f32 0.0, %v1618_v26  ;;  %v2190_v57 = vmul.f32 %v5697_v4, %v2030_v31 }
 0x1ea   : > { %v2223_v5 = vsub.f32 1.0, %v2191_v21  ;;  %4056 = vrcp.f32 %v1684_v15  ;;  %v2067_v44 = vsub.f32 0.0, %v1619_v55  ;;  %v2192_v1 = vmul.f32 %v4049_v62, %v2032_v32 }
 0x1eb   : > { %v2221_v2 = vsub.f32 1.0, %v2189_v53  ;;  %v2068_v39 = vsub.f32 0.0, %v1620_v41  ;;  %v2097_v49 = vmul.f32 %v2065_v37, %v1617_v24  ;;  %v2222_v25 = vsub.f32 1.0, %v2190_v57  ;;  %v689_v53 = vld [vmem:[#allocation2 + $0x1e7] sm:$0xff] }
 0x1ec   : > { %v2287_v56 = vsub.f32 0.0, %v2223_v5  ;;  %v2098_v47 = vmul.f32 %v2066_v22, %v1618_v26  ;;  %v2099_v10 = vmul.f32 %v2067_v44, %v1619_v55  ;;  %v2224_v60 = vsub.f32 1.0, %v2192_v1 }
 0x1ed   : > { %v2285_v58 = vsub.f32 0.0, %v2221_v2  ;;  %v2100_v54 = vmul.f32 %v2068_v39, %v1620_v41  ;;  %v2151_v52 = vmul.f32 1.442695, %v2097_v49  ;;  %v2286_v42 = vsub.f32 0.0, %v2222_v25 }
 0x1ee   : > { %v2319_v23 = vsel %vm2255_vm7, %v2223_v5, %v2287_v56  ;;  %v2153_v4 = vmul.f32 1.442695, %v2098_v47  ;;  %v2155_v51 = vmul.f32 1.442695, %v2099_v10  ;;  %v2288_v31 = vsub.f32 0.0, %v2224_v60 }
 0x1ef   : > { %v2317_v62 = vsel %vm2253_vm8, %v2221_v2, %v2285_v58  ;;  %v2383_v21 = vadd.f32 1.0, %v2319_v23  ;;  %v1037_v24 = vadd.f32 %v5647_v43, %v5700_v48  ;;  %v2318_v55 = vsel %vm2254_vm9, %v2222_v25, %v2286_v42  ;;  %v1072_v43 = vld [vmem:[#allocation2 + $0x208] sm:$0xff] }
 0x1f0   : > { %v2381_v26 = vadd.f32 1.0, %v2317_v62  ;;  %4058 = vpow2.f32 %v2151_v52  ;;  %v2157_v41 = vmul.f32 1.442695, %v2100_v54  ;;  %v2320_v28 = vsel %vm2256_vm10, %v2224_v60, %v2288_v31 }
 0x1f1   : > { %v2382_v37 = vadd.f32 1.0, %v2318_v55  ;;  %v2415_v15 = vmul.f32 %v2383_v21, %v5599_v61  ;;  %4060 = vpow2.f32 %v2153_v4  ;;  %v2384_v32 = vadd.f32 1.0, %v2320_v28  ;;  %v969_v4 = vld [vmem:[#allocation2 + $0x20f] sm:$0xff] }
 0x1f2   : > { %v2413_v36 = vmul.f32 %v2381_v26, %v5597_v38  ;;  %v5762_v58 = vadd.f32 %v5640_v13, %v5642_v6  ;;  %4062 = vpow2.f32 %v2155_v51  ;;  %v1036_v63 = vadd.f32 %v5595_v12, %v5692_v19  ;;  %v760_v12 = vld [vmem:[#allocation2 + $0x1e8] sm:$0xff] }
 0x1f3   : > { %v2414_v48 = vmul.f32 %v2382_v37, %v5603_v34  ;;  %2447 = vst.msk [vmem:[#allocation2 + $0x168] sm:$0xff] %vm553_vm3, %v2415_v15  ;;  %v5769_v61 = vadd.f32 %v5650_v11, %v1037_v24  ;;  %4064 = vpow2.f32 %v2157_v41  ;;  %v2416_v13 = vmul.f32 %v2384_v32, %v5601_v46  ;;  %v1073_v24 = vld [vmem:[#allocation2 + $0x210] sm:$0xff] }
 0x1f4   : > { %v5771_v38 = vpop.eup %4050  ;;  %2445 = vst.msk [vmem:[#allocation2 + $0x148] sm:$0xff] %vm553_vm3, %v2413_v36  ;;  %v5776_v6 = vmul.f32 0.5, %v5706_v33  ;;  %v5779_v34 = vmul.f32 0.5, %v5711_v3  ;;  %v5782_v22 = vmul.f32 0.5, %v5708_v17  ;;  %v5789_v46 = vmul.f32 0.5, %v5721_v8  ;;  %v1176_v55 = vld [vmem:[#allocation2 + $0x209] sm:$0xff] }
 0x1f5   : > { %v5784_v11 = vpop.eup %4052  ;;  %2446 = vst.msk [vmem:[#allocation2 + $0x150] sm:$0xff] %vm553_vm3, %v2414_v48  ;;  %v1777_v19 = vmul.f32 1.0614054, %v5771_v38  ;;  %v5792_v57 = vmul.f32 %v5592_v40, %v968_v7  ;;  %v5795_v33 = vmul.f32 %v5546_v9, %v1072_v43  ;;  %2448 = vst.msk [vmem:[#allocation2 + $0x170] sm:$0xff] %vm553_vm3, %v2416_v13  ;;  %v5802_v5 = vmul.f32 %v5615_v35, %v968_v7  ;;  %v1177_v37 = vld [vmem:[#allocation2 + $0x211] sm:$0xff] }
 0x1f6   : > { %v5797_v3 = vpop.eup %4054  ;;  %v1778_v17 = vmul.f32 1.0614054, %v5784_v11  ;;  %v5805_v44 = vmul.f32 %v5634_v30, %v1072_v43  ;;  %v728_v8 = vmul.f32 %v6702_v16, %v689_v53  ;;  %v800_v49 = vmul.f32 %v6703_v27, %v760_v12 }
 0x1f7   : > { %v5808_v1 = vpop.eup %4056  ;;  %v1779_v2 = vmul.f32 1.0614054, %v5797_v3  ;;  %v3763_v39 = vadd.f32 -1.4531521, %v1777_v19  ;;  %v1006_v25 = vmul.f32 %v5592_v40, %v689_v53  ;;  %v1110_v10 = vmul.f32 %v5546_v9, %v760_v12 }
 0x1f8   : > { %v1780_v56 = vmul.f32 1.0614054, %v5808_v1  ;;  %v3764_v47 = vadd.f32 -1.4531521, %v1778_v17  ;;  %v1140_v60 = vadd.f32 %v5610_v18, %v1036_v63  ;;  %v832_v42 = vadd.f32 %v800_v49, %v728_v8  ;;  %v5836_v8 = vld [vmem:[#allocation2 + $0x1ef] sm:$0xff] }
 0x1f9   : > { %v3765_v54 = vadd.f32 -1.4531521, %v1779_v2  ;;  %v1841_v52 = vmul.f32 %v5771_v38, %v3763_v39  ;;  %v1038_v23 = vadd.f32 %v1006_v25, %v5644_v0  ;;  %v1317_v21 = vmul.f32 %v5615_v35, %v689_v53  ;;  %v5838_v2 = vld [vmem:[#allocation2 + $0x1f0] sm:$0xff] }
 0x1fa   : > { %v3766_v51 = vadd.f32 -1.4531521, %v1780_v56  ;;  %v1842_v31 = vmul.f32 %v5784_v11, %v3764_v47  ;;  %v1244_v62 = vadd.f32 %v5653_v14, %v1140_v60  ;;  %v1421_v28 = vmul.f32 %v5634_v30, %v760_v12  ;;  %v5849_v60 = vld [vmem:[#allocation2 + $0x1f1] sm:$0xff] }
 0x1fb   : > { %v1843_v26 = vmul.f32 %v5797_v3, %v3765_v54  ;;  %v1873_v41 = vadd.f32 1.4214138, %v1841_v52  ;;  %v5822_v18 = vadd.f32 %v1110_v10, %v1038_v23  ;;  %v1009_v36 = vmul.f32 %v5592_v40, %v969_v4  ;;  %v5847_v10 = vld [vmem:[#allocation2 + $0x1e9] sm:$0xff] }
 0x1fc   : > { %v1844_v0 = vmul.f32 %v5808_v1, %v3766_v51  ;;  %v1874_v15 = vadd.f32 1.4214138, %v1842_v31  ;;  %v1349_v32 = vadd.f32 %v1317_v21, %v1244_v62  ;;  %v1113_v48 = vmul.f32 %v5546_v9, %v1073_v24 }
 0x1fd   : > { %v4059_v7 = vpop.eup %4058  ;;  %v1875_v14 = vadd.f32 1.4214138, %v1843_v26  ;;  %v1905_v43 = vmul.f32 %v5771_v38, %v1873_v41  ;;  %v5830_v63 = vmul.f32 %v5559_v45, %v1176_v55  ;;  %v1217_v17 = vmul.f32 %v5559_v45, %v1177_v37 }
 0x1fe   : > { %v4061_v53 = vpop.eup %4060  ;;  %v1876_v13 = vadd.f32 1.4214138, %v1844_v0  ;;  %v1906_v12 = vmul.f32 %v5784_v11, %v1874_v15  ;;  %v5833_v19 = vadd.f32 %v1421_v28, %v1349_v32  ;;  %v5842_v56 = vmul.f32 %v5615_v35, %v969_v4  ;;  %v6708_v28 = vld [vmem:[#allocation10_spill] sm:$0xff] }
 0x1ff   : > { %v4063_v39 = vpop.eup %4062  ;;  %v1907_v49 = vmul.f32 %v5797_v3, %v1875_v14  ;;  %v3795_v25 = vadd.f32 -0.28449672, %v1905_v43  ;;  %v5845_v47 = vmul.f32 %v5634_v30, %v1073_v24  ;;  %v5853_v51 = vmul.f32 %v5663_v20, %v1176_v55 }
 0x200   : > { %v4065_v54 = vpop.eup %4064  ;;  %v1908_v52 = vmul.f32 %v5808_v1, %v1876_v13  ;;  %v3796_v23 = vadd.f32 -0.28449672, %v1906_v12  ;;  %v5856_v31 = vmul.f32 %v5663_v20, %v1177_v37  ;;  %v729_v21 = vmul.f32 %v6702_v16, %v5836_v8 }
 0x201   : > { %v3797_v62 = vadd.f32 -0.28449672, %v1907_v49  ;;  %v1969_v4 = vmul.f32 %v5771_v38, %v3795_v25  ;;  %v801_v24 = vmul.f32 %v6703_v27, %v5838_v2  ;;  %v904_v0 = vmul.f32 %v6708_v28, %v5847_v10 }
 0x202   : > { %v3798_v26 = vadd.f32 -0.28449672, %v1908_v52  ;;  %v1970_v41 = vmul.f32 %v5784_v11, %v3796_v23  ;;  %v905_v55 = vmul.f32 %v6708_v28, %v5849_v60  ;;  %v1007_v14 = vmul.f32 %v5592_v40, %v5836_v8 }
 0x203   : > { %v1971_v37 = vmul.f32 %v5797_v3, %v3797_v62  ;;  %v2001_v15 = vadd.f32 0.2548296, %v1969_v4  ;;  %v833_v32 = vadd.f32 %v801_v24, %v729_v21  ;;  %vm2257_vm11 = vcmp.ge.f32.partialorder %v5715_v29, 0.0  ;;  %v6709_v21 = vld [vmem:[#allocation4_spill] sm:$0xff] }
 0x204   : > { %v1972_v16 = vmul.f32 %v5808_v1, %v3798_v26  ;;  %v2002_v43 = vadd.f32 0.2548296, %v1970_v41  ;;  %v936_v27 = vadd.f32 %v904_v0, %v832_v42  ;;  %v1111_v13 = vmul.f32 %v5546_v9, %v5838_v2 }
 0x205   : > { %v2003_v12 = vadd.f32 0.2548296, %v1971_v37  ;;  %v2033_v49 = vmul.f32 %v5771_v38, %v2001_v15  ;;  %vm2258_vm12 = vcmp.ge.f32.partialorder %v5724_v50, 0.0  ;;  %v937_v25 = vadd.f32 %v905_v55, %v833_v32  ;;  %v6710_v55 = vld [vmem:[#allocation11_spill] sm:$0xff] }
 0x206   : > { %v1039_v52 = vadd.f32 %v1007_v14, %v5762_v58  ;;  %v2004_v23 = vadd.f32 0.2548296, %v1972_v16  ;;  %v2034_v40 = vmul.f32 %v5784_v11, %v2002_v43  ;;  %vm2259_vm13 = vcmp.ge.f32.partialorder %v5718_v59, 0.0 }
 0x207   : > { %v1040_v62 = vadd.f32 %v5792_v57, %v936_v27  ;;  %v1214_v42 = vmul.f32 %v5559_v45, %v5847_v10  ;;  %v2035_v9 = vmul.f32 %v5797_v3, %v2003_v12  ;;  %v2193_v4 = vmul.f32 %v4059_v7, %v2033_v49 }
 0x208   : > { %vm2260_vm14 = vcmp.ge.f32.partialorder %v6709_v21, 0.0  ;;  %v1041_v38 = vadd.f32 %v1009_v36, %v937_v25  ;;  %v1143_v24 = vadd.f32 %v1111_v13, %v1039_v52  ;;  %v2036_v26 = vmul.f32 %v5808_v1, %v2004_v23 }
 0x209   : > { %v2194_v58 = vmul.f32 %v4061_v53, %v2034_v40  ;;  %v1144_v41 = vadd.f32 %v5795_v33, %v1040_v62  ;;  %v1215_v11 = vmul.f32 %v5559_v45, %v5849_v60  ;;  %v2195_v28 = vmul.f32 %v4063_v39, %v2035_v9 }
 0x20a   : > { %v2225_v57 = vsub.f32 1.0, %v2193_v4  ;;  %v1145_v0 = vadd.f32 %v1113_v48, %v1041_v38  ;;  %v1245_v37 = vadd.f32 %v6710_v55, %v5769_v61  ;;  %v2196_v3 = vmul.f32 %v4065_v54, %v2036_v26  ;;  %v2460_v26 = vld [vmem:[#allocation2 + $0xf] sm:$0xff] }
 0x20b   : > { %v2226_v7 = vsub.f32 1.0, %v2194_v58  ;;  %v1246_v15 = vadd.f32 %v1214_v42, %v5822_v18  ;;  %v1247_v36 = vadd.f32 %v1215_v11, %v1143_v24  ;;  %v2227_v32 = vsub.f32 1.0, %v2195_v28  ;;  %v6711_v18 = vld [vmem:[#allocation6_spill] sm:$0xff]  ;;  %v6713_v42 = vld [vmem:[#allocation7_spill] sm:$0xff]  ;;  %v2531_v58 = vld [vmem:[#allocation2 + $0x10] sm:$0xff] }
 0x20c   : > { %v2289_v14 = vsub.f32 0.0, %v2225_v57  ;;  %v1248_v1 = vadd.f32 %v5830_v63, %v1144_v41  ;;  %v1249_v53 = vadd.f32 %v1217_v17, %v1145_v0  ;;  %v2228_v33 = vsub.f32 1.0, %v2196_v3  ;;  %v5956_v41 = vld [vmem:[%s6642_s4 + $0x1] ss:$0 sm:$0xff] }
 0x20d   : > { %v2290_v16 = vsub.f32 0.0, %v2226_v7  ;;  %v1318_v45 = vmul.f32 %v5615_v35, %v5836_v8  ;;  %v1351_v48 = vadd.f32 %v5802_v5, %v1246_v15  ;;  %v2291_v39 = vsub.f32 0.0, %v2227_v32  ;;  %v6712_v8 = vld [vmem:[#allocation3_spill] sm:$0xff]  ;;  %6718 = vst [vmem:[#allocation4_spill] sm:$0xff] %v5956_v41 }
 0x20e   : > { %v2321_v61 = vsel %vm2257_vm11, %v2225_v57, %v2289_v14  ;;  %v1352_v54 = vadd.f32 %v5842_v56, %v1247_v36  ;;  %v1353_v43 = vadd.f32 %v6711_v18, %v1248_v1  ;;  %v2292_v27 = vsub.f32 0.0, %v2228_v33 }
 0x20f   : > { %v2322_v63 = vsel %vm2258_vm12, %v2226_v7, %v2290_v16  ;;  %v2385_v17 = vadd.f32 1.0, %v2321_v61  ;;  %v1350_v13 = vadd.f32 %v1318_v45, %v1245_v37  ;;  %v2323_v12 = vsel %vm2259_vm13, %v2227_v32, %v2291_v39 }
 0x210   : > { %v2386_v35 = vadd.f32 1.0, %v2322_v63  ;;  %v1354_v5 = vadd.f32 %v6712_v8, %v1249_v53  ;;  %v1422_v29 = vmul.f32 %v5634_v30, %v5838_v2  ;;  %v2324_v56 = vsel %vm2260_vm14, %v2228_v33, %v2292_v27  ;;  %v6714_v2 = vld [vmem:[#allocation9_spill] sm:$0xff] }
 0x211   : > { %v2387_v49 = vadd.f32 1.0, %v2323_v12  ;;  %v2417_v25 = vmul.f32 %v2385_v17, %v5776_v6  ;;  %v1455_v50 = vadd.f32 %v5805_v44, %v1351_v48  ;;  %v2388_v52 = vadd.f32 1.0, %v2324_v56 }
 0x212   : > { %v2418_v23 = vmul.f32 %v2386_v35, %v5779_v34  ;;  %v1454_v40 = vadd.f32 %v1422_v29, %v1350_v13  ;;  %v1456_v59 = vadd.f32 %v5845_v47, %v1352_v54  ;;  %v1457_v30 = vadd.f32 %v6713_v42, %v1353_v43  ;;  %v2459_v47 = vld [vmem:[#allocation2 + $0x7] sm:$0xff] }
 0x213   : > { %v2419_v62 = vmul.f32 %v2387_v49, %v5782_v22  ;;  %2449 = vst.msk [vmem:[#allocation2 + $0x188] sm:$0xff] %vm553_vm3, %v2417_v25  ;;  %v1458_v9 = vadd.f32 %v6714_v2, %v1354_v5  ;;  %v1525_v4 = vmul.f32 %v5663_v20, %v5847_v10  ;;  %v2420_v6 = vmul.f32 %v2388_v52, %v5789_v46  ;;  %v6715_v10 = vld [vmem:[#allocation8_spill] sm:$0xff]  ;;  %v6716_v46 = vld [vmem:[#allocation5_spill] sm:$0xff] }
 0x214   : > { %2450 = vst.msk [vmem:[#allocation2 + $0x190] sm:$0xff] %vm553_vm3, %v2418_v23  ;;  %v1526_v34 = vmul.f32 %v5663_v20, %v5849_v60  ;;  %v5924_v44 = vadd.f32 %v5853_v51, %v1455_v50  ;;  %v5927_v22 = vadd.f32 %v5856_v31, %v1456_v59  ;;  %v5934_v38 = vadd.f32 %v6715_v10, %v1457_v30  ;;  %v5942_v20 = vld [vmem:[%s6642_s4] ss:$0 sm:$0xff]  ;;  %v2530_v60 = vld [vmem:[#allocation2 + $0x8] sm:$0xff]  ;;  %v5983_v30 = vld [vmem:[%s6642_s4 + $0x2] ss:$0 sm:$0xff] }
 0x215   : > { %2451 = vst.msk [vmem:[#allocation2 + $0x1a8] sm:$0xff] %vm553_vm3, %v2419_v62  ;;  %v5931_v21 = vadd.f32 %v1525_v4, %v5833_v19  ;;  %v5937_v24 = vadd.f32 %v6716_v46, %v1458_v9  ;;  %6717 = vst [vmem:[#allocation10_spill] sm:$0xff] %v5942_v20  ;;  %v2498_v3 = vmul.f32 %v5942_v20, %v2459_v47  ;;  %v2634_v42 = vld [vmem:[#allocation2 + $0x9] sm:$0xff]  ;;  %v2635_v9 = vld [vmem:[#allocation2 + $0x11] sm:$0xff]  ;;  %vm3610_vm6 = vcmask 31744  }
 0x216   : > { %2452 = vst.msk [vmem:[#allocation2 + $0x1b0] sm:$0xff] %vm553_vm3, %v2420_v6  ;;  %v5945_v51 = vadd.f32 %v1526_v34, %v1454_v40  ;;  %v5948_v19 = vmul.f32 0.70710677, %v5924_v44  ;;  %v5951_v31 = vmul.f32 0.70710677, %v5927_v22  ;;  %v2499_v32 = vmul.f32 %v5942_v20, %v2460_v26  ;;  %v2738_v4 = vld [vmem:[#allocation2 + $0x27] sm:$0xff] }
 0x217   : > { %v5959_v11 = vmul.f32 0.70710677, %v5931_v21  ;;  %v5962_v28 = vmul.f32 0.70710677, %v5934_v38  ;;  %v5965_v57 = vmul.f32 0.70710677, %v5937_v24  ;;  %v2570_v33 = vmul.f32 %v5956_v41, %v2530_v60 }
 0x218   : > { %v5968_v0 = vmul.f32 0.70710677, %v5945_v51  ;;  %v1623_v55 = vand.u32 2147483647, %v5948_v19  ;;  %v1624_v37 = vand.u32 2147483647, %v5951_v31  ;;  %v2571_v39 = vmul.f32 %v5956_v41, %v2531_v58 }
 0x219   : > { %v1621_v7 = vand.u32 2147483647, %v5959_v11  ;;  %v1625_v15 = vand.u32 2147483647, %v5962_v28  ;;  %v1626_v36 = vand.u32 2147483647, %v5965_v57  ;;  %v2602_v10 = vadd.f32 %v2570_v33, %v2498_v3 }
 0x21a   : > { %v1622_v14 = vand.u32 2147483647, %v5968_v0  ;;  %v1655_v1 = vmul.f32 0.3275911, %v1623_v55  ;;  %v1656_v53 = vmul.f32 0.3275911, %v1624_v37 }
 0x21b   : > { %v1653_v16 = vmul.f32 0.3275911, %v1621_v7  ;;  %v1657_v45 = vmul.f32 0.3275911, %v1625_v15  ;;  %v1658_v48 = vmul.f32 0.3275911, %v1626_v36 }
 0x21c   : > { %v1654_v61 = vmul.f32 0.3275911, %v1622_v14  ;;  %v1687_v54 = vadd.f32 1.0, %v1655_v1  ;;  %v1688_v18 = vadd.f32 1.0, %v1656_v53  ;;  %v2069_v43 = vsub.f32 0.0, %v1621_v7  ;;  %v2739_v46 = vld [vmem:[#allocation2 + $0x2f] sm:$0xff] }
 0x21d   : > { %v1685_v27 = vadd.f32 1.0, %v1653_v16  ;;  %v1689_v63 = vadd.f32 1.0, %v1657_v45  ;;  %v1690_v17 = vadd.f32 1.0, %v1658_v48  ;;  %v2070_v13 = vsub.f32 0.0, %v1622_v14  ;;  %v5988_v6 = vld [vmem:[%s6642_s4 + $0x3] ss:$0 sm:$0xff] }
 0x21e   : > { %v1686_v12 = vadd.f32 1.0, %v1654_v61  ;;  %4066 = vrcp.f32 %v1687_v54  ;;  %v2071_v35 = vsub.f32 0.0, %v1623_v55  ;;  %v2072_v8 = vsub.f32 0.0, %v1624_v37  ;;  %v2842_v26 = vld [vmem:[#allocation2 + $0x28] sm:$0xff]  ;;  %v2843_v60 = vld [vmem:[#allocation2 + $0x30] sm:$0xff] }
 0x21f   : > { %4068 = vrcp.f32 %v1685_v27  ;;  %v2073_v5 = vsub.f32 0.0, %v1625_v15  ;;  %v2074_v29 = vsub.f32 0.0, %v1626_v36  ;;  %v2101_v56 = vmul.f32 %v2069_v43, %v1621_v7  ;;  %v5999_v7 = vld [vmem:[%s6642_s4 + $0x4] ss:$0 sm:$0xff]  ;;  %v6026_v53 = vld [vmem:[#allocation2 + $0x4f] sm:$0xff] }
 0x220   : > { %4070 = vrcp.f32 %v1686_v12  ;;  %v2102_v49 = vmul.f32 %v2070_v13, %v1622_v14  ;;  %v2103_v25 = vmul.f32 %v2071_v35, %v1623_v55  ;;  %v2104_v50 = vmul.f32 %v2072_v8, %v1624_v37  ;;  %v6036_v45 = vld [vmem:[#allocation2 + $0x48] sm:$0xff]  ;;  %v6038_v48 = vld [vmem:[#allocation2 + $0x50] sm:$0xff] }
 0x221   : > { %4072 = vrcp.f32 %v1688_v18  ;;  %v2105_v52 = vmul.f32 %v2073_v5, %v1625_v15  ;;  %v2106_v23 = vmul.f32 %v2074_v29, %v1626_v36  ;;  %v2159_v40 = vmul.f32 1.442695, %v2101_v56  ;;  %v6001_v15 = vld [vmem:[#allocation2 + $0x29] sm:$0xff]  ;;  %v6048_v27 = vld [vmem:[#allocation2 + $0x51] sm:$0xff] }
 0x222   : > { %4074 = vrcp.f32 %v1689_v63  ;;  %v2161_v59 = vmul.f32 1.442695, %v2102_v49  ;;  %v2163_v62 = vmul.f32 1.442695, %v2103_v25  ;;  %v2165_v2 = vmul.f32 1.442695, %v2104_v50 }
 0x223   : > { %4076 = vrcp.f32 %v1690_v17  ;;  %v2167_v34 = vmul.f32 1.442695, %v2105_v52  ;;  %v5991_v47 = vmul.f32 0.5, %v5924_v44  ;;  %v2169_v58 = vmul.f32 1.442695, %v2106_v23  ;;  %v6046_v43 = vld [vmem:[#allocation2 + $0x49] sm:$0xff] }
 0x224   : > { %4078 = vpow2.f32 %v2159_v40  ;;  %v5994_v55 = vmul.f32 0.5, %v5931_v21  ;;  %v2603_v37 = vadd.f32 %v2571_v39, %v2499_v32  ;;  %v6004_v44 = vmul.f32 0.5, %v5945_v51  ;;  %v6012_v21 = vld [vmem:[#allocation2 + $0x31] sm:$0xff]  ;;  %v6017_v32 = vld [vmem:[%s6642_s4 + $0x5] ss:$0 sm:$0xff] }
 0x225   : > { %4080 = vpow2.f32 %v2161_v59  ;;  %v6007_v3 = vmul.f32 0.5, %v5927_v22  ;;  %v6010_v36 = vmul.f32 0.5, %v5934_v38  ;;  %v6020_v14 = vmul.f32 0.5, %v5937_v24  ;;  %v6024_v22 = vld [vmem:[#allocation2 + $0x47] sm:$0xff]  ;;  %v6031_v38 = vld [vmem:[%s6642_s4 + $0x6] ss:$0 sm:$0xff] }
 0x226   : > { %4082 = vpow2.f32 %v2163_v62  ;;  %v2674_v51 = vmul.f32 %v5983_v30, %v2634_v42  ;;  %v2675_v1 = vmul.f32 %v5983_v30, %v2635_v9  ;;  %v2778_v33 = vmul.f32 %v5988_v6, %v2738_v4  ;;  %v6043_v39 = vld [vmem:[%s6642_s4 + $0x7] ss:$0 sm:$0xff]  ;;  %v6053_v63 = vld [vmem:[%s6642_s4 + $0x8] ss:$0 sm:$0xff] }
 0x227   : > { %4084 = vpow2.f32 %v2165_v2  ;;  %6719 = vst [vmem:[#allocation11_spill] sm:$0xff] %v6020_v14  ;;  %v2779_v16 = vmul.f32 %v5988_v6, %v2739_v46  ;;  %v2882_v24 = vmul.f32 %v5999_v7, %v2842_v26  ;;  %6720 = vst [vmem:[#allocation6_spill] sm:$0xff] %v6043_v39  ;;  %v2883_v18 = vmul.f32 %v5999_v7, %v2843_v60 }
 0x228   : > { %4086 = vpow2.f32 %v2167_v34  ;;  %v2706_v61 = vadd.f32 %v2674_v51, %v2602_v10  ;;  %v2707_v54 = vadd.f32 %v2675_v1, %v2603_v37  ;;  %6721 = vst [vmem:[#allocation3_spill] sm:$0xff] %v6053_v63  ;;  %v2986_v17 = vmul.f32 %v6017_v32, %v6001_v15 }
 0x229   : > { %4088 = vpow2.f32 %v2169_v58  ;;  %v2987_v13 = vmul.f32 %v6017_v32, %v6012_v21  ;;  %v3090_v12 = vmul.f32 %v6031_v38, %v6024_v22  ;;  %v3091_v35 = vmul.f32 %v6031_v38, %v6026_v53 }
 0x22a   : > { %v2810_v5 = vadd.f32 %v2778_v33, %v2706_v61  ;;  %v2811_v29 = vadd.f32 %v2779_v16, %v2707_v54  ;;  %v3194_v56 = vmul.f32 %v6043_v39, %v6036_v45  ;;  %v3195_v49 = vmul.f32 %v6043_v39, %v6038_v48 }
 0x22b   : > { %v6063_v8 = vpop.eup %4066  ;;  %v3298_v52 = vmul.f32 %v6053_v63, %v6046_v43  ;;  %v3299_v23 = vmul.f32 %v6053_v63, %v6048_v27  ;;  %v2500_v40 = vmul.f32 %v5942_v20, %v2738_v4  ;;  %v2501_v9 = vmul.f32 %v5942_v20, %v2739_v46 }
 0x22c   : > { %v6069_v25 = vpop.eup %4068  ;;  %v1783_v50 = vmul.f32 1.0614054, %v6063_v8  ;;  %v2914_v42 = vadd.f32 %v2882_v24, %v2810_v5  ;;  %v2915_v2 = vadd.f32 %v2883_v18, %v2811_v29  ;;  %v2572_v37 = vmul.f32 %v5956_v41, %v2842_v26 }
 0x22d   : > { %v6077_v59 = vpop.eup %4070  ;;  %v1781_v62 = vmul.f32 1.0614054, %v6069_v25  ;;  %v2573_v51 = vmul.f32 %v5956_v41, %v2843_v60  ;;  %vm2263_vm15 = vcmp.ge.f32.partialorder %v5948_v19, 0.0  ;;  %vm2261_vm0 = vcmp.ge.f32.partialorder %v5959_v11, 0.0 }
 0x22e   : > { %v6081_v34 = vpop.eup %4072  ;;  %v1782_v10 = vmul.f32 1.0614054, %v6077_v59  ;;  %v3769_v58 = vadd.f32 -1.4531521, %v1783_v50  ;;  %v3018_v16 = vadd.f32 %v2986_v17, %v2914_v42  ;;  %v3019_v61 = vadd.f32 %v2987_v13, %v2915_v2 }
 0x22f   : > { %v6086_v1 = vpop.eup %4074  ;;  %v1784_v4 = vmul.f32 1.0614054, %v6081_v34  ;;  %v3767_v33 = vadd.f32 -1.4531521, %v1781_v62  ;;  %v2604_v5 = vadd.f32 %v2572_v37, %v2500_v40  ;;  %v2605_v14 = vadd.f32 %v2573_v51, %v2501_v9 }
 0x230   : > { %v6089_v24 = vpop.eup %4076  ;;  %v1785_v46 = vmul.f32 1.0614054, %v6086_v1  ;;  %v3768_v54 = vadd.f32 -1.4531521, %v1782_v10  ;;  %v1847_v18 = vmul.f32 %v6063_v8, %v3769_v58  ;;  %v3122_v63 = vadd.f32 %v3090_v12, %v3018_v16 }
 0x231   : > { %v6093_v29 = vpop.eup %4078  ;;  %v1786_v26 = vmul.f32 1.0614054, %v6089_v24  ;;  %v3770_v60 = vadd.f32 -1.4531521, %v1784_v4  ;;  %v1845_v50 = vmul.f32 %v6069_v25, %v3767_v33  ;;  %v3123_v42 = vadd.f32 %v3091_v35, %v3019_v61 }
 0x232   : > { %v6097_v41 = vpop.eup %4080  ;;  %v3771_v17 = vadd.f32 -1.4531521, %v1785_v46  ;;  %v1846_v13 = vmul.f32 %v6077_v59, %v3768_v54  ;;  %v1879_v62 = vadd.f32 1.4214138, %v1847_v18  ;;  %v3226_v37 = vadd.f32 %v3194_v56, %v3122_v63 }
 0x233   : > { %v4083_v2 = vpop.eup %4082  ;;  %v3772_v10 = vadd.f32 -1.4531521, %v1786_v26  ;;  %v1848_v58 = vmul.f32 %v6081_v34, %v3770_v60  ;;  %v1877_v40 = vadd.f32 1.4214138, %v1845_v50  ;;  %v3227_v33 = vadd.f32 %v3195_v49, %v3123_v42 }
 0x234   : > { %v6101_v20 = vpop.eup %4084  ;;  %v1849_v4 = vmul.f32 %v6086_v1, %v3771_v17  ;;  %v1878_v39 = vadd.f32 1.4214138, %v1846_v13  ;;  %v1911_v12 = vmul.f32 %v6063_v8, %v1879_v62  ;;  %v3330_v61 = vadd.f32 %v3298_v52, %v3226_v37 }
 0x235   : > { %v4087_v16 = vpop.eup %4086  ;;  %v1850_v46 = vmul.f32 %v6089_v24, %v3772_v10  ;;  %v1880_v54 = vadd.f32 1.4214138, %v1848_v58  ;;  %v1909_v35 = vmul.f32 %v6069_v25, %v1877_v40  ;;  %v3331_v56 = vadd.f32 %v3299_v23, %v3227_v33 }
 0x236   : > { %v4089_v18 = vpop.eup %4088  ;;  %v1881_v26 = vadd.f32 1.4214138, %v1849_v4  ;;  %v1910_v60 = vmul.f32 %v6077_v59, %v1878_v39  ;;  %v3801_v63 = vadd.f32 -0.28449672, %v1911_v12  ;;  %v2676_v39 = vmul.f32 %v5983_v30, %v6001_v15 }
 0x237   : > { %v1882_v50 = vadd.f32 1.4214138, %v1850_v46  ;;  %v1912_v17 = vmul.f32 %v6081_v34, %v1880_v54  ;;  %v3799_v13 = vadd.f32 -0.28449672, %v1909_v35  ;;  %v3362_v10 = vpack.c.bf16 %v3331_v56, %v3330_v61 }
 0x238   : > { %v1913_v49 = vmul.f32 %v6086_v1, %v1881_v26  ;;  %v3800_v62 = vadd.f32 -0.28449672, %v1910_v60  ;;  %v1975_v42 = vmul.f32 %v6063_v8, %v3801_v63  ;;  %v2677_v9 = vmul.f32 %v5983_v30, %v6012_v21 }
 0x239   : > { %v1914_v58 = vmul.f32 %v6089_v24, %v1882_v50  ;;  %v3802_v52 = vadd.f32 -0.28449672, %v1912_v17  ;;  %v1973_v40 = vmul.f32 %v6069_v25, %v3799_v13  ;;  %3918 = vmatprep.mubr.msk.bf16.mxu1 %vm553_vm3, %v3362_v10  ;;  %v2708_v46 = vadd.f32 %v2676_v39, %v2604_v5 }
 0x23a   : > { %v3803_v23 = vadd.f32 -0.28449672, %v1913_v49  ;;  %v1974_v37 = vmul.f32 %v6077_v59, %v3800_v62  ;;  %v2007_v4 = vadd.f32 0.2548296, %v1975_v42  ;;  %v2709_v61 = vadd.f32 %v2677_v9, %v2605_v14 }
 0x23b   : > { %v3804_v51 = vadd.f32 -0.28449672, %v1914_v58  ;;  %v1976_v12 = vmul.f32 %v6081_v34, %v3802_v52  ;;  %v2005_v33 = vadd.f32 0.2548296, %v1973_v40  ;;  %vm2262_vm1 = vcmp.ge.f32.partialorder %v5968_v0, 0.0 }
 0x23c   : > { %v1977_v54 = vmul.f32 %v6086_v1, %v3803_v23  ;;  %v2006_v35 = vadd.f32 0.2548296, %v1974_v37  ;;  %v2039_v15 = vmul.f32 %v6063_v8, %v2007_v4  ;;  %v2780_v63 = vmul.f32 %v5988_v6, %v6024_v22 }
 0x23d   : > { %v1978_v26 = vmul.f32 %v6089_v24, %v3804_v51  ;;  %v2008_v60 = vadd.f32 0.2548296, %v1976_v12  ;;  %v2037_v21 = vmul.f32 %v6069_v25, %v2005_v33  ;;  %vm2264_vm2 = vcmp.ge.f32.partialorder %v5951_v31, 0.0 }
 0x23e   : > { %v2009_v56 = vadd.f32 0.2548296, %v1977_v54  ;;  %v2038_v5 = vmul.f32 %v6077_v59, %v2006_v35  ;;  %v2199_v50 = vmul.f32 %v4083_v2, %v2039_v15  ;;  %v2781_v8 = vmul.f32 %v5988_v6, %v6026_v53 }
 0x23f   : > { %v2010_v14 = vadd.f32 0.2548296, %v1978_v26  ;;  %v2040_v17 = vmul.f32 %v6081_v34, %v2008_v60  ;;  %v2197_v13 = vmul.f32 %v6093_v29, %v2037_v21  ;;  %vm2265_vm4 = vcmp.ge.f32.partialorder %v5962_v28, 0.0  ;;  %v3052_v60 = vld [vmem:[#allocation2 + $0x67] sm:$0xff] }
 0x240   : > { %v2812_v25 = vadd.f32 %v2780_v63, %v2708_v46  ;;  %v2041_v49 = vmul.f32 %v6086_v1, %v2009_v56  ;;  %v2198_v62 = vmul.f32 %v6097_v41, %v2038_v5  ;;  %v2231_v42 = vsub.f32 1.0, %v2199_v50  ;;  %v3053_v56 = vld [vmem:[#allocation2 + $0x6f] sm:$0xff] }
 0x241   : > { %vm2266_vm5 = vcmp.ge.f32.partialorder %v5965_v57, 0.0  ;;  %v2813_v59 = vadd.f32 %v2781_v8, %v2709_v61  ;;  %v2042_v2 = vmul.f32 %v6089_v24, %v2010_v14  ;;  %v2200_v10 = vmul.f32 %v6101_v20, %v2040_v17  ;;  %v3156_v8 = vld [vmem:[#allocation2 + $0x68] sm:$0xff]  ;;  %v3157_v14 = vld [vmem:[#allocation2 + $0x70] sm:$0xff] }
 0x242   : > { %v2229_v58 = vsub.f32 1.0, %v2197_v13  ;;  %v2884_v34 = vmul.f32 %v5999_v7, %v6036_v45  ;;  %v2201_v29 = vmul.f32 %v4087_v16, %v2041_v49  ;;  %v2230_v52 = vsub.f32 1.0, %v2198_v62 }
 0x243   : > { %v2295_v40 = vsub.f32 0.0, %v2231_v42  ;;  %v2885_v1 = vmul.f32 %v5999_v7, %v6038_v48  ;;  %v2202_v39 = vmul.f32 %v4089_v18, %v2042_v2  ;;  %v2232_v41 = vsub.f32 1.0, %v2200_v10  ;;  %v3260_v2 = vld [vmem:[#allocation2 + $0x69] sm:$0xff]  ;;  %v3261_v10 = vld [vmem:[#allocation2 + $0x71] sm:$0xff] }
 0x244   : > { %v2293_v23 = vsub.f32 0.0, %v2229_v58  ;;  %v2916_v37 = vadd.f32 %v2884_v34, %v2812_v25  ;;  %v2233_v4 = vsub.f32 1.0, %v2201_v29  ;;  %v2294_v9 = vsub.f32 0.0, %v2230_v52 }
 0x245   : > { %v2327_v24 = vsel %vm2263_vm15, %v2231_v42, %v2295_v40  ;;  %v2917_v20 = vadd.f32 %v2885_v1, %v2813_v59  ;;  %v2234_v51 = vsub.f32 1.0, %v2202_v39  ;;  %v2296_v12 = vsub.f32 0.0, %v2232_v41  ;;  %v6723_v42 = vld [vmem:[#allocation6_spill] sm:$0xff] }
 0x246   : > { %v2325_v16 = vsel %vm2261_vm0, %v2229_v58, %v2293_v23  ;;  %v2391_v33 = vadd.f32 1.0, %v2327_v24  ;;  %v2297_v46 = vsub.f32 0.0, %v2233_v4  ;;  %v2326_v54 = vsel %vm2262_vm1, %v2230_v52, %v2294_v9  ;;  %v6725_v52 = vld [vmem:[#allocation4_spill] sm:$0xff] }
 0x247   : > { %v2389_v18 = vadd.f32 1.0, %v2325_v16  ;;  %v2988_v35 = vmul.f32 %v6017_v32, %v6046_v43  ;;  %v2298_v15 = vsub.f32 0.0, %v2234_v51  ;;  %v2328_v19 = vsel %vm2264_vm2, %v2232_v41, %v2296_v12 }
 0x248   : > { %v2390_v61 = vadd.f32 1.0, %v2326_v54  ;;  %v2423_v26 = vmul.f32 %v2391_v33, %v5991_v47  ;;  %v2329_v11 = vsel %vm2265_vm4, %v2233_v4, %v2297_v46  ;;  %v2392_v21 = vadd.f32 1.0, %v2328_v19  ;;  %v3055_v33 = vld [vmem:[#allocation2 + $0x8f] sm:$0xff] }
 0x249   : > { %v2421_v63 = vmul.f32 %v2389_v18, %v5994_v55  ;;  %v2989_v0 = vmul.f32 %v6017_v32, %v6048_v27  ;;  %v2330_v5 = vsel %vm2266_vm5, %v2234_v51, %v2298_v15  ;;  %v2393_v50 = vadd.f32 1.0, %v2329_v11 }
 0x24a   : > { %v2422_v31 = vmul.f32 %v2390_v61, %v6004_v44  ;;  %2455 = vst.msk [vmem:[#allocation2 + $0x1e8] sm:$0xff] %vm553_vm3, %v2423_v26  ;;  %v3020_v47 = vadd.f32 %v2988_v35, %v2916_v37  ;;  %v2394_v28 = vadd.f32 1.0, %v2330_v5  ;;  %v2424_v17 = vmul.f32 %v2392_v21, %v6007_v3  ;;  %v6722_v44 = vld [vmem:[#allocation11_spill] sm:$0xff]  ;;  %v3158_v61 = vld [vmem:[#allocation2 + $0x88] sm:$0xff]  ;;  %v3159_v5 = vld [vmem:[#allocation2 + $0x90] sm:$0xff] }
 0x24b   : > { %2453 = vst.msk [vmem:[#allocation2 + $0x1c8] sm:$0xff] %vm553_vm3, %v2421_v63  ;;  %v3021_v55 = vadd.f32 %v2989_v0, %v2917_v20  ;;  %v3092_v13 = vmul.f32 %v6031_v38, %v3052_v60  ;;  %v2425_v25 = vmul.f32 %v2393_v50, %v6010_v36  ;;  %v3093_v57 = vmul.f32 %v6031_v38, %v3053_v56  ;;  %v6724_v36 = vld [vmem:[#allocation10_spill] sm:$0xff]  ;;  %v6726_v37 = vld [vmem:[#allocation3_spill] sm:$0xff]  ;;  %v3262_v50 = vld [vmem:[#allocation2 + $0x89] sm:$0xff] }
 0x24c   : > { %2454 = vst.msk [vmem:[#allocation2 + $0x1d0] sm:$0xff] %vm553_vm3, %v2422_v31  ;;  %v2426_v49 = vmul.f32 %v2394_v28, %v6722_v44  ;;  %2456 = vst.msk [vmem:[#allocation2 + $0x1f0] sm:$0xff] %vm553_vm3, %v2424_v17  ;;  %v3196_v59 = vmul.f32 %v6723_v42, %v3156_v8  ;;  %v3197_v3 = vmul.f32 %v6723_v42, %v3157_v14  ;;  %v3054_v20 = vld [vmem:[#allocation2 + $0x87] sm:$0xff]  ;;  %v3263_v31 = vld [vmem:[#allocation2 + $0x91] sm:$0xff] }
 0x24d   : > { %v3124_v62 = vadd.f32 %v3092_v13, %v3020_v47  ;;  %2457 = vst.msk [vmem:[#allocation2 + $0x208] sm:$0xff] %vm553_vm3, %v2425_v25  ;;  %v3125_v58 = vadd.f32 %v3093_v57, %v3021_v55  ;;  %v2502_v34 = vmul.f32 %v6724_v36, %v6024_v22  ;;  %v2503_v29 = vmul.f32 %v6724_v36, %v6026_v53 }
 0x24e   : > { %v2574_v40 = vmul.f32 %v6725_v52, %v6036_v45  ;;  %2458 = vst.msk [vmem:[#allocation2 + $0x210] sm:$0xff] %vm553_vm3, %v2426_v49  ;;  %v2575_v39 = vmul.f32 %v6725_v52, %v6038_v48  ;;  %v2678_v41 = vmul.f32 %v5983_v30, %v6046_v43  ;;  %v3300_v4 = vmul.f32 %v6726_v37, %v3260_v2 }
 0x24f   : > { %v3228_v1 = vadd.f32 %v3196_v59, %v3124_v62  ;;  %v3229_v23 = vadd.f32 %v3197_v3, %v3125_v58  ;;  %v3301_v22 = vmul.f32 %v6726_v37, %v3261_v10  ;;  %v2679_v53 = vmul.f32 %v5983_v30, %v6048_v27  ;;  %v6212_v3 = vld [vmem:[#allocation2 + $0xa7] sm:$0xff] }
 0x250   : > { %v2606_v9 = vadd.f32 %v2574_v40, %v2502_v34  ;;  %v2607_v24 = vadd.f32 %v2575_v39, %v2503_v29  ;;  %v2783_v45 = vmul.f32 %v5988_v6, %v3053_v56  ;;  %v2782_v48 = vmul.f32 %v5988_v6, %v3052_v60  ;;  %v3057_v29 = vld [vmem:[#allocation2 + $0xaf] sm:$0xff] }
 0x251   : > { %v3332_v51 = vadd.f32 %v3300_v4, %v3228_v1  ;;  %v3333_v12 = vadd.f32 %v3301_v22, %v3229_v23  ;;  %v2886_v46 = vmul.f32 %v5999_v7, %v3156_v8  ;;  %v2887_v54 = vmul.f32 %v5999_v7, %v3157_v14  ;;  %v3160_v23 = vld [vmem:[#allocation2 + $0xa8] sm:$0xff] }
 0x252   : > { %v2710_v16 = vadd.f32 %v2678_v41, %v2606_v9  ;;  %v2711_v43 = vadd.f32 %v2679_v53, %v2607_v24  ;;  %v2990_v18 = vmul.f32 %v6017_v32, %v3260_v2  ;;  %v2991_v27 = vmul.f32 %v6017_v32, %v3261_v10 }
 0x253   : > { %v3363_v35 = vpack.c.bf16 %v3333_v12, %v3332_v51  ;;  %v3094_v19 = vmul.f32 %v6031_v38, %v3054_v20  ;;  %v3095_v11 = vmul.f32 %v6031_v38, %v3055_v33  ;;  %v2504_v21 = vmul.f32 %v6724_v36, %v3052_v60  ;;  %v3161_v51 = vld [vmem:[#allocation2 + $0xb0] sm:$0xff] }
 0x254   : > { %v2814_v15 = vadd.f32 %v2782_v48, %v2710_v16  ;;  %v2815_v26 = vadd.f32 %v2783_v45, %v2711_v43  ;;  %v2505_v63 = vmul.f32 %v6724_v36, %v3053_v56  ;;  %v2576_v47 = vmul.f32 %v6725_v52, %v3156_v8 }
 0x255   : > { %3919 = vmatmul.mubr.msk.bf16.vlgmr.msra.gmra.mxu1 %vm553_vm3, %v3363_v35  ;;  %v2577_v28 = vmul.f32 %v6725_v52, %v3157_v14  ;;  %v2680_v17 = vmul.f32 %v5983_v30, %v3260_v2  ;;  %v3198_v13 = vmul.f32 %v6723_v42, %v3158_v61  ;;  %v2681_v25 = vmul.f32 %v5983_v30, %v3261_v10 }
 0x256   : > { %v2918_v0 = vadd.f32 %v2886_v46, %v2814_v15  ;;  %v2919_v55 = vadd.f32 %v2887_v54, %v2815_v26  ;;  %v2784_v60 = vmul.f32 %v5988_v6, %v3054_v20  ;;  %v2608_v57 = vadd.f32 %v2576_v47, %v2504_v21  ;;  %v3264_v21 = vld [vmem:[#allocation2 + $0xa9] sm:$0xff] }
 0x257   : > { %v2609_v44 = vadd.f32 %v2577_v28, %v2505_v63  ;;  %v2785_v49 = vmul.f32 %v5988_v6, %v3055_v33  ;;  %v3199_v59 = vmul.f32 %v6723_v42, %v3159_v5  ;;  %v3302_v8 = vmul.f32 %v6726_v37, %v3262_v50 }
 0x258   : > { %v3022_v56 = vadd.f32 %v2990_v18, %v2918_v0  ;;  %v3023_v62 = vadd.f32 %v2991_v27, %v2919_v55  ;;  %v3303_v14 = vmul.f32 %v6726_v37, %v3263_v31  ;;  %v2712_v58 = vadd.f32 %v2680_v17, %v2608_v57  ;;  %v3059_v57 = vld [vmem:[#allocation2 + $0xcf] sm:$0xff] }
 0x259   : > { %v2713_v34 = vadd.f32 %v2681_v25, %v2609_v44  ;;  %v2888_v10 = vmul.f32 %v5999_v7, %v3158_v61  ;;  %v2889_v1 = vmul.f32 %v5999_v7, %v3159_v5  ;;  %v2992_v39 = vmul.f32 %v6017_v32, %v3262_v50 }
 0x25a   : > { %v3126_v2 = vadd.f32 %v3094_v19, %v3022_v56  ;;  %v3127_v40 = vadd.f32 %v3095_v11, %v3023_v62  ;;  %v2993_v41 = vmul.f32 %v6017_v32, %v3263_v31  ;;  %v2816_v22 = vadd.f32 %v2784_v60, %v2712_v58 }
 0x25b   : > { %v2817_v9 = vadd.f32 %v2785_v49, %v2713_v34  ;;  %v3096_v24 = vmul.f32 %v6031_v38, %v6212_v3  ;;  %v3097_v45 = vmul.f32 %v6031_v38, %v3057_v29  ;;  %v2506_v12 = vmul.f32 %v6724_v36, %v3054_v20  ;;  %v3265_v20 = vld [vmem:[#allocation2 + $0xb1] sm:$0xff] }
 0x25c   : > { %v3230_v4 = vadd.f32 %v3198_v13, %v3126_v2  ;;  %v3231_v53 = vadd.f32 %v3199_v59, %v3127_v40  ;;  %v2507_v16 = vmul.f32 %v6724_v36, %v3055_v33  ;;  %v2920_v48 = vadd.f32 %v2888_v10, %v2816_v22 }
 0x25d   : > { %v2921_v43 = vadd.f32 %v2889_v1, %v2817_v9  ;;  %v3200_v46 = vmul.f32 %v6723_v42, %v3160_v23  ;;  %v2578_v54 = vmul.f32 %v6725_v52, %v3158_v61  ;;  %v2579_v15 = vmul.f32 %v6725_v52, %v3159_v5  ;;  %v3162_v1 = vld [vmem:[#allocation2 + $0xc8] sm:$0xff] }
 0x25e   : > { %v3334_v18 = vadd.f32 %v3302_v8, %v3230_v4  ;;  %v3335_v35 = vadd.f32 %v3303_v14, %v3231_v53  ;;  %v2682_v27 = vmul.f32 %v5983_v30, %v3262_v50  ;;  %v3024_v19 = vadd.f32 %v2992_v39, %v2920_v48  ;;  %v3058_v50 = vld [vmem:[#allocation2 + $0xc7] sm:$0xff]  ;;  %v3163_v53 = vld [vmem:[#allocation2 + $0xd0] sm:$0xff] }
 0x25f   : > { %v3025_v26 = vadd.f32 %v2993_v41, %v2921_v43  ;;  %v3201_v11 = vmul.f32 %v6723_v42, %v3161_v51  ;;  %v2610_v63 = vadd.f32 %v2578_v54, %v2506_v12  ;;  %v2611_v0 = vadd.f32 %v2579_v15, %v2507_v16 }
 0x260   : > { %v3364_v33 = vpack.c.bf16 %v3335_v35, %v3334_v18  ;;  %v2683_v47 = vmul.f32 %v5983_v30, %v3263_v31  ;;  %v2787_v28 = vmul.f32 %v5988_v6, %v3057_v29  ;;  %v3128_v61 = vadd.f32 %v3096_v24, %v3024_v19 }
 0x261   : > { %v3129_v17 = vadd.f32 %v3097_v45, %v3025_v26  ;;  %v2714_v55 = vadd.f32 %v2682_v27, %v2610_v63  ;;  %v2786_v5 = vmul.f32 %v5988_v6, %v6212_v3  ;;  %v3304_v13 = vmul.f32 %v6726_v37, %v3264_v21  ;;  %v3266_v45 = vld [vmem:[#allocation2 + $0xc9] sm:$0xff] }
 0x262   : > { %3922 = vmatprep.mubr.msk.bf16.mxu1 %vm553_vm3, %v3364_v33  ;;  %v3305_v25 = vmul.f32 %v6726_v37, %v3265_v20  ;;  %v2715_v60 = vadd.f32 %v2683_v47, %v2611_v0  ;;  %v2890_v56 = vmul.f32 %v5999_v7, %v3160_v23  ;;  %v3232_v31 = vadd.f32 %v3200_v46, %v3128_v61  ;;  %v3267_v46 = vld [vmem:[#allocation2 + $0xd1] sm:$0xff]  ;;  %v3060_v26 = vld [vmem:[#allocation2 + $0xe7] sm:$0xff] }
 0x263   : > { %v3233_v44 = vadd.f32 %v3201_v11, %v3129_v17  ;;  %v2818_v49 = vadd.f32 %v2786_v5, %v2714_v55  ;;  %v2891_v62 = vmul.f32 %v5999_v7, %v3161_v51  ;;  %v2994_v8 = vmul.f32 %v6017_v32, %v3264_v21  ;;  %v3061_v11 = vld [vmem:[#allocation2 + $0xef] sm:$0xff] }
 0x264   : > { %v2819_v59 = vadd.f32 %v2787_v28, %v2715_v60  ;;  %v2995_v14 = vmul.f32 %v6017_v32, %v3265_v20  ;;  %v3098_v2 = vmul.f32 %v6031_v38, %v3058_v50  ;;  %v3336_v58 = vadd.f32 %v3304_v13, %v3232_v31 }
 0x265   : > { %v3337_v34 = vadd.f32 %v3305_v25, %v3233_v44  ;;  %v2922_v10 = vadd.f32 %v2890_v56, %v2818_v49  ;;  %v3099_v40 = vmul.f32 %v6031_v38, %v3059_v57  ;;  %v2508_v41 = vmul.f32 %v6724_v36, %v6212_v3  ;;  %v3164_v25 = vld [vmem:[#allocation2 + $0xe8] sm:$0xff] }
 0x266   : > { %v2923_v39 = vadd.f32 %v2891_v62, %v2819_v59  ;;  %v2509_v4 = vmul.f32 %v6724_v36, %v3057_v29  ;;  %v2580_v22 = vmul.f32 %v6725_v52, %v3160_v23  ;;  %v2581_v12 = vmul.f32 %v6725_v52, %v3161_v51  ;;  %v3165_v62 = vld [vmem:[#allocation2 + $0xf0] sm:$0xff] }
 0x267   : > { %v3365_v9 = vpack.c.bf16 %v3337_v34, %v3336_v58  ;;  %v3026_v24 = vadd.f32 %v2994_v8, %v2922_v10  ;;  %v2684_v16 = vmul.f32 %v5983_v30, %v3264_v21  ;;  %v3202_v43 = vmul.f32 %v6723_v42, %v3162_v1  ;;  %v3268_v59 = vld [vmem:[#allocation2 + $0xe9] sm:$0xff] }
 0x268   : > { %v3027_v48 = vadd.f32 %v2995_v14, %v2923_v39  ;;  %v2612_v54 = vadd.f32 %v2580_v22, %v2508_v41  ;;  %v2788_v18 = vmul.f32 %v5988_v6, %v3058_v50  ;;  %v2613_v29 = vadd.f32 %v2581_v12, %v2509_v4  ;;  %v3269_v41 = vld [vmem:[#allocation2 + $0xf1] sm:$0xff] }
 0x269   : > { %3923 = vmatmul.mubr.msk.bf16.gmra.mxu1 %vm553_vm3, %v3365_v9  ;;  %v3130_v3 = vadd.f32 %v3098_v2, %v3026_v24  ;;  %v2685_v23 = vmul.f32 %v5983_v30, %v3265_v20  ;;  %v2789_v35 = vmul.f32 %v5988_v6, %v3059_v57  ;;  %v3203_v51 = vmul.f32 %v6723_v42, %v3163_v53 }
 0x26a   : > { %v3131_v15 = vadd.f32 %v3099_v40, %v3027_v48  ;;  %v3306_v27 = vmul.f32 %v6726_v37, %v3266_v45  ;;  %v2716_v19 = vadd.f32 %v2684_v16, %v2612_v54  ;;  %v3307_v63 = vmul.f32 %v6726_v37, %v3267_v46  ;;  %v3062_v48 = vld [vmem:[#allocation2 + $0x107] sm:$0xff] }
 0x26b   : > { %v3234_v21 = vadd.f32 %v3202_v43, %v3130_v3  ;;  %v2717_v33 = vadd.f32 %v2685_v23, %v2613_v29  ;;  %v2892_v0 = vmul.f32 %v5999_v7, %v3162_v1  ;;  %v2893_v20 = vmul.f32 %v5999_v7, %v3163_v53  ;;  %v3063_v43 = vld [vmem:[#allocation2 + $0x10f] sm:$0xff] }
 0x26c   : > { %v3235_v47 = vadd.f32 %v3203_v51, %v3131_v15  ;;  %v2820_v28 = vadd.f32 %v2788_v18, %v2716_v19  ;;  %v2996_v61 = vmul.f32 %v6017_v32, %v3266_v45  ;;  %v2997_v55 = vmul.f32 %v6017_v32, %v3267_v46 }
 0x26d   : > { %v2821_v17 = vadd.f32 %v2789_v35, %v2717_v33  ;;  %v3100_v5 = vmul.f32 %v6031_v38, %v3060_v26  ;;  %v3101_v13 = vmul.f32 %v6031_v38, %v3061_v11  ;;  %v3338_v60 = vadd.f32 %v3306_v27, %v3234_v21 }
 0x26e   : > { %v3339_v56 = vadd.f32 %v3307_v63, %v3235_v47  ;;  %v2924_v31 = vadd.f32 %v2892_v0, %v2820_v28  ;;  %v2510_v44 = vmul.f32 %v6724_v36, %v3058_v50  ;;  %v2511_v8 = vmul.f32 %v6724_v36, %v3059_v57  ;;  %v3166_v28 = vld [vmem:[#allocation2 + $0x108] sm:$0xff] }
 0x26f   : > { %v2925_v49 = vadd.f32 %v2893_v20, %v2821_v17  ;;  %v2582_v14 = vmul.f32 %v6725_v52, %v3162_v1  ;;  %v2583_v2 = vmul.f32 %v6725_v52, %v3163_v53  ;;  %v3204_v10 = vmul.f32 %v6723_v42, %v3164_v25  ;;  %v3167_v20 = vld [vmem:[#allocation2 + $0x110] sm:$0xff] }
 0x270   : > { %v3366_v58 = vpack.c.bf16 %v3339_v56, %v3338_v60  ;;  %v3028_v34 = vadd.f32 %v2996_v61, %v2924_v31  ;;  %v2686_v40 = vmul.f32 %v5983_v30, %v3266_v45  ;;  %v2687_v50 = vmul.f32 %v5983_v30, %v3267_v46  ;;  %v3270_v31 = vld [vmem:[#allocation2 + $0x109] sm:$0xff] }
 0x271   : > { %v3029_v39 = vadd.f32 %v2997_v55, %v2925_v49  ;;  %v2614_v4 = vadd.f32 %v2582_v14, %v2510_v44  ;;  %v2615_v22 = vadd.f32 %v2583_v2, %v2511_v8  ;;  %v3205_v57 = vmul.f32 %v6723_v42, %v3165_v62  ;;  %v3271_v44 = vld [vmem:[#allocation2 + $0x111] sm:$0xff] }
 0x272   : > { %3926 = vmatprep.mubr.msk.bf16.mxu1 %vm553_vm3, %v3366_v58  ;;  %v3132_v9 = vadd.f32 %v3100_v5, %v3028_v34  ;;  %v3308_v1 = vmul.f32 %v6726_v37, %v3268_v59  ;;  %v2791_v24 = vmul.f32 %v5988_v6, %v3061_v11  ;;  %v2790_v45 = vmul.f32 %v5988_v6, %v3060_v26 }
 0x273   : > { %v3133_v53 = vadd.f32 %v3101_v13, %v3029_v39  ;;  %v2718_v12 = vadd.f32 %v2686_v40, %v2614_v4  ;;  %v2719_v16 = vadd.f32 %v2687_v50, %v2615_v22  ;;  %v3309_v18 = vmul.f32 %v6726_v37, %v3269_v41  ;;  %v3064_v40 = vld [vmem:[#allocation2 + $0x127] sm:$0xff]  ;;  %v3065_v39 = vld [vmem:[#allocation2 + $0x12f] sm:$0xff] }
 0x274   : > { %v3236_v54 = vadd.f32 %v3204_v10, %v3132_v9  ;;  %v2894_v46 = vmul.f32 %v5999_v7, %v3164_v25  ;;  %v2895_v3 = vmul.f32 %v5999_v7, %v3165_v62  ;;  %v2998_v15 = vmul.f32 %v6017_v32, %v3268_v59 }
 0x275   : > { %v3237_v29 = vadd.f32 %v3205_v57, %v3133_v53  ;;  %v2822_v23 = vadd.f32 %v2790_v45, %v2718_v12  ;;  %v2823_v35 = vadd.f32 %v2791_v24, %v2719_v16  ;;  %v2999_v27 = vmul.f32 %v6017_v32, %v3269_v41 }
 0x276   : > { %v3340_v51 = vadd.f32 %v3308_v1, %v3236_v54  ;;  %v3102_v19 = vmul.f32 %v6031_v38, %v3062_v48  ;;  %v3103_v21 = vmul.f32 %v6031_v38, %v3063_v43  ;;  %v2512_v47 = vmul.f32 %v6724_v36, %v3060_v26  ;;  %v3168_v54 = vld [vmem:[#allocation2 + $0x128] sm:$0xff] }
 0x277   : > { %v3341_v63 = vadd.f32 %v3309_v18, %v3237_v29  ;;  %v2926_v33 = vadd.f32 %v2894_v46, %v2822_v23  ;;  %v2927_v0 = vadd.f32 %v2895_v3, %v2823_v35  ;;  %v2513_v61 = vmul.f32 %v6724_v36, %v3061_v11  ;;  %v3169_v18 = vld [vmem:[#allocation2 + $0x130] sm:$0xff]  ;;  %v6302_v29 = vld [vmem:[%s6642_s4] ss:$0 sm:$0xff] }
 0x278   : > { %v2584_v17 = vmul.f32 %v6725_v52, %v3164_v25  ;;  %v2585_v55 = vmul.f32 %v6725_v52, %v3165_v62  ;;  %v2688_v5 = vmul.f32 %v5983_v30, %v3268_v59  ;;  %v2689_v49 = vmul.f32 %v5983_v30, %v3269_v41 }
 0x279   : > { %v3367_v13 = vpack.c.bf16 %v3341_v63, %v3340_v51  ;;  %v3030_v60 = vadd.f32 %v2998_v15, %v2926_v33  ;;  %v3031_v56 = vadd.f32 %v2999_v27, %v2927_v0  ;;  %v2792_v26 = vmul.f32 %v5988_v6, %v3062_v48  ;;  %v3272_v51 = vld [vmem:[#allocation2 + $0x129] sm:$0xff]  ;;  %v3273_v27 = vld [vmem:[#allocation2 + $0x131] sm:$0xff] }
 0x27a   : > { %v2616_v8 = vadd.f32 %v2584_v17, %v2512_v47  ;;  %v2617_v14 = vadd.f32 %v2585_v55, %v2513_v61  ;;  %v2793_v2 = vmul.f32 %v5988_v6, %v3063_v43  ;;  %v3206_v25 = vmul.f32 %v6723_v42, %v3166_v28 }
 0x27b   : > { %3927 = vmatmul.mubr.msk.bf16.gmra.mxu1 %vm553_vm3, %v3367_v13  ;;  %v3134_v36 = vadd.f32 %v3102_v19, %v3030_v60  ;;  %v3135_v11 = vadd.f32 %v3103_v21, %v3031_v56  ;;  %v3207_v62 = vmul.f32 %v6723_v42, %v3167_v20  ;;  %v3310_v59 = vmul.f32 %v6726_v37, %v3270_v31  ;;  %v6310_v21 = vld [vmem:[%s6642_s4 + $0x1] ss:$0 sm:$0xff]  ;;  %v6321_v60 = vld [vmem:[#allocation2 + $0x147] sm:$0xff] }
 0x27c   : > { %v3311_v58 = vmul.f32 %v6726_v37, %v3271_v44  ;;  %v2720_v34 = vadd.f32 %v2688_v5, %v2616_v8  ;;  %v2721_v10 = vadd.f32 %v2689_v49, %v2617_v14  ;;  %v2896_v22 = vmul.f32 %v5999_v7, %v3166_v28  ;;  %v3067_v14 = vld [vmem:[#allocation2 + $0x14f] sm:$0xff] }
 0x27d   : > { %v3238_v41 = vadd.f32 %v3206_v25, %v3134_v36  ;;  %v3239_v4 = vadd.f32 %v3207_v62, %v3135_v11  ;;  %v2897_v50 = vmul.f32 %v5999_v7, %v3167_v20  ;;  %v3000_v1 = vmul.f32 %v6017_v32, %v3270_v31 }
 0x27e   : > { %v2824_v9 = vadd.f32 %v2792_v26, %v2720_v34  ;;  %v2825_v57 = vadd.f32 %v2793_v2, %v2721_v10  ;;  %v3001_v24 = vmul.f32 %v6017_v32, %v3271_v44  ;;  %v3104_v16 = vmul.f32 %v6031_v38, %v3064_v40 }
 0x27f   : > { %v3342_v53 = vadd.f32 %v3310_v59, %v3238_v41  ;;  %v3343_v12 = vadd.f32 %v3311_v58, %v3239_v4  ;;  %v3105_v45 = vmul.f32 %v6031_v38, %v3065_v39  ;;  %v2514_v23 = vmul.f32 %v6302_v29, %v3062_v48  ;;  %v3170_v58 = vld [vmem:[#allocation2 + $0x148] sm:$0xff] }
 0x280   : > { %v2928_v46 = vadd.f32 %v2896_v22, %v2824_v9  ;;  %v2929_v3 = vadd.f32 %v2897_v50, %v2825_v57  ;;  %v2515_v35 = vmul.f32 %v6302_v29, %v3063_v43  ;;  %v2586_v19 = vmul.f32 %v6725_v52, %v3166_v28  ;;  %v3171_v9 = vld [vmem:[#allocation2 + $0x150] sm:$0xff] }
 0x281   : > { %v3368_v15 = vpack.c.bf16 %v3343_v12, %v3342_v53  ;;  %v2587_v63 = vmul.f32 %v6310_v21, %v3167_v20  ;;  %v2690_v33 = vmul.f32 %v5983_v30, %v3270_v31  ;;  %v3208_v48 = vmul.f32 %v6723_v42, %v3168_v54  ;;  %v3274_v12 = vld [vmem:[#allocation2 + $0x149] sm:$0xff] }
 0x282   : > { %v3032_v0 = vadd.f32 %v3000_v1, %v2928_v46  ;;  %v3033_v47 = vadd.f32 %v3001_v24, %v2929_v3  ;;  %v3209_v43 = vmul.f32 %v6723_v42, %v3169_v18  ;;  %v2618_v61 = vadd.f32 %v2586_v19, %v2514_v23  ;;  %v3275_v23 = vld [vmem:[#allocation2 + $0x151] sm:$0xff] }
 0x283   : > { %3930 = vmatprep.mubr.msk.bf16.mxu1 %vm553_vm3, %v3368_v15  ;;  %v2619_v17 = vadd.f32 %v2587_v63, %v2515_v35  ;;  %v2691_v52 = vmul.f32 %v5983_v30, %v3271_v44  ;;  %v2795_v28 = vmul.f32 %v5988_v6, %v3065_v39  ;;  %v3312_v20 = vmul.f32 %v6726_v37, %v3272_v51  ;;  %v6344_v15 = vld [vmem:[%s6642_s4 + $0x2] ss:$0 sm:$0xff] }
 0x284   : > { %v3136_v55 = vadd.f32 %v3104_v16, %v3032_v0  ;;  %v3137_v5 = vadd.f32 %v3105_v45, %v3033_v47  ;;  %v3313_v13 = vmul.f32 %v6726_v37, %v3273_v27  ;;  %v2722_v56 = vadd.f32 %v2690_v33, %v2618_v61  ;;  %v6354_v0 = vld [vmem:[#allocation2 + $0x167] sm:$0xff]  ;;  %v6356_v47 = vld [vmem:[#allocation2 + $0x16f] sm:$0xff] }
 0x285   : > { %v2723_v31 = vadd.f32 %v2691_v52, %v2619_v17  ;;  %v2794_v49 = vmul.f32 %v5988_v6, %v3064_v40  ;;  %v2898_v8 = vmul.f32 %v5999_v7, %v3168_v54  ;;  %v2899_v44 = vmul.f32 %v5999_v7, %v3169_v18 }
 0x286   : > { %v3240_v26 = vadd.f32 %v3208_v48, %v3136_v55  ;;  %v3241_v2 = vadd.f32 %v3209_v43, %v3137_v5  ;;  %v3002_v36 = vmul.f32 %v6017_v32, %v3272_v51  ;;  %v3003_v62 = vmul.f32 %v6017_v32, %v3273_v27 }
 0x287   : > { %v2826_v11 = vadd.f32 %v2794_v49, %v2722_v56  ;;  %v2827_v25 = vadd.f32 %v2795_v28, %v2723_v31  ;;  %v3106_v59 = vmul.f32 %v6031_v38, %v6321_v60  ;;  %v3107_v41 = vmul.f32 %v6031_v38, %v3067_v14 }
 0x288   : > { %v3344_v34 = vadd.f32 %v3312_v20, %v3240_v26  ;;  %v3345_v10 = vadd.f32 %v3313_v13, %v3241_v2  ;;  %v2516_v4 = vmul.f32 %v6302_v29, %v3064_v40  ;;  %v2517_v57 = vmul.f32 %v6302_v29, %v3065_v39  ;;  %v3173_v2 = vld [vmem:[#allocation2 + $0x170] sm:$0xff] }
 0x289   : > { %v2930_v22 = vadd.f32 %v2898_v8, %v2826_v11  ;;  %v2931_v50 = vadd.f32 %v2899_v44, %v2827_v25  ;;  %v2588_v1 = vmul.f32 %v6310_v21, %v3168_v54  ;;  %v3210_v53 = vmul.f32 %v6723_v42, %v3170_v58  ;;  %v3276_v44 = vld [vmem:[#allocation2 + $0x169] sm:$0xff] }
 0x28a   : > { %v3369_v24 = vpack.c.bf16 %v3345_v10, %v3344_v34  ;;  %v2589_v16 = vmul.f32 %v6310_v21, %v3169_v18  ;;  %v2692_v45 = vmul.f32 %v5983_v30, %v3272_v51  ;;  %v2796_v40 = vmul.f32 %v5988_v6, %v6321_v60  ;;  %v6350_v30 = vld [vmem:[%s6642_s4 + $0x3] ss:$0 sm:$0xff]  ;;  %v3277_v10 = vld [vmem:[#allocation2 + $0x171] sm:$0xff] }
 0x28b   : > { %v3034_v46 = vadd.f32 %v3002_v36, %v2930_v22  ;;  %v3035_v3 = vadd.f32 %v3003_v62, %v2931_v50  ;;  %v2620_v35 = vadd.f32 %v2588_v1, %v2516_v4  ;;  %v3211_v39 = vmul.f32 %v6723_v42, %v3171_v9 }
 0x28c   : > { %3931 = vmatmul.mubr.msk.bf16.gmra.mxu1 %vm553_vm3, %v3369_v24  ;;  %v2621_v54 = vadd.f32 %v2589_v16, %v2517_v57  ;;  %v2693_v18 = vmul.f32 %v6344_v15, %v3273_v27  ;;  %v2797_v51 = vmul.f32 %v6350_v30, %v3067_v14  ;;  %v3314_v63 = vmul.f32 %v6726_v37, %v3274_v12  ;;  %v6394_v16 = vld [vmem:[#allocation2 + $0x18f] sm:$0xff] }
 0x28d   : > { %v3138_v6 = vadd.f32 %v3106_v59, %v3034_v46  ;;  %v3139_v19 = vadd.f32 %v3107_v41, %v3035_v3  ;;  %v2724_v33 = vadd.f32 %v2692_v45, %v2620_v35  ;;  %v3315_v48 = vmul.f32 %v6726_v37, %v3275_v23  ;;  %v3172_v37 = vld [vmem:[#allocation2 + $0x168] sm:$0xff]  ;;  %v6400_v3 = vld [vmem:[%s6642_s4 + $0x4] ss:$0 sm:$0xff] }
 0x28e   : > { %v2725_v43 = vadd.f32 %v2693_v18, %v2621_v54  ;;  %v2900_v27 = vmul.f32 %v5999_v7, %v3170_v58  ;;  %v2901_v61 = vmul.f32 %v5999_v7, %v3171_v9  ;;  %v3004_v55 = vmul.f32 %v6017_v32, %v3274_v12  ;;  %v6407_v18 = vld [vmem:[%s6642_s4 + $0x5] ss:$0 sm:$0xff] }
 0x28f   : > { %v3242_v17 = vadd.f32 %v3210_v53, %v3138_v6  ;;  %v3243_v52 = vadd.f32 %v3211_v39, %v3139_v19  ;;  %v2828_v28 = vadd.f32 %v2796_v40, %v2724_v33  ;;  %v3005_v20 = vmul.f32 %v6017_v32, %v3275_v23 }
 0x290   : > { %v2829_v5 = vadd.f32 %v2797_v51, %v2725_v43  ;;  %v3108_v13 = vmul.f32 %v6031_v38, %v6354_v0  ;;  %v3109_v56 = vmul.f32 %v6031_v38, %v6356_v47  ;;  %v2518_v7 = vmul.f32 %v6302_v29, %v6321_v60 }
 0x291   : > { %v3346_v31 = vadd.f32 %v3314_v63, %v3242_v17  ;;  %v3347_v49 = vadd.f32 %v3315_v48, %v3243_v52  ;;  %v2932_v8 = vadd.f32 %v2900_v27, %v2828_v28  ;;  %v2519_v36 = vmul.f32 %v6302_v29, %v3067_v14  ;;  %v6379_v14 = vld [vmem:[%s6642_s4 + $0x7] ss:$0 sm:$0xff]  ;;  %v6414_v63 = vld [vmem:[%s6642_s4 + $0x6] ss:$0 sm:$0xff]  ;;  %v3174_v52 = vld [vmem:[#allocation2 + $0x188] sm:$0xff] }
 0x292   : > { %v2933_v26 = vadd.f32 %v2901_v61, %v2829_v5  ;;  %v2590_v32 = vmul.f32 %v6310_v21, %v3170_v58  ;;  %v2591_v11 = vmul.f32 %v6310_v21, %v3171_v9  ;;  %v3212_v38 = vmul.f32 %v6723_v42, %v3172_v37  ;;  %v6385_v42 = vld [vmem:[%s6642_s4 + $0x8] ss:$0 sm:$0xff]  ;;  %v3175_v28 = vld [vmem:[#allocation2 + $0x190] sm:$0xff] }
 0x293   : > { %v3370_v25 = vpack.c.bf16 %v3347_v49, %v3346_v31  ;;  %v3036_v62 = vadd.f32 %v3004_v55, %v2932_v8  ;;  %v2694_v59 = vmul.f32 %v6344_v15, %v3274_v12  ;;  %v2695_v60 = vmul.f32 %v6344_v15, %v3275_v23  ;;  %v6392_v12 = vld [vmem:[#allocation2 + $0x187] sm:$0xff] }
 0x294   : > { %v3037_v34 = vadd.f32 %v3005_v20, %v2933_v26  ;;  %v2622_v41 = vadd.f32 %v2590_v32, %v2518_v7  ;;  %v2623_v4 = vadd.f32 %v2591_v11, %v2519_v36  ;;  %v3213_v58 = vmul.f32 %v6379_v14, %v3173_v2  ;;  %v3278_v8 = vld [vmem:[#allocation2 + $0x189] sm:$0xff]  ;;  %v3279_v7 = vld [vmem:[#allocation2 + $0x191] sm:$0xff] }
 0x295   : > { %3934 = vmatprep.mubr.msk.bf16.mxu1 %vm553_vm3, %v3370_v25  ;;  %v3140_v22 = vadd.f32 %v3108_v13, %v3036_v62  ;;  %v3316_v50 = vmul.f32 %v6385_v42, %v3276_v44  ;;  %v2799_v9 = vmul.f32 %v6350_v30, %v6356_v47  ;;  %v2798_v53 = vmul.f32 %v6350_v30, %v6354_v0 }
 0x296   : > { %v3141_v57 = vadd.f32 %v3109_v56, %v3037_v34  ;;  %v2726_v1 = vadd.f32 %v2694_v59, %v2622_v41  ;;  %v2727_v24 = vadd.f32 %v2695_v60, %v2623_v4  ;;  %v3317_v46 = vmul.f32 %v6385_v42, %v3277_v10  ;;  %v3072_v34 = vld [vmem:[#allocation2 + $0x1a7] sm:$0xff] }
 0x297   : > { %v3244_v45 = vadd.f32 %v3212_v38, %v3140_v22  ;;  %v2902_v23 = vmul.f32 %v6400_v3, %v3172_v37  ;;  %v2903_v35 = vmul.f32 %v6400_v3, %v3173_v2  ;;  %v3006_v51 = vmul.f32 %v6407_v18, %v3276_v44 }
 0x298   : > { %v3245_v40 = vadd.f32 %v3213_v58, %v3141_v57  ;;  %v2830_v39 = vadd.f32 %v2798_v53, %v2726_v1  ;;  %v2831_v54 = vadd.f32 %v2799_v9, %v2727_v24  ;;  %v3007_v19 = vmul.f32 %v6407_v18, %v3277_v10 }
 0x299   : > { %v3348_v6 = vadd.f32 %v3316_v50, %v3244_v45  ;;  %v3110_v33 = vmul.f32 %v6414_v63, %v6392_v12  ;;  %v3111_v48 = vmul.f32 %v6414_v63, %v6394_v16  ;;  %v2520_v17 = vmul.f32 %v6302_v29, %v6354_v0 }
 0x29a   : > { %v3349_v43 = vadd.f32 %v3317_v46, %v3245_v40  ;;  %v2934_v27 = vadd.f32 %v2902_v23, %v2830_v39  ;;  %v2935_v61 = vadd.f32 %v2903_v35, %v2831_v54  ;;  %v2521_v55 = vmul.f32 %v6302_v29, %v6356_v47  ;;  %v3176_v46 = vld [vmem:[#allocation2 + $0x1a8] sm:$0xff]  ;;  %v3177_v23 = vld [vmem:[#allocation2 + $0x1b0] sm:$0xff] }
 0x29b   : > { %v2592_v5 = vmul.f32 %v6310_v21, %v3172_v37  ;;  %v2593_v20 = vmul.f32 %v6310_v21, %v3173_v2  ;;  %v2696_v13 = vmul.f32 %v6344_v15, %v3276_v44  ;;  %v2697_v26 = vmul.f32 %v6344_v15, %v3277_v10  ;;  %v3073_v10 = vld [vmem:[#allocation2 + $0x1af] sm:$0xff] }
 0x29c   : > { %v3371_v56 = vpack.c.bf16 %v3349_v43, %v3348_v6  ;;  %v3038_v31 = vadd.f32 %v3006_v51, %v2934_v27  ;;  %v3039_v49 = vadd.f32 %v3007_v19, %v2935_v61  ;;  %v2800_v32 = vmul.f32 %v6350_v30, %v6392_v12  ;;  %v3280_v6 = vld [vmem:[#allocation2 + $0x1a9] sm:$0xff]  ;;  %v3281_v19 = vld [vmem:[#allocation2 + $0x1b1] sm:$0xff] }
 0x29d   : > { %v2624_v36 = vadd.f32 %v2592_v5, %v2520_v17  ;;  %v2625_v0 = vadd.f32 %v2593_v20, %v2521_v55  ;;  %v2801_v47 = vmul.f32 %v6350_v30, %v6394_v16  ;;  %v3214_v44 = vmul.f32 %v6379_v14, %v3174_v52 }
 0x29e   : > { %3935 = vmatmul.mubr.msk.bf16.gmra.mxu1 %vm553_vm3, %v3371_v56  ;;  %v3142_v37 = vadd.f32 %v3110_v33, %v3038_v31  ;;  %v3143_v2 = vadd.f32 %v3111_v48, %v3039_v49  ;;  %v3215_v11 = vmul.f32 %v6379_v14, %v3175_v28  ;;  %v3318_v25 = vmul.f32 %v6385_v42, %v3278_v8  ;;  %v3074_v31 = vld [vmem:[#allocation2 + $0x1c7] sm:$0xff] }
 0x29f   : > { %v3319_v62 = vmul.f32 %v6385_v42, %v3279_v7  ;;  %v2728_v38 = vadd.f32 %v2696_v13, %v2624_v36  ;;  %v2729_v59 = vadd.f32 %v2697_v26, %v2625_v0  ;;  %v2904_v60 = vmul.f32 %v6400_v3, %v3174_v52  ;;  %v3075_v0 = vld [vmem:[#allocation2 + $0x1cf] sm:$0xff] }
 0x2a0   : > { %v3246_v41 = vadd.f32 %v3214_v44, %v3142_v37  ;;  %v3247_v4 = vadd.f32 %v3215_v11, %v3143_v2  ;;  %v2905_v22 = vmul.f32 %v6400_v3, %v3175_v28  ;;  %v3008_v9 = vmul.f32 %v6407_v18, %v3278_v8 }
 0x2a1   : > { %v2832_v58 = vadd.f32 %v2800_v32, %v2728_v38  ;;  %v2833_v50 = vadd.f32 %v2801_v47, %v2729_v59  ;;  %v3009_v57 = vmul.f32 %v6407_v18, %v3279_v7  ;;  %v3112_v53 = vmul.f32 %v6414_v63, %v3072_v34 }
 0x2a2   : > { %v3350_v1 = vadd.f32 %v3318_v25, %v3246_v41  ;;  %v3351_v24 = vadd.f32 %v3319_v62, %v3247_v4  ;;  %v3113_v45 = vmul.f32 %v6414_v63, %v3073_v10  ;;  %v2522_v39 = vmul.f32 %v6302_v29, %v6392_v12  ;;  %v3178_v62 = vld [vmem:[#allocation2 + $0x1c8] sm:$0xff] }
 0x2a3   : > { %v2936_v35 = vadd.f32 %v2904_v60, %v2832_v58  ;;  %v2937_v40 = vadd.f32 %v2905_v22, %v2833_v50  ;;  %v2523_v54 = vmul.f32 %v6302_v29, %v6394_v16  ;;  %v2594_v33 = vmul.f32 %v6310_v21, %v3174_v52  ;;  %v3179_v58 = vld [vmem:[#allocation2 + $0x1d0] sm:$0xff] }
 0x2a4   : > { %v3372_v51 = vpack.c.bf16 %v3351_v24, %v3350_v1  ;;  %v2595_v48 = vmul.f32 %v6310_v21, %v3175_v28  ;;  %v2698_v43 = vmul.f32 %v6344_v15, %v3278_v8  ;;  %v3216_v17 = vmul.f32 %v6379_v14, %v3176_v46  ;;  %v3282_v24 = vld [vmem:[#allocation2 + $0x1c9] sm:$0xff] }
 0x2a5   : > { %v3040_v27 = vadd.f32 %v3008_v9, %v2936_v35  ;;  %v3041_v61 = vadd.f32 %v3009_v57, %v2937_v40  ;;  %v3217_v55 = vmul.f32 %v6379_v14, %v3177_v23  ;;  %v2626_v12 = vadd.f32 %v2594_v33, %v2522_v39  ;;  %v3283_v39 = vld [vmem:[#allocation2 + $0x1d1] sm:$0xff] }
 0x2a6   : > { %3938 = vmatprep.mubr.msk.bf16.mxu1 %vm553_vm3, %v3372_v51  ;;  %v2627_v5 = vadd.f32 %v2595_v48, %v2523_v54  ;;  %v2699_v16 = vmul.f32 %v6344_v15, %v3279_v7  ;;  %v2803_v20 = vmul.f32 %v6350_v30, %v3073_v10  ;;  %v3320_v28 = vmul.f32 %v6385_v42, %v3280_v6 }
 0x2a7   : > { %v3144_v13 = vadd.f32 %v3112_v53, %v3040_v27  ;;  %v3145_v52 = vadd.f32 %v3113_v45, %v3041_v61  ;;  %v3321_v56 = vmul.f32 %v6385_v42, %v3281_v19  ;;  %v2730_v49 = vadd.f32 %v2698_v43, %v2626_v12  ;;  %v3076_v27 = vld [vmem:[#allocation2 + $0x1e7] sm:$0xff]  ;;  %v3077_v61 = vld [vmem:[#allocation2 + $0x1ef] sm:$0xff] }
 0x2a8   : > { %v2731_v8 = vadd.f32 %v2699_v16, %v2627_v5  ;;  %v2802_v26 = vmul.f32 %v6350_v30, %v3072_v34  ;;  %v2906_v36 = vmul.f32 %v6400_v3, %v3176_v46  ;;  %v2907_v7 = vmul.f32 %v6400_v3, %v3177_v23 }
 0x2a9   : > { %v3248_v32 = vadd.f32 %v3216_v17, %v3144_v13  ;;  %v3249_v47 = vadd.f32 %v3217_v55, %v3145_v52  ;;  %v3010_v37 = vmul.f32 %v6407_v18, %v3280_v6  ;;  %v3011_v11 = vmul.f32 %v6407_v18, %v3281_v19 }
 0x2aa   : > { %v2834_v2 = vadd.f32 %v2802_v26, %v2730_v49  ;;  %v2835_v44 = vadd.f32 %v2803_v20, %v2731_v8  ;;  %v3114_v25 = vmul.f32 %v6414_v63, %v3074_v31  ;;  %v3115_v41 = vmul.f32 %v6414_v63, %v3075_v0  ;;  %v3180_v8 = vld [vmem:[#allocation2 + $0x1e8] sm:$0xff] }
 0x2ab   : > { %v3352_v38 = vadd.f32 %v3320_v28, %v3248_v32  ;;  %v3353_v59 = vadd.f32 %v3321_v56, %v3249_v47  ;;  %v2524_v4 = vmul.f32 %v6302_v29, %v3072_v34  ;;  %v2525_v50 = vmul.f32 %v6302_v29, %v3073_v10 }
 0x2ac   : > { %v2938_v60 = vadd.f32 %v2906_v36, %v2834_v2  ;;  %v2939_v22 = vadd.f32 %v2907_v7, %v2835_v44  ;;  %v2596_v9 = vmul.f32 %v6310_v21, %v3176_v46  ;;  %v3218_v1 = vmul.f32 %v6379_v14, %v3178_v62  ;;  %v3284_v2 = vld [vmem:[#allocation2 + $0x1e9] sm:$0xff] }
 0x2ad   : > { %v3373_v57 = vpack.c.bf16 %v3353_v59, %v3352_v38  ;;  %v2597_v53 = vmul.f32 %v6310_v21, %v3177_v23  ;;  %v2700_v45 = vmul.f32 %v6344_v15, %v3280_v6  ;;  %v2804_v34 = vmul.f32 %v6350_v30, %v3074_v31 }
 0x2ae   : > { %v3042_v35 = vadd.f32 %v3010_v37, %v2938_v60  ;;  %v3043_v40 = vadd.f32 %v3011_v11, %v2939_v22  ;;  %v2628_v54 = vadd.f32 %v2596_v9, %v2524_v4  ;;  %v3219_v10 = vmul.f32 %v6379_v14, %v3179_v58  ;;  %v3181_v37 = vld [vmem:[#allocation2 + $0x1f0] sm:$0xff] }
 0x2af   : > { %3939 = vmatmul.mubr.msk.bf16.gmra.mxu1 %vm553_vm3, %v3373_v57  ;;  %v2629_v51 = vadd.f32 %v2597_v53, %v2525_v50  ;;  %v2701_v46 = vmul.f32 %v6344_v15, %v3281_v19  ;;  %v2805_v33 = vmul.f32 %v6350_v30, %v3075_v0  ;;  %v3322_v23 = vmul.f32 %v6385_v42, %v3282_v24  ;;  %v3285_v22 = vld [vmem:[#allocation2 + $0x1f1] sm:$0xff] }
 0x2b0   : > { %v3146_v48 = vadd.f32 %v3114_v25, %v3042_v35  ;;  %v3147_v43 = vadd.f32 %v3115_v41, %v3043_v40  ;;  %v2732_v6 = vadd.f32 %v2700_v45, %v2628_v54  ;;  %v3323_v17 = vmul.f32 %v6385_v42, %v3283_v39  ;;  %v3078_v35 = vld [vmem:[#allocation2 + $0x207] sm:$0xff]  ;;  %v3079_v40 = vld [vmem:[#allocation2 + $0x20f] sm:$0xff] }
 0x2b1   : > { %v2733_v55 = vadd.f32 %v2701_v46, %v2629_v51  ;;  %v2908_v12 = vmul.f32 %v6400_v3, %v3178_v62  ;;  %v2909_v5 = vmul.f32 %v6400_v3, %v3179_v58  ;;  %v3012_v19 = vmul.f32 %v6407_v18, %v3282_v24 }
 0x2b2   : > { %v3250_v16 = vadd.f32 %v3218_v1, %v3146_v48  ;;  %v3251_v20 = vadd.f32 %v3219_v10, %v3147_v43  ;;  %v2836_v13 = vadd.f32 %v2804_v34, %v2732_v6  ;;  %v3013_v28 = vmul.f32 %v6407_v18, %v3283_v39 }
 0x2b3   : > { %v2837_v52 = vadd.f32 %v2805_v33, %v2733_v55  ;;  %v3116_v56 = vmul.f32 %v6414_v63, %v3076_v27  ;;  %v3117_v49 = vmul.f32 %v6414_v63, %v3077_v61  ;;  %v2526_v47 = vmul.f32 %v6302_v29, %v3074_v31 }
 0x2b4   : > { %v3354_v26 = vadd.f32 %v3322_v23, %v3250_v16  ;;  %v3355_v36 = vadd.f32 %v3323_v17, %v3251_v20  ;;  %v2940_v32 = vadd.f32 %v2908_v12, %v2836_v13  ;;  %v2527_v44 = vmul.f32 %v6302_v29, %v3075_v0  ;;  %v3182_v20 = vld [vmem:[#allocation2 + $0x208] sm:$0xff]  ;;  %v3183_v13 = vld [vmem:[#allocation2 + $0x210] sm:$0xff] }
 0x2b5   : > { %v2941_v7 = vadd.f32 %v2909_v5, %v2837_v52  ;;  %v2598_v11 = vmul.f32 %v6310_v21, %v3178_v62  ;;  %v2599_v25 = vmul.f32 %v6310_v21, %v3179_v58  ;;  %v3220_v41 = vmul.f32 %v6379_v14, %v3180_v8 }
 0x2b6   : > { %v3374_v38 = vpack.c.bf16 %v3355_v36, %v3354_v26  ;;  %v3044_v59 = vadd.f32 %v3012_v19, %v2940_v32  ;;  %v2702_v4 = vmul.f32 %v6344_v15, %v3282_v24  ;;  %v2703_v31 = vmul.f32 %v6344_v15, %v3283_v39 }
 0x2b7   : > { %v3045_v60 = vadd.f32 %v3013_v28, %v2941_v7  ;;  %v2630_v50 = vadd.f32 %v2598_v11, %v2526_v47  ;;  %v2631_v9 = vadd.f32 %v2599_v25, %v2527_v44  ;;  %v3221_v0 = vmul.f32 %v6379_v14, %v3181_v37  ;;  %v3286_v47 = vld [vmem:[#allocation2 + $0x209] sm:$0xff]  ;;  %v3287_v7 = vld [vmem:[#allocation2 + $0x211] sm:$0xff] }
 0x2b8   : > { %3942 = vmatprep.mubr.msk.bf16.mxu1 %vm553_vm3, %v3374_v38  ;;  %v3148_v57 = vadd.f32 %v3116_v56, %v3044_v59  ;;  %v3324_v62 = vmul.f32 %v6385_v42, %v3284_v2  ;;  %v2807_v58 = vmul.f32 %v6350_v30, %v3077_v61  ;;  %v2806_v24 = vmul.f32 %v6350_v30, %v3076_v27 }
 0x2b9   : > { %v3149_v1 = vadd.f32 %v3117_v49, %v3045_v60  ;;  %v2734_v53 = vadd.f32 %v2702_v4, %v2630_v50  ;;  %v2735_v45 = vadd.f32 %v2703_v31, %v2631_v9  ;;  %v3325_v34 = vmul.f32 %v6385_v42, %v3285_v22  ;;  %v3080_v4 = vld [vmem:[#allocation2 + $0x227] sm:$0xff]  ;;  %v3081_v60 = vld [vmem:[#allocation2 + $0x22f] sm:$0xff] }
 0x2ba   : > { %v3252_v54 = vadd.f32 %v3220_v41, %v3148_v57  ;;  %v2910_v39 = vmul.f32 %v6400_v3, %v3180_v8  ;;  %v2911_v10 = vmul.f32 %v6400_v3, %v3181_v37  ;;  %v3014_v48 = vmul.f32 %v6407_v18, %v3284_v2 }
 0x2bb   : > { %v3253_v51 = vadd.f32 %v3221_v0, %v3149_v1  ;;  %v2838_v46 = vadd.f32 %v2806_v24, %v2734_v53  ;;  %v2839_v33 = vadd.f32 %v2807_v58, %v2735_v45  ;;  %v3015_v23 = vmul.f32 %v6407_v18, %v3285_v22  ;;  %v3184_v58 = vld [vmem:[#allocation2 + $0x228] sm:$0xff]  ;;  %v3185_v1 = vld [vmem:[#allocation2 + $0x230] sm:$0xff] }
 0x2bc   : > { %v3356_v43 = vadd.f32 %v3324_v62, %v3252_v54  ;;  %v3118_v6 = vmul.f32 %v6414_v63, %v3078_v35  ;;  %v3119_v17 = vmul.f32 %v6414_v63, %v3079_v40  ;;  %v2528_v16 = vmul.f32 %v6302_v29, %v3076_v27  ;;  %v3288_v54 = vld [vmem:[#allocation2 + $0x229] sm:$0xff] }
 0x2bd   : > { %v3357_v55 = vadd.f32 %v3325_v34, %v3253_v51  ;;  %v2942_v12 = vadd.f32 %v2910_v39, %v2838_v46  ;;  %v2943_v5 = vadd.f32 %v2911_v10, %v2839_v33  ;;  %v2529_v19 = vmul.f32 %v6302_v29, %v3077_v61  ;;  %v3289_v34 = vld [vmem:[#allocation2 + $0x231] sm:$0xff] }
 0x2be   : > { %v2600_v52 = vmul.f32 %v6310_v21, %v3180_v8  ;;  %v2601_v28 = vmul.f32 %v6310_v21, %v3181_v37  ;;  %v2704_v56 = vmul.f32 %v6344_v15, %v3284_v2  ;;  %v2705_v32 = vmul.f32 %v6344_v15, %v3285_v22 }
 0x2bf   : > { %v3375_v49 = vpack.c.bf16 %v3357_v55, %v3356_v43  ;;  %v3046_v26 = vadd.f32 %v3014_v48, %v2942_v12  ;;  %v3047_v36 = vadd.f32 %v3015_v23, %v2943_v5  ;;  %v2808_v27 = vmul.f32 %v6350_v30, %v3078_v35  ;;  %v6530_v55 = vld [vmem:[%s6644_s6] ss:$0 sm:$0xff] }
 0x2c0   : > { %v2632_v44 = vadd.f32 %v2600_v52, %v2528_v16  ;;  %v2633_v11 = vadd.f32 %v2601_v28, %v2529_v19  ;;  %v2809_v25 = vmul.f32 %v6350_v30, %v3079_v40  ;;  %v3222_v21 = vmul.f32 %v6379_v14, %v3182_v20 }
 0x2c1   : > { %3943 = vmatmul.mubr.msk.bf16.gmra.mxu1 %vm553_vm3, %v3375_v49  ;;  %v3150_v29 = vadd.f32 %v3118_v6, %v3046_v26  ;;  %v3151_v61 = vadd.f32 %v3119_v17, %v3047_v36  ;;  %v3223_v8 = vmul.f32 %v6379_v14, %v3183_v13  ;;  %v3326_v59 = vmul.f32 %v6385_v42, %v3286_v47 }
 0x2c2   : > { %v2736_v37 = vadd.f32 %v2704_v56, %v2632_v44  ;;  %v2737_v2 = vadd.f32 %v2705_v32, %v2633_v11  ;;  %v3327_v41 = vmul.f32 %v6385_v42, %v3287_v7  ;;  %v2912_v50 = vmul.f32 %v6400_v3, %v3182_v20 }
 0x2c3   : > { %v3254_v38 = vadd.f32 %v3222_v21, %v3150_v29  ;;  %v3255_v15 = vadd.f32 %v3223_v8, %v3151_v61  ;;  %v2913_v9 = vmul.f32 %v6400_v3, %v3183_v13  ;;  %v3016_v0 = vmul.f32 %v6407_v18, %v3286_v47 }
 0x2c4   : > { %v2840_v22 = vadd.f32 %v2808_v27, %v2736_v37  ;;  %v2841_v30 = vadd.f32 %v2809_v25, %v2737_v2  ;;  %v3017_v62 = vmul.f32 %v6407_v18, %v3287_v7  ;;  %v3120_v24 = vmul.f32 %v6414_v63, %v3080_v4 }
 0x2c5   : > { %v3358_v31 = vadd.f32 %v3326_v59, %v3254_v38  ;;  %v3359_v57 = vadd.f32 %v3327_v41, %v3255_v15  ;;  %v3121_v35 = vmul.f32 %v6414_v63, %v3081_v60  ;;  %v3224_v10 = vmul.f32 %v6379_v14, %v3184_v58 }
 0x2c6   : > { %v2944_v53 = vadd.f32 %v2912_v50, %v2840_v22  ;;  %v2945_v45 = vadd.f32 %v2913_v9, %v2841_v30  ;;  %v3225_v51 = vmul.f32 %v6379_v14, %v3185_v1  ;;  %v3328_v33 = vmul.f32 %v6385_v42, %v3288_v54 }
 0x2c7   : > { %v3376_v40 = vpack.c.bf16 %v3359_v57, %v3358_v31  ;;  %v3329_v48 = vmul.f32 %v6385_v42, %v3289_v34 }
 0x2c8   : > { %v3048_v39 = vadd.f32 %v3016_v0, %v2944_v53  ;;  %v3049_v3 = vadd.f32 %v3017_v62, %v2945_v45 }
 0x2c9   : > { %3946 = vmatprep.mubr.msk.bf16.mxu1 %vm553_vm3, %v3376_v40 }
 0x2ca   : > { %v3152_v18 = vadd.f32 %v3120_v24, %v3048_v39  ;;  %v3153_v46 = vadd.f32 %v3121_v35, %v3049_v3 }
 0x2cc   : > { %v3256_v43 = vadd.f32 %v3224_v10, %v3152_v18  ;;  %v3257_v63 = vadd.f32 %v3225_v51, %v3153_v46 }
 0x2ce   : > { %v3360_v23 = vadd.f32 %v3328_v33, %v3256_v43  ;;  %v3361_v6 = vadd.f32 %v3329_v48, %v3257_v63 }
 0x2d0   : > { %v3377_v17 = vpack.c.bf16 %v3361_v6, %v3360_v23 }
 0x2d2   : > { %3947 = vmatmul.mubr.msk.bf16.gmra.mxu1 %vm553_vm3, %v3377_v17 }
 0x315   : > { %v3920_v14 = vpop.f32.mrf.mxu1 }
 0x316   : > { %v3492_v42 = vadd.f32 %v3920_v14, %v6530_v55 }
 0x317   : > { %v3483_v12 = vpop.f32.mrf.mxu1 }
 0x318   : > { %3613 = vst.msk [vmem:[%s6537_s11 + $0x10] sm:$0xff] %vm3610_vm6, %v3492_v42  ;;  %v3484_v5 = vadd.f32 %v6530_v55, %v3483_v12 }
 0x319   : > { %v3921_v16 = vpop.f32.mrf.mxu1 }
 0x31a   : > { %3611 = vst.msk [vmem:[%s6537_s11] sm:$0xff] %vm3610_vm6, %v3484_v5  ;;  %v3495_v20 = vadd.f32 %v3921_v16, %v6530_v55 }
 0x31b   : > { %v3486_v13 = vpop.f32.mrf.mxu1 }
 0x31c   : > { %3614 = vst.msk [vmem:[%s6537_s11 + $0x18] sm:$0xff] %vm3610_vm6, %v3495_v20  ;;  %v3487_v19 = vadd.f32 %v6530_v55, %v3486_v13 }
 0x31e   : > { %3612 = vst.msk [vmem:[%s6537_s11 + $0x8] sm:$0xff] %vm3610_vm6, %v3487_v19 }
 0x329   : > { %v3924_v52 = vpop.f32.mrf.mxu1 }
 0x32a   : > { %v3508_v28 = vadd.f32 %v3924_v52, %v6530_v55 }
 0x32b   : > { %v3499_v56 = vpop.f32.mrf.mxu1 }
 0x32c   : > { %3617 = vst.msk [vmem:[%s6537_s11 + $0x30] sm:$0xff] %vm3610_vm6, %v3508_v28  ;;  %v3500_v49 = vadd.f32 %v6530_v55, %v3499_v56 }
 0x32d   : > { %v3925_v26 = vpop.f32.mrf.mxu1 }
 0x32e   : > { %3615 = vst.msk [vmem:[%s6537_s11 + $0x20] sm:$0xff] %vm3610_vm6, %v3500_v49  ;;  %v3511_v36 = vadd.f32 %v3925_v26, %v6530_v55 }
 0x32f   : > { %v3502_v32 = vpop.f32.mrf.mxu1 }
 0x330   : > { %3618 = vst.msk [vmem:[%s6537_s11 + $0x38] sm:$0xff] %vm3610_vm6, %v3511_v36  ;;  %v3503_v47 = vadd.f32 %v6530_v55, %v3502_v32 }
 0x332   : > { %3616 = vst.msk [vmem:[%s6537_s11 + $0x28] sm:$0xff] %vm3610_vm6, %v3503_v47 }
 0x33b   : > { %v3928_v7 = vpop.f32.mrf.mxu1 }
 0x33c   : > { %v3524_v44 = vadd.f32 %v3928_v7, %v6530_v55 }
 0x33d   : > { %v3515_v11 = vpop.f32.mrf.mxu1 }
 0x33e   : > { %3621 = vst.msk [vmem:[%s6537_s11 + $0x50] sm:$0xff] %vm3610_vm6, %v3524_v44  ;;  %v3516_v27 = vadd.f32 %v6530_v55, %v3515_v11 }
 0x33f   : > { %v3929_v25 = vpop.f32.mrf.mxu1 }
 0x340   : > { %3619 = vst.msk [vmem:[%s6537_s11 + $0x40] sm:$0xff] %vm3610_vm6, %v3516_v27  ;;  %v3527_v29 = vadd.f32 %v3929_v25, %v6530_v55 }
 0x341   : > { %v3518_v61 = vpop.f32.mrf.mxu1 }
 0x342   : > { %3622 = vst.msk [vmem:[%s6537_s11 + $0x58] sm:$0xff] %vm3610_vm6, %v3527_v29  ;;  %v3519_v21 = vadd.f32 %v6530_v55, %v3518_v61 }
 0x344   : > { %3620 = vst.msk [vmem:[%s6537_s11 + $0x48] sm:$0xff] %vm3610_vm6, %v3519_v21 }
 0x34c   : > { %v3932_v8 = vpop.f32.mrf.mxu1 }
 0x34d   : > { %v3540_v37 = vadd.f32 %v3932_v8, %v6530_v55 }
 0x34e   : > { %v3531_v2 = vpop.f32.mrf.mxu1 }
 0x34f   : > { %3625 = vst.msk [vmem:[%s6537_s11 + $0x70] sm:$0xff] %vm3610_vm6, %v3540_v37  ;;  %v3532_v38 = vadd.f32 %v6530_v55, %v3531_v2 }
 0x350   : > { %v3933_v15 = vpop.f32.mrf.mxu1 }
 0x351   : > { %3623 = vst.msk [vmem:[%s6537_s11 + $0x60] sm:$0xff] %vm3610_vm6, %v3532_v38  ;;  %v3543_v59 = vadd.f32 %v3933_v15, %v6530_v55 }
 0x352   : > { %v3534_v41 = vpop.f32.mrf.mxu1 }
 0x353   : > { %3626 = vst.msk [vmem:[%s6537_s11 + $0x78] sm:$0xff] %vm3610_vm6, %v3543_v59  ;;  %v3535_v4 = vadd.f32 %v6530_v55, %v3534_v41 }
 0x355   : > { %3624 = vst.msk [vmem:[%s6537_s11 + $0x68] sm:$0xff] %vm3610_vm6, %v3535_v4 }
 0x35e   : > { %v3936_v60 = vpop.f32.mrf.mxu1 }
 0x35f   : > { %v3556_v22 = vadd.f32 %v3936_v60, %v6530_v55 }
 0x360   : > { %v3547_v30 = vpop.f32.mrf.mxu1 }
 0x361   : > { %3629 = vst.msk [vmem:[%s6537_s11 + $0x90] sm:$0xff] %vm3610_vm6, %v3556_v22  ;;  %v3548_v50 = vadd.f32 %v6530_v55, %v3547_v30 }
 0x362   : > { %v3937_v9 = vpop.f32.mrf.mxu1 }
 0x363   : > { %3627 = vst.msk [vmem:[%s6537_s11 + $0x80] sm:$0xff] %vm3610_vm6, %v3548_v50  ;;  %v3559_v31 = vadd.f32 %v3937_v9, %v6530_v55 }
 0x364   : > { %v3550_v57 = vpop.f32.mrf.mxu1 }
 0x365   : > { %3630 = vst.msk [vmem:[%s6537_s11 + $0x98] sm:$0xff] %vm3610_vm6, %v3559_v31  ;;  %v3551_v0 = vadd.f32 %v6530_v55, %v3550_v57 }
 0x367   : > { %3628 = vst.msk [vmem:[%s6537_s11 + $0x88] sm:$0xff] %vm3610_vm6, %v3551_v0 }
 0x36f   : > { %v3940_v62 = vpop.f32.mrf.mxu1 }
 0x370   : > { %v3572_v58 = vadd.f32 %v3940_v62, %v6530_v55 }
 0x371   : > { %v3563_v1 = vpop.f32.mrf.mxu1 }
 0x372   : > { %3633 = vst.msk [vmem:[%s6537_s11 + $0xb0] sm:$0xff] %vm3610_vm6, %v3572_v58  ;;  %v3564_v53 = vadd.f32 %v6530_v55, %v3563_v1 }
 0x373   : > { %v3941_v45 = vpop.f32.mrf.mxu1 }
 0x374   : > { %3631 = vst.msk [vmem:[%s6537_s11 + $0xa0] sm:$0xff] %vm3610_vm6, %v3564_v53  ;;  %v3575_v24 = vadd.f32 %v3941_v45, %v6530_v55 }
 0x375   : > { %v3566_v35 = vpop.f32.mrf.mxu1 }
 0x376   : > { %3634 = vst.msk [vmem:[%s6537_s11 + $0xb8] sm:$0xff] %vm3610_vm6, %v3575_v24  ;;  %v3567_v40 = vadd.f32 %v6530_v55, %v3566_v35 }
 0x378   : > { %3632 = vst.msk [vmem:[%s6537_s11 + $0xa8] sm:$0xff] %vm3610_vm6, %v3567_v40 }
 0x381   : > { %v3944_v54 = vpop.f32.mrf.mxu1 }
 0x382   : > { %v3588_v34 = vadd.f32 %v3944_v54, %v6530_v55 }
 0x383   : > { %v3579_v39 = vpop.f32.mrf.mxu1 }
 0x384   : > { %3637 = vst.msk [vmem:[%s6537_s11 + $0xd0] sm:$0xff] %vm3610_vm6, %v3588_v34  ;;  %v3580_v3 = vadd.f32 %v6530_v55, %v3579_v39 }
 0x385   : > { %v3945_v10 = vpop.f32.mrf.mxu1 }
 0x386   : > { %3635 = vst.msk [vmem:[%s6537_s11 + $0xc0] sm:$0xff] %vm3610_vm6, %v3580_v3  ;;  %v3591_v51 = vadd.f32 %v3945_v10, %v6530_v55 }
 0x387   : > { %v3582_v18 = vpop.f32.mrf.mxu1 }
 0x388   : > { %3638 = vst.msk [vmem:[%s6537_s11 + $0xd8] sm:$0xff] %vm3610_vm6, %v3591_v51  ;;  %v3583_v46 = vadd.f32 %v6530_v55, %v3582_v18 }
 0x38a   : > { %3636 = vst.msk [vmem:[%s6537_s11 + $0xc8] sm:$0xff] %vm3610_vm6, %v3583_v46 }
 0x392   : > { %v3948_v33 = vpop.f32.mrf.mxu1 }
 0x393   : > { %v3604_v48 = vadd.f32 %v3948_v33, %v6530_v55 }
 0x394   : > { %v3595_v43 = vpop.f32.mrf.mxu1 }
 0x395   : > { %3641 = vst.msk [vmem:[%s6537_s11 + $0xf0] sm:$0xff] %vm3610_vm6, %v3604_v48  ;;  %v3596_v63 = vadd.f32 %v6530_v55, %v3595_v43 }
 0x396   : > { %v3949_v23 = vpop.f32.mrf.mxu1 }
 0x397   : > { %3639 = vst.msk [vmem:[%s6537_s11 + $0xe0] sm:$0xff] %vm3610_vm6, %v3596_v63  ;;  %v3607_v6 = vadd.f32 %v3949_v23, %v6530_v55 }
 0x398   : > { %v3598_v17 = vpop.f32.mrf.mxu1 }
 0x399   : > { %3642 = vst.msk [vmem:[%s6537_s11 + $0xf8] sm:$0xff] %vm3610_vm6, %v3607_v6  ;;  %v3599_v14 = vadd.f32 %v6530_v55, %v3598_v17 }
 0x39b   : > { %3640 = vst.msk [vmem:[%s6537_s11 + $0xe8] sm:$0xff] %vm3610_vm6, %v3599_v14 }
 0x39c PF: > { %s17_s24 = sadd.s32 1, %s4124_s24  }
 0x39d   : > { %p14_p4 = scmp.ge.s32.totalorder %s17_s24, 4  }
 0x39f   :  { %16 = sbr.rel (!%p14_p4) target bundleno = 1 (0x1), region = 96 }

</bundles_post_ra>
